<compile_context>
chip_gen: v7x
topology: tpu7x:2x2x1
jax: 0.10.0
libtpu: 0.0.40
codegen_flags: <defaults>
</compile_context>

<pallas_src>
import jax
import jax.numpy as jnp
from jax import lax
from jax.experimental import pallas as pl
from jax.experimental.pallas import tpu as pltpu


# ---------------------------------------------------------------------------
# Fused kernel: all layers + full time recurrence in one invocation.
# ---------------------------------------------------------------------------
def _make_fused_gru_kernel(num_layers: int):
    """Build the fused kernel body.

    Ref order (all full arrays resident in VMEM, no grid):
      gi0    (T, B, 3*H0)  layer-0 input projection, b_ih already folded in
      h0_0   (B, H0)
      whT_0  (H0, 3*H0)    transposed weight_hh, gate order [r | z | n]
      bh_0   (1, 3*H0)
      for l in 1 .. num_layers-1:
        h0_l   (B, H_l)
        wiT_l  (H_{l-1}, 3*H_l)
        bi_l   (1, 3*H_l)
        whT_l  (H_l, 3*H_l)
        bh_l   (1, 3*H_l)
      out    (T, B, H_last)
    """

    def kernel(*refs):
        out_ref = refs[-1]
        gi0_ref = refs[0]
        T = gi0_ref.shape[0]

        def cell(gi, gh, h, H):
            # PyTorch GRU gate order along the 3H axis: [r | z | n].
            r = jax.nn.sigmoid(gi[:, :H] + gh[:, :H])
            z = jax.nn.sigmoid(gi[:, H:2 * H] + gh[:, H:2 * H])
            n = jnp.tanh(gi[:, 2 * H:] + r * gh[:, 2 * H:])
            return n + z * (h - n)          # == (1 - z) * n + z * h

        # -------- layer 0: x-side projection hoisted to the wrapper --------
        h0_ref, wh_ref, bh_ref = refs[1], refs[2], refs[3]
        H = h0_ref.shape[1]
        wh = wh_ref[...]
        bh = bh_ref[...]
        h = h0_ref[...]
        prev = []
        for t in range(T):                  # static unroll: T is small & fixed
            gh = jnp.dot(h, wh, preferred_element_type=jnp.float32) + bh
            h = cell(gi0_ref[t], gh, h, H)
            if num_layers == 1:
                out_ref[t] = h
            else:
                prev.append(h)

        # -------- layers 1..L-1: two small matmuls per step --------
        idx = 4
        for l in range(1, num_layers):
            h0_ref, wi_ref, bi_ref, wh_ref, bh_ref = refs[idx:idx + 5]
            idx += 5
            H = h0_ref.shape[1]
            wi = wi_ref[...]
            bi = bi_ref[...]
            wh = wh_ref[...]
            bh = bh_ref[...]
            h = h0_ref[...]
            cur = []
            last = (l == num_layers - 1)
            for t in range(T):
                gi = jnp.dot(prev[t], wi,
                             preferred_element_type=jnp.float32) + bi
                gh = jnp.dot(h, wh,
                             preferred_element_type=jnp.float32) + bh
                h = cell(gi, gh, h, H)
                if last:
                    out_ref[t] = h          # VMEM store; HBM writeback once
                else:
                    cur.append(h)
            prev = cur

    return kernel


# ---------------------------------------------------------------------------
# Module-level forward (matches DEAP_GRU.forward, eval-mode dropout).
# ---------------------------------------------------------------------------
def deap_gru_forward(x_bct, hidden_list, params):
    """x_bct: (B, input_size, T); hidden_list[i]: (1, B, H_i);
    params[i] = (w_ih (3H, I), w_hh (3H, H), b_ih (3H,), b_hh (3H,)).
    Returns (B, T, 2)."""
    num_layers = len(params)

    # PyTorch: x = transpose(x, 1, 2) -> (B, T, C); we go time-major (T, B, C).
    x = jnp.transpose(x_bct, (2, 0, 1)).astype(jnp.float32)
    T, B, I = x.shape

    # Layer 0 x-side projection hoisted out of the recurrence (one big matmul,
    # fused by XLA with the surrounding transpose/reshape glue).
    w_ih0, w_hh0, b_ih0, b_hh0 = params[0]
    H0 = w_hh0.shape[1]
    gi0 = (x.reshape(T * B, I) @ w_ih0.astype(jnp.float32).T
           + b_ih0.astype(jnp.float32)).reshape(T, B, 3 * H0)

    inputs = [
        gi0,
        hidden_list[0][0].astype(jnp.float32),          # (B, H0)
        w_hh0.astype(jnp.float32).T,                    # (H0, 3H0)
        b_hh0.astype(jnp.float32).reshape(1, 3 * H0),
    ]
    for l in range(1, num_layers):
        w_ih, w_hh, b_ih, b_hh = params[l]
        H = w_hh.shape[1]
        inputs += [
            hidden_list[l][0].astype(jnp.float32),      # (B, H)
            w_ih.astype(jnp.float32).T,                 # (I_l, 3H)
            b_ih.astype(jnp.float32).reshape(1, 3 * H),
            w_hh.astype(jnp.float32).T,                 # (H, 3H)
            b_hh.astype(jnp.float32).reshape(1, 3 * H),
        ]

    H_last = params[-1][1].shape[1]
    vmem = pl.BlockSpec(memory_space=pltpu.MemorySpace.VMEM)
    out_tbf = pl.pallas_call(
        _make_fused_gru_kernel(num_layers),
        out_shape=jax.ShapeDtypeStruct((T, B, H_last), jnp.float32),
        in_specs=[vmem] * len(inputs),
        out_specs=vmem,
    )(*inputs)

    # nn.Dropout(p=0.2) between layers: identity at inference time.
    return jnp.transpose(out_tbf, (1, 0, 2))            # (B, T, 2)


# ---------------------------------------------------------------------------
# Pure-JAX reference (correctness check only).
# ---------------------------------------------------------------------------
def _gru_layer_ref(x_tbf, h0, w_ih, w_hh, b_ih, b_hh):
    H = h0.shape[1]

    def step(h, x_t):
        gi = x_t @ w_ih.T + b_ih
        gh = h @ w_hh.T + b_hh
        r = jax.nn.sigmoid(gi[:, :H] + gh[:, :H])
        z = jax.nn.sigmoid(gi[:, H:2 * H] + gh[:, H:2 * H])
        n = jnp.tanh(gi[:, 2 * H:] + r * gh[:, 2 * H:])
        h_new = (1.0 - z) * n + z * h
        return h_new, h_new

    _, ys = lax.scan(step, h0, x_tbf)
    return ys


def _deap_gru_ref(x_bct, hidden_list, params):
    x = jnp.transpose(x_bct, (2, 0, 1)).astype(jnp.float32)
    for i, (w_ih, w_hh, b_ih, b_hh) in enumerate(params):
        x = _gru_layer_ref(x, hidden_list[i][0], w_ih, w_hh, b_ih, b_hh)
    return jnp.transpose(x, (1, 0, 2))


# ---------------------------------------------------------------------------
# Deterministic parameter init (PyTorch GRU: U(-1/sqrt(H), 1/sqrt(H))).
# ---------------------------------------------------------------------------
def init_params(key, layer_dims):
    params = []
    for (in_dim, hid) in layer_dims:
        k = 1.0 / jnp.sqrt(jnp.float32(hid))
        key, k1, k2, k3, k4 = jax.random.split(key, 5)
        w_ih = jax.random.uniform(k1, (3 * hid, in_dim), jnp.float32, -k, k)
        w_hh = jax.random.uniform(k2, (3 * hid, hid), jnp.float32, -k, k)
        b_ih = jax.random.uniform(k3, (3 * hid,), jnp.float32, -k, k)
        b_hh = jax.random.uniform(k4, (3 * hid,), jnp.float32, -k, k)
        params.append((w_ih, w_hh, b_ih, b_hh))
    return params, key


if __name__ == "__main__":
    # Small shapes consistent with the module.
    batch_size = 2
    input_size = 4
    seq_len = 16
    fea_list = [32, 16]

    # GRU stack dims: input_size -> 32 -> 16 -> 2
    layer_dims = [(input_size, fea_list[0]),
                  (fea_list[0], fea_list[1]),
                  (fea_list[1], 2)]
    hidden_sizes = [fea_list[0], fea_list[1], 2]   # == self.fea_list in PyTorch

    key = jax.random.PRNGKey(0)
    params, key = init_params(key, layer_dims)

    key, kx = jax.random.split(key)
    x = jax.random.normal(kx, (batch_size, input_size, seq_len), jnp.float32)

    hidden_list = []
    for h in hidden_sizes:
        key, kh = jax.random.split(key)
        hidden_list.append(
            jax.random.normal(kh, (1, batch_size, h), jnp.float32))

    fwd = jax.jit(deap_gru_forward)
    out = jax.block_until_ready(fwd(x, hidden_list, params))

    ref = jax.block_until_ready(_deap_gru_ref(x, hidden_list, params))
    assert out.shape == (batch_size, seq_len, 2), out.shape
    assert jnp.allclose(out, ref, atol=5e-5, rtol=5e-5), \
        float(jnp.max(jnp.abs(out - ref)))

    print("KERNEL_OK")
</pallas_src>

<mosaic_0001>
module attributes {stable_mosaic.version = 11 : i64} {
  func.func @kernel(%arg0: memref<16x2x96xf32, #tpu.memory_space<vmem>>, %arg1: memref<2x32xf32, #tpu.memory_space<vmem>>, %arg2: memref<32x96xf32, #tpu.memory_space<vmem>>, %arg3: memref<1x96xf32, #tpu.memory_space<vmem>>, %arg4: memref<2x16xf32, #tpu.memory_space<vmem>>, %arg5: memref<32x48xf32, #tpu.memory_space<vmem>>, %arg6: memref<1x48xf32, #tpu.memory_space<vmem>>, %arg7: memref<16x48xf32, #tpu.memory_space<vmem>>, %arg8: memref<1x48xf32, #tpu.memory_space<vmem>>, %arg9: memref<2x2xf32, #tpu.memory_space<vmem>>, %arg10: memref<16x6xf32, #tpu.memory_space<vmem>>, %arg11: memref<1x6xf32, #tpu.memory_space<vmem>>, %arg12: memref<2x6xf32, #tpu.memory_space<vmem>>, %arg13: memref<1x6xf32, #tpu.memory_space<vmem>>, %arg14: memref<16x2x2xf32, #tpu.memory_space<vmem>>) attributes {dimension_semantics = [], scalar_prefetch = 0 : i64, scratch_operands = 0 : i64, tpu.core_type = #tpu.core_type<tc>} {
    %c0 = arith.constant 0 : index
    %c0_0 = arith.constant 0 : index
    %0 = vector.load %arg2[%c0, %c0_0] : memref<32x96xf32, #tpu.memory_space<vmem>>, vector<32x96xf32>
    %c0_1 = arith.constant 0 : index
    %c0_2 = arith.constant 0 : index
    %1 = vector.load %arg3[%c0_1, %c0_2] : memref<1x96xf32, #tpu.memory_space<vmem>>, vector<1x96xf32>
    %c0_3 = arith.constant 0 : index
    %c0_4 = arith.constant 0 : index
    %2 = vector.load %arg1[%c0_3, %c0_4] : memref<2x32xf32, #tpu.memory_space<vmem>>, vector<2x32xf32>
    %cst = arith.constant dense<0.000000e+00> : vector<2x96xf32>
    %3 = tpu.matmul %2, %0, %cst {dimension_numbers = #tpu.dot_dimension_numbers<[1], [0], [0], [1], [0, 0, 1, 1], [], []>} : vector<2x32xf32>, vector<32x96xf32>, vector<2x96xf32> -> vector<2x96xf32>
    %4 = vector.broadcast %1 : vector<1x96xf32> to vector<2x96xf32>
    %5 = arith.addf %3, %4 : vector<2x96xf32>
    %c0_5 = arith.constant 0 : index
    %c0_6 = arith.constant 0 : index
    %c0_7 = arith.constant 0 : index
    %6 = vector.load %arg0[%c0_5, %c0_6, %c0_7] : memref<16x2x96xf32, #tpu.memory_space<vmem>>, vector<1x2x96xf32>
    %7 = vector.shape_cast %6 : vector<1x2x96xf32> to vector<2x96xf32>
    %8 = vector.extract_strided_slice %7 {offsets = [0, 0], sizes = [2, 32], strides = [1, 1]} : vector<2x96xf32> to vector<2x32xf32>
    %9 = vector.extract_strided_slice %5 {offsets = [0, 0], sizes = [2, 32], strides = [1, 1]} : vector<2x96xf32> to vector<2x32xf32>
    %10 = arith.addf %8, %9 : vector<2x32xf32>
    %11 = arith.negf %10 : vector<2x32xf32>
    %12 = math.exp %11 : vector<2x32xf32>
    %cst_8 = arith.constant 1.000000e+00 : f32
    %13 = vector.broadcast %cst_8 : f32 to vector<2x32xf32>
    %14 = arith.addf %13, %12 : vector<2x32xf32>
    %15 = arith.divf %13, %14 : vector<2x32xf32>
    %16 = vector.extract_strided_slice %7 {offsets = [0, 32], sizes = [2, 32], strides = [1, 1]} : vector<2x96xf32> to vector<2x32xf32>
    %17 = vector.extract_strided_slice %5 {offsets = [0, 32], sizes = [2, 32], strides = [1, 1]} : vector<2x96xf32> to vector<2x32xf32>
    %18 = arith.addf %16, %17 : vector<2x32xf32>
    %19 = arith.negf %18 : vector<2x32xf32>
    %20 = math.exp %19 : vector<2x32xf32>
    %cst_9 = arith.constant 1.000000e+00 : f32
    %21 = vector.broadcast %cst_9 : f32 to vector<2x32xf32>
    %22 = arith.addf %21, %20 : vector<2x32xf32>
    %23 = arith.divf %21, %22 : vector<2x32xf32>
    %24 = vector.extract_strided_slice %7 {offsets = [0, 64], sizes = [2, 32], strides = [1, 1]} : vector<2x96xf32> to vector<2x32xf32>
    %25 = vector.extract_strided_slice %5 {offsets = [0, 64], sizes = [2, 32], strides = [1, 1]} : vector<2x96xf32> to vector<2x32xf32>
    %26 = arith.mulf %15, %25 : vector<2x32xf32>
    %27 = arith.addf %24, %26 : vector<2x32xf32>
    %28 = math.tanh %27 : vector<2x32xf32>
    %29 = arith.subf %2, %28 : vector<2x32xf32>
    %30 = arith.mulf %23, %29 : vector<2x32xf32>
    %31 = arith.addf %28, %30 : vector<2x32xf32>
    %cst_10 = arith.constant dense<0.000000e+00> : vector<2x96xf32>
    %32 = tpu.matmul %31, %0, %cst_10 {dimension_numbers = #tpu.dot_dimension_numbers<[1], [0], [0], [1], [0, 0, 1, 1], [], []>} : vector<2x32xf32>, vector<32x96xf32>, vector<2x96xf32> -> vector<2x96xf32>
    %33 = vector.broadcast %1 : vector<1x96xf32> to vector<2x96xf32>
    %34 = arith.addf %32, %33 : vector<2x96xf32>
    %c1 = arith.constant 1 : index
    %c0_11 = arith.constant 0 : index
    %c0_12 = arith.constant 0 : index
    %35 = vector.load %arg0[%c1, %c0_11, %c0_12] : memref<16x2x96xf32, #tpu.memory_space<vmem>>, vector<1x2x96xf32>
    %36 = vector.shape_cast %35 : vector<1x2x96xf32> to vector<2x96xf32>
    %37 = vector.extract_strided_slice %36 {offsets = [0, 0], sizes = [2, 32], strides = [1, 1]} : vector<2x96xf32> to vector<2x32xf32>
    %38 = vector.extract_strided_slice %34 {offsets = [0, 0], sizes = [2, 32], strides = [1, 1]} : vector<2x96xf32> to vector<2x32xf32>
    %39 = arith.addf %37, %38 : vector<2x32xf32>
    %40 = arith.negf %39 : vector<2x32xf32>
    %41 = math.exp %40 : vector<2x32xf32>
    %cst_13 = arith.constant 1.000000e+00 : f32
    %42 = vector.broadcast %cst_13 : f32 to vector<2x32xf32>
    %43 = arith.addf %42, %41 : vector<2x32xf32>
    %44 = arith.divf %42, %43 : vector<2x32xf32>
    %45 = vector.extract_strided_slice %36 {offsets = [0, 32], sizes = [2, 32], strides = [1, 1]} : vector<2x96xf32> to vector<2x32xf32>
    %46 = vector.extract_strided_slice %34 {offsets = [0, 32], sizes = [2, 32], strides = [1, 1]} : vector<2x96xf32> to vector<2x32xf32>
    %47 = arith.addf %45, %46 : vector<2x32xf32>
    %48 = arith.negf %47 : vector<2x32xf32>
    %49 = math.exp %48 : vector<2x32xf32>
    %cst_14 = arith.constant 1.000000e+00 : f32
    %50 = vector.broadcast %cst_14 : f32 to vector<2x32xf32>
    %51 = arith.addf %50, %49 : vector<2x32xf32>
    %52 = arith.divf %50, %51 : vector<2x32xf32>
    %53 = vector.extract_strided_slice %36 {offsets = [0, 64], sizes = [2, 32], strides = [1, 1]} : vector<2x96xf32> to vector<2x32xf32>
    %54 = vector.extract_strided_slice %34 {offsets = [0, 64], sizes = [2, 32], strides = [1, 1]} : vector<2x96xf32> to vector<2x32xf32>
    %55 = arith.mulf %44, %54 : vector<2x32xf32>
    %56 = arith.addf %53, %55 : vector<2x32xf32>
    %57 = math.tanh %56 : vector<2x32xf32>
    %58 = arith.subf %31, %57 : vector<2x32xf32>
    %59 = arith.mulf %52, %58 : vector<2x32xf32>
    %60 = arith.addf %57, %59 : vector<2x32xf32>
    %cst_15 = arith.constant dense<0.000000e+00> : vector<2x96xf32>
    %61 = tpu.matmul %60, %0, %cst_15 {dimension_numbers = #tpu.dot_dimension_numbers<[1], [0], [0], [1], [0, 0, 1, 1], [], []>} : vector<2x32xf32>, vector<32x96xf32>, vector<2x96xf32> -> vector<2x96xf32>
    %62 = vector.broadcast %1 : vector<1x96xf32> to vector<2x96xf32>
    %63 = arith.addf %61, %62 : vector<2x96xf32>
    %c2 = arith.constant 2 : index
    %c0_16 = arith.constant 0 : index
    %c0_17 = arith.constant 0 : index
    %64 = vector.load %arg0[%c2, %c0_16, %c0_17] : memref<16x2x96xf32, #tpu.memory_space<vmem>>, vector<1x2x96xf32>
    %65 = vector.shape_cast %64 : vector<1x2x96xf32> to vector<2x96xf32>
    %66 = vector.extract_strided_slice %65 {offsets = [0, 0], sizes = [2, 32], strides = [1, 1]} : vector<2x96xf32> to vector<2x32xf32>
    %67 = vector.extract_strided_slice %63 {offsets = [0, 0], sizes = [2, 32], strides = [1, 1]} : vector<2x96xf32> to vector<2x32xf32>
    %68 = arith.addf %66, %67 : vector<2x32xf32>
    %69 = arith.negf %68 : vector<2x32xf32>
    %70 = math.exp %69 : vector<2x32xf32>
    %cst_18 = arith.constant 1.000000e+00 : f32
    %71 = vector.broadcast %cst_18 : f32 to vector<2x32xf32>
    %72 = arith.addf %71, %70 : vector<2x32xf32>
    %73 = arith.divf %71, %72 : vector<2x32xf32>
    %74 = vector.extract_strided_slice %65 {offsets = [0, 32], sizes = [2, 32], strides = [1, 1]} : vector<2x96xf32> to vector<2x32xf32>
    %75 = vector.extract_strided_slice %63 {offsets = [0, 32], sizes = [2, 32], strides = [1, 1]} : vector<2x96xf32> to vector<2x32xf32>
    %76 = arith.addf %74, %75 : vector<2x32xf32>
    %77 = arith.negf %76 : vector<2x32xf32>
    %78 = math.exp %77 : vector<2x32xf32>
    %cst_19 = arith.constant 1.000000e+00 : f32
    %79 = vector.broadcast %cst_19 : f32 to vector<2x32xf32>
    %80 = arith.addf %79, %78 : vector<2x32xf32>
    %81 = arith.divf %79, %80 : vector<2x32xf32>
    %82 = vector.extract_strided_slice %65 {offsets = [0, 64], sizes = [2, 32], strides = [1, 1]} : vector<2x96xf32> to vector<2x32xf32>
    %83 = vector.extract_strided_slice %63 {offsets = [0, 64], sizes = [2, 32], strides = [1, 1]} : vector<2x96xf32> to vector<2x32xf32>
    %84 = arith.mulf %73, %83 : vector<2x32xf32>
    %85 = arith.addf %82, %84 : vector<2x32xf32>
    %86 = math.tanh %85 : vector<2x32xf32>
    %87 = arith.subf %60, %86 : vector<2x32xf32>
    %88 = arith.mulf %81, %87 : vector<2x32xf32>
    %89 = arith.addf %86, %88 : vector<2x32xf32>
    %cst_20 = arith.constant dense<0.000000e+00> : vector<2x96xf32>
    %90 = tpu.matmul %89, %0, %cst_20 {dimension_numbers = #tpu.dot_dimension_numbers<[1], [0], [0], [1], [0, 0, 1, 1], [], []>} : vector<2x32xf32>, vector<32x96xf32>, vector<2x96xf32> -> vector<2x96xf32>
    %91 = vector.broadcast %1 : vector<1x96xf32> to vector<2x96xf32>
    %92 = arith.addf %90, %91 : vector<2x96xf32>
    %c3 = arith.constant 3 : index
    %c0_21 = arith.constant 0 : index
    %c0_22 = arith.constant 0 : index
    %93 = vector.load %arg0[%c3, %c0_21, %c0_22] : memref<16x2x96xf32, #tpu.memory_space<vmem>>, vector<1x2x96xf32>
    %94 = vector.shape_cast %93 : vector<1x2x96xf32> to vector<2x96xf32>
    %95 = vector.extract_strided_slice %94 {offsets = [0, 0], sizes = [2, 32], strides = [1, 1]} : vector<2x96xf32> to vector<2x32xf32>
    %96 = vector.extract_strided_slice %92 {offsets = [0, 0], sizes = [2, 32], strides = [1, 1]} : vector<2x96xf32> to vector<2x32xf32>
    %97 = arith.addf %95, %96 : vector<2x32xf32>
    %98 = arith.negf %97 : vector<2x32xf32>
    %99 = math.exp %98 : vector<2x32xf32>
    %cst_23 = arith.constant 1.000000e+00 : f32
    %100 = vector.broadcast %cst_23 : f32 to vector<2x32xf32>
    %101 = arith.addf %100, %99 : vector<2x32xf32>
    %102 = arith.divf %100, %101 : vector<2x32xf32>
    %103 = vector.extract_strided_slice %94 {offsets = [0, 32], sizes = [2, 32], strides = [1, 1]} : vector<2x96xf32> to vector<2x32xf32>
    %104 = vector.extract_strided_slice %92 {offsets = [0, 32], sizes = [2, 32], strides = [1, 1]} : vector<2x96xf32> to vector<2x32xf32>
    %105 = arith.addf %103, %104 : vector<2x32xf32>
    %106 = arith.negf %105 : vector<2x32xf32>
    %107 = math.exp %106 : vector<2x32xf32>
    %cst_24 = arith.constant 1.000000e+00 : f32
    %108 = vector.broadcast %cst_24 : f32 to vector<2x32xf32>
    %109 = arith.addf %108, %107 : vector<2x32xf32>
    %110 = arith.divf %108, %109 : vector<2x32xf32>
    %111 = vector.extract_strided_slice %94 {offsets = [0, 64], sizes = [2, 32], strides = [1, 1]} : vector<2x96xf32> to vector<2x32xf32>
    %112 = vector.extract_strided_slice %92 {offsets = [0, 64], sizes = [2, 32], strides = [1, 1]} : vector<2x96xf32> to vector<2x32xf32>
    %113 = arith.mulf %102, %112 : vector<2x32xf32>
    %114 = arith.addf %111, %113 : vector<2x32xf32>
    %115 = math.tanh %114 : vector<2x32xf32>
    %116 = arith.subf %89, %115 : vector<2x32xf32>
    %117 = arith.mulf %110, %116 : vector<2x32xf32>
    %118 = arith.addf %115, %117 : vector<2x32xf32>
    %cst_25 = arith.constant dense<0.000000e+00> : vector<2x96xf32>
    %119 = tpu.matmul %118, %0, %cst_25 {dimension_numbers = #tpu.dot_dimension_numbers<[1], [0], [0], [1], [0, 0, 1, 1], [], []>} : vector<2x32xf32>, vector<32x96xf32>, vector<2x96xf32> -> vector<2x96xf32>
    %120 = vector.broadcast %1 : vector<1x96xf32> to vector<2x96xf32>
    %121 = arith.addf %119, %120 : vector<2x96xf32>
    %c4 = arith.constant 4 : index
    %c0_26 = arith.constant 0 : index
    %c0_27 = arith.constant 0 : index
    %122 = vector.load %arg0[%c4, %c0_26, %c0_27] : memref<16x2x96xf32, #tpu.memory_space<vmem>>, vector<1x2x96xf32>
    %123 = vector.shape_cast %122 : vector<1x2x96xf32> to vector<2x96xf32>
    %124 = vector.extract_strided_slice %123 {offsets = [0, 0], sizes = [2, 32], strides = [1, 1]} : vector<2x96xf32> to vector<2x32xf32>
    %125 = vector.extract_strided_slice %121 {offsets = [0, 0], sizes = [2, 32], strides = [1, 1]} : vector<2x96xf32> to vector<2x32xf32>
    %126 = arith.addf %124, %125 : vector<2x32xf32>
    %127 = arith.negf %126 : vector<2x32xf32>
    %128 = math.exp %127 : vector<2x32xf32>
    %cst_28 = arith.constant 1.000000e+00 : f32
    %129 = vector.broadcast %cst_28 : f32 to vector<2x32xf32>
    %130 = arith.addf %129, %128 : vector<2x32xf32>
    %131 = arith.divf %129, %130 : vector<2x32xf32>
    %132 = vector.extract_strided_slice %123 {offsets = [0, 32], sizes = [2, 32], strides = [1, 1]} : vector<2x96xf32> to vector<2x32xf32>
    %133 = vector.extract_strided_slice %121 {offsets = [0, 32], sizes = [2, 32], strides = [1, 1]} : vector<2x96xf32> to vector<2x32xf32>
    %134 = arith.addf %132, %133 : vector<2x32xf32>
    %135 = arith.negf %134 : vector<2x32xf32>
    %136 = math.exp %135 : vector<2x32xf32>
    %cst_29 = arith.constant 1.000000e+00 : f32
    %137 = vector.broadcast %cst_29 : f32 to vector<2x32xf32>
    %138 = arith.addf %137, %136 : vector<2x32xf32>
    %139 = arith.divf %137, %138 : vector<2x32xf32>
    %140 = vector.extract_strided_slice %123 {offsets = [0, 64], sizes = [2, 32], strides = [1, 1]} : vector<2x96xf32> to vector<2x32xf32>
    %141 = vector.extract_strided_slice %121 {offsets = [0, 64], sizes = [2, 32], strides = [1, 1]} : vector<2x96xf32> to vector<2x32xf32>
    %142 = arith.mulf %131, %141 : vector<2x32xf32>
    %143 = arith.addf %140, %142 : vector<2x32xf32>
    %144 = math.tanh %143 : vector<2x32xf32>
    %145 = arith.subf %118, %144 : vector<2x32xf32>
    %146 = arith.mulf %139, %145 : vector<2x32xf32>
    %147 = arith.addf %144, %146 : vector<2x32xf32>
    %cst_30 = arith.constant dense<0.000000e+00> : vector<2x96xf32>
    %148 = tpu.matmul %147, %0, %cst_30 {dimension_numbers = #tpu.dot_dimension_numbers<[1], [0], [0], [1], [0, 0, 1, 1], [], []>} : vector<2x32xf32>, vector<32x96xf32>, vector<2x96xf32> -> vector<2x96xf32>
    %149 = vector.broadcast %1 : vector<1x96xf32> to vector<2x96xf32>
    %150 = arith.addf %148, %149 : vector<2x96xf32>
    %c5 = arith.constant 5 : index
    %c0_31 = arith.constant 0 : index
    %c0_32 = arith.constant 0 : index
    %151 = vector.load %arg0[%c5, %c0_31, %c0_32] : memref<16x2x96xf32, #tpu.memory_space<vmem>>, vector<1x2x96xf32>
    %152 = vector.shape_cast %151 : vector<1x2x96xf32> to vector<2x96xf32>
    %153 = vector.extract_strided_slice %152 {offsets = [0, 0], sizes = [2, 32], strides = [1, 1]} : vector<2x96xf32> to vector<2x32xf32>
    %154 = vector.extract_strided_slice %150 {offsets = [0, 0], sizes = [2, 32], strides = [1, 1]} : vector<2x96xf32> to vector<2x32xf32>
    %155 = arith.addf %153, %154 : vector<2x32xf32>
    %156 = arith.negf %155 : vector<2x32xf32>
    %157 = math.exp %156 : vector<2x32xf32>
    %cst_33 = arith.constant 1.000000e+00 : f32
    %158 = vector.broadcast %cst_33 : f32 to vector<2x32xf32>
    %159 = arith.addf %158, %157 : vector<2x32xf32>
    %160 = arith.divf %158, %159 : vector<2x32xf32>
    %161 = vector.extract_strided_slice %152 {offsets = [0, 32], sizes = [2, 32], strides = [1, 1]} : vector<2x96xf32> to vector<2x32xf32>
    %162 = vector.extract_strided_slice %150 {offsets = [0, 32], sizes = [2, 32], strides = [1, 1]} : vector<2x96xf32> to vector<2x32xf32>
    %163 = arith.addf %161, %162 : vector<2x32xf32>
    %164 = arith.negf %163 : vector<2x32xf32>
    %165 = math.exp %164 : vector<2x32xf32>
    %cst_34 = arith.constant 1.000000e+00 : f32
    %166 = vector.broadcast %cst_34 : f32 to vector<2x32xf32>
    %167 = arith.addf %166, %165 : vector<2x32xf32>
    %168 = arith.divf %166, %167 : vector<2x32xf32>
    %169 = vector.extract_strided_slice %152 {offsets = [0, 64], sizes = [2, 32], strides = [1, 1]} : vector<2x96xf32> to vector<2x32xf32>
    %170 = vector.extract_strided_slice %150 {offsets = [0, 64], sizes = [2, 32], strides = [1, 1]} : vector<2x96xf32> to vector<2x32xf32>
    %171 = arith.mulf %160, %170 : vector<2x32xf32>
    %172 = arith.addf %169, %171 : vector<2x32xf32>
    %173 = math.tanh %172 : vector<2x32xf32>
    %174 = arith.subf %147, %173 : vector<2x32xf32>
    %175 = arith.mulf %168, %174 : vector<2x32xf32>
    %176 = arith.addf %173, %175 : vector<2x32xf32>
    %cst_35 = arith.constant dense<0.000000e+00> : vector<2x96xf32>
    %177 = tpu.matmul %176, %0, %cst_35 {dimension_numbers = #tpu.dot_dimension_numbers<[1], [0], [0], [1], [0, 0, 1, 1], [], []>} : vector<2x32xf32>, vector<32x96xf32>, vector<2x96xf32> -> vector<2x96xf32>
    %178 = vector.broadcast %1 : vector<1x96xf32> to vector<2x96xf32>
    %179 = arith.addf %177, %178 : vector<2x96xf32>
    %c6 = arith.constant 6 : index
    %c0_36 = arith.constant 0 : index
    %c0_37 = arith.constant 0 : index
    %180 = vector.load %arg0[%c6, %c0_36, %c0_37] : memref<16x2x96xf32, #tpu.memory_space<vmem>>, vector<1x2x96xf32>
    %181 = vector.shape_cast %180 : vector<1x2x96xf32> to vector<2x96xf32>
    %182 = vector.extract_strided_slice %181 {offsets = [0, 0], sizes = [2, 32], strides = [1, 1]} : vector<2x96xf32> to vector<2x32xf32>
    %183 = vector.extract_strided_slice %179 {offsets = [0, 0], sizes = [2, 32], strides = [1, 1]} : vector<2x96xf32> to vector<2x32xf32>
    %184 = arith.addf %182, %183 : vector<2x32xf32>
    %185 = arith.negf %184 : vector<2x32xf32>
    %186 = math.exp %185 : vector<2x32xf32>
    %cst_38 = arith.constant 1.000000e+00 : f32
    %187 = vector.broadcast %cst_38 : f32 to vector<2x32xf32>
    %188 = arith.addf %187, %186 : vector<2x32xf32>
    %189 = arith.divf %187, %188 : vector<2x32xf32>
    %190 = vector.extract_strided_slice %181 {offsets = [0, 32], sizes = [2, 32], strides = [1, 1]} : vector<2x96xf32> to vector<2x32xf32>
    %191 = vector.extract_strided_slice %179 {offsets = [0, 32], sizes = [2, 32], strides = [1, 1]} : vector<2x96xf32> to vector<2x32xf32>
    %192 = arith.addf %190, %191 : vector<2x32xf32>
    %193 = arith.negf %192 : vector<2x32xf32>
    %194 = math.exp %193 : vector<2x32xf32>
    %cst_39 = arith.constant 1.000000e+00 : f32
    %195 = vector.broadcast %cst_39 : f32 to vector<2x32xf32>
    %196 = arith.addf %195, %194 : vector<2x32xf32>
    %197 = arith.divf %195, %196 : vector<2x32xf32>
    %198 = vector.extract_strided_slice %181 {offsets = [0, 64], sizes = [2, 32], strides = [1, 1]} : vector<2x96xf32> to vector<2x32xf32>
    %199 = vector.extract_strided_slice %179 {offsets = [0, 64], sizes = [2, 32], strides = [1, 1]} : vector<2x96xf32> to vector<2x32xf32>
    %200 = arith.mulf %189, %199 : vector<2x32xf32>
    %201 = arith.addf %198, %200 : vector<2x32xf32>
    %202 = math.tanh %201 : vector<2x32xf32>
    %203 = arith.subf %176, %202 : vector<2x32xf32>
    %204 = arith.mulf %197, %203 : vector<2x32xf32>
    %205 = arith.addf %202, %204 : vector<2x32xf32>
    %cst_40 = arith.constant dense<0.000000e+00> : vector<2x96xf32>
    %206 = tpu.matmul %205, %0, %cst_40 {dimension_numbers = #tpu.dot_dimension_numbers<[1], [0], [0], [1], [0, 0, 1, 1], [], []>} : vector<2x32xf32>, vector<32x96xf32>, vector<2x96xf32> -> vector<2x96xf32>
    %207 = vector.broadcast %1 : vector<1x96xf32> to vector<2x96xf32>
    %208 = arith.addf %206, %207 : vector<2x96xf32>
    %c7 = arith.constant 7 : index
    %c0_41 = arith.constant 0 : index
    %c0_42 = arith.constant 0 : index
    %209 = vector.load %arg0[%c7, %c0_41, %c0_42] : memref<16x2x96xf32, #tpu.memory_space<vmem>>, vector<1x2x96xf32>
    %210 = vector.shape_cast %209 : vector<1x2x96xf32> to vector<2x96xf32>
    %211 = vector.extract_strided_slice %210 {offsets = [0, 0], sizes = [2, 32], strides = [1, 1]} : vector<2x96xf32> to vector<2x32xf32>
    %212 = vector.extract_strided_slice %208 {offsets = [0, 0], sizes = [2, 32], strides = [1, 1]} : vector<2x96xf32> to vector<2x32xf32>
    %213 = arith.addf %211, %212 : vector<2x32xf32>
    %214 = arith.negf %213 : vector<2x32xf32>
    %215 = math.exp %214 : vector<2x32xf32>
    %cst_43 = arith.constant 1.000000e+00 : f32
    %216 = vector.broadcast %cst_43 : f32 to vector<2x32xf32>
    %217 = arith.addf %216, %215 : vector<2x32xf32>
    %218 = arith.divf %216, %217 : vector<2x32xf32>
    %219 = vector.extract_strided_slice %210 {offsets = [0, 32], sizes = [2, 32], strides = [1, 1]} : vector<2x96xf32> to vector<2x32xf32>
    %220 = vector.extract_strided_slice %208 {offsets = [0, 32], sizes = [2, 32], strides = [1, 1]} : vector<2x96xf32> to vector<2x32xf32>
    %221 = arith.addf %219, %220 : vector<2x32xf32>
    %222 = arith.negf %221 : vector<2x32xf32>
    %223 = math.exp %222 : vector<2x32xf32>
    %cst_44 = arith.constant 1.000000e+00 : f32
    %224 = vector.broadcast %cst_44 : f32 to vector<2x32xf32>
    %225 = arith.addf %224, %223 : vector<2x32xf32>
    %226 = arith.divf %224, %225 : vector<2x32xf32>
    %227 = vector.extract_strided_slice %210 {offsets = [0, 64], sizes = [2, 32], strides = [1, 1]} : vector<2x96xf32> to vector<2x32xf32>
    %228 = vector.extract_strided_slice %208 {offsets = [0, 64], sizes = [2, 32], strides = [1, 1]} : vector<2x96xf32> to vector<2x32xf32>
    %229 = arith.mulf %218, %228 : vector<2x32xf32>
    %230 = arith.addf %227, %229 : vector<2x32xf32>
    %231 = math.tanh %230 : vector<2x32xf32>
    %232 = arith.subf %205, %231 : vector<2x32xf32>
    %233 = arith.mulf %226, %232 : vector<2x32xf32>
    %234 = arith.addf %231, %233 : vector<2x32xf32>
    %cst_45 = arith.constant dense<0.000000e+00> : vector<2x96xf32>
    %235 = tpu.matmul %234, %0, %cst_45 {dimension_numbers = #tpu.dot_dimension_numbers<[1], [0], [0], [1], [0, 0, 1, 1], [], []>} : vector<2x32xf32>, vector<32x96xf32>, vector<2x96xf32> -> vector<2x96xf32>
    %236 = vector.broadcast %1 : vector<1x96xf32> to vector<2x96xf32>
    %237 = arith.addf %235, %236 : vector<2x96xf32>
    %c8 = arith.constant 8 : index
    %c0_46 = arith.constant 0 : index
    %c0_47 = arith.constant 0 : index
    %238 = vector.load %arg0[%c8, %c0_46, %c0_47] : memref<16x2x96xf32, #tpu.memory_space<vmem>>, vector<1x2x96xf32>
    %239 = vector.shape_cast %238 : vector<1x2x96xf32> to vector<2x96xf32>
    %240 = vector.extract_strided_slice %239 {offsets = [0, 0], sizes = [2, 32], strides = [1, 1]} : vector<2x96xf32> to vector<2x32xf32>
    %241 = vector.extract_strided_slice %237 {offsets = [0, 0], sizes = [2, 32], strides = [1, 1]} : vector<2x96xf32> to vector<2x32xf32>
    %242 = arith.addf %240, %241 : vector<2x32xf32>
    %243 = arith.negf %242 : vector<2x32xf32>
    %244 = math.exp %243 : vector<2x32xf32>
    %cst_48 = arith.constant 1.000000e+00 : f32
    %245 = vector.broadcast %cst_48 : f32 to vector<2x32xf32>
    %246 = arith.addf %245, %244 : vector<2x32xf32>
    %247 = arith.divf %245, %246 : vector<2x32xf32>
    %248 = vector.extract_strided_slice %239 {offsets = [0, 32], sizes = [2, 32], strides = [1, 1]} : vector<2x96xf32> to vector<2x32xf32>
    %249 = vector.extract_strided_slice %237 {offsets = [0, 32], sizes = [2, 32], strides = [1, 1]} : vector<2x96xf32> to vector<2x32xf32>
    %250 = arith.addf %248, %249 : vector<2x32xf32>
    %251 = arith.negf %250 : vector<2x32xf32>
    %252 = math.exp %251 : vector<2x32xf32>
    %cst_49 = arith.constant 1.000000e+00 : f32
    %253 = vector.broadcast %cst_49 : f32 to vector<2x32xf32>
    %254 = arith.addf %253, %252 : vector<2x32xf32>
    %255 = arith.divf %253, %254 : vector<2x32xf32>
    %256 = vector.extract_strided_slice %239 {offsets = [0, 64], sizes = [2, 32], strides = [1, 1]} : vector<2x96xf32> to vector<2x32xf32>
    %257 = vector.extract_strided_slice %237 {offsets = [0, 64], sizes = [2, 32], strides = [1, 1]} : vector<2x96xf32> to vector<2x32xf32>
    %258 = arith.mulf %247, %257 : vector<2x32xf32>
    %259 = arith.addf %256, %258 : vector<2x32xf32>
    %260 = math.tanh %259 : vector<2x32xf32>
    %261 = arith.subf %234, %260 : vector<2x32xf32>
    %262 = arith.mulf %255, %261 : vector<2x32xf32>
    %263 = arith.addf %260, %262 : vector<2x32xf32>
    %cst_50 = arith.constant dense<0.000000e+00> : vector<2x96xf32>
    %264 = tpu.matmul %263, %0, %cst_50 {dimension_numbers = #tpu.dot_dimension_numbers<[1], [0], [0], [1], [0, 0, 1, 1], [], []>} : vector<2x32xf32>, vector<32x96xf32>, vector<2x96xf32> -> vector<2x96xf32>
    %265 = vector.broadcast %1 : vector<1x96xf32> to vector<2x96xf32>
    %266 = arith.addf %264, %265 : vector<2x96xf32>
    %c9 = arith.constant 9 : index
    %c0_51 = arith.constant 0 : index
    %c0_52 = arith.constant 0 : index
    %267 = vector.load %arg0[%c9, %c0_51, %c0_52] : memref<16x2x96xf32, #tpu.memory_space<vmem>>, vector<1x2x96xf32>
    %268 = vector.shape_cast %267 : vector<1x2x96xf32> to vector<2x96xf32>
    %269 = vector.extract_strided_slice %268 {offsets = [0, 0], sizes = [2, 32], strides = [1, 1]} : vector<2x96xf32> to vector<2x32xf32>
    %270 = vector.extract_strided_slice %266 {offsets = [0, 0], sizes = [2, 32], strides = [1, 1]} : vector<2x96xf32> to vector<2x32xf32>
    %271 = arith.addf %269, %270 : vector<2x32xf32>
    %272 = arith.negf %271 : vector<2x32xf32>
    %273 = math.exp %272 : vector<2x32xf32>
    %cst_53 = arith.constant 1.000000e+00 : f32
    %274 = vector.broadcast %cst_53 : f32 to vector<2x32xf32>
    %275 = arith.addf %274, %273 : vector<2x32xf32>
    %276 = arith.divf %274, %275 : vector<2x32xf32>
    %277 = vector.extract_strided_slice %268 {offsets = [0, 32], sizes = [2, 32], strides = [1, 1]} : vector<2x96xf32> to vector<2x32xf32>
    %278 = vector.extract_strided_slice %266 {offsets = [0, 32], sizes = [2, 32], strides = [1, 1]} : vector<2x96xf32> to vector<2x32xf32>
    %279 = arith.addf %277, %278 : vector<2x32xf32>
    %280 = arith.negf %279 : vector<2x32xf32>
    %281 = math.exp %280 : vector<2x32xf32>
    %cst_54 = arith.constant 1.000000e+00 : f32
    %282 = vector.broadcast %cst_54 : f32 to vector<2x32xf32>
    %283 = arith.addf %282, %281 : vector<2x32xf32>
    %284 = arith.divf %282, %283 : vector<2x32xf32>
    %285 = vector.extract_strided_slice %268 {offsets = [0, 64], sizes = [2, 32], strides = [1, 1]} : vector<2x96xf32> to vector<2x32xf32>
    %286 = vector.extract_strided_slice %266 {offsets = [0, 64], sizes = [2, 32], strides = [1, 1]} : vector<2x96xf32> to vector<2x32xf32>
    %287 = arith.mulf %276, %286 : vector<2x32xf32>
    %288 = arith.addf %285, %287 : vector<2x32xf32>
    %289 = math.tanh %288 : vector<2x32xf32>
    %290 = arith.subf %263, %289 : vector<2x32xf32>
    %291 = arith.mulf %284, %290 : vector<2x32xf32>
    %292 = arith.addf %289, %291 : vector<2x32xf32>
    %cst_55 = arith.constant dense<0.000000e+00> : vector<2x96xf32>
    %293 = tpu.matmul %292, %0, %cst_55 {dimension_numbers = #tpu.dot_dimension_numbers<[1], [0], [0], [1], [0, 0, 1, 1], [], []>} : vector<2x32xf32>, vector<32x96xf32>, vector<2x96xf32> -> vector<2x96xf32>
    %294 = vector.broadcast %1 : vector<1x96xf32> to vector<2x96xf32>
    %295 = arith.addf %293, %294 : vector<2x96xf32>
    %c10 = arith.constant 10 : index
    %c0_56 = arith.constant 0 : index
    %c0_57 = arith.constant 0 : index
    %296 = vector.load %arg0[%c10, %c0_56, %c0_57] : memref<16x2x96xf32, #tpu.memory_space<vmem>>, vector<1x2x96xf32>
    %297 = vector.shape_cast %296 : vector<1x2x96xf32> to vector<2x96xf32>
    %298 = vector.extract_strided_slice %297 {offsets = [0, 0], sizes = [2, 32], strides = [1, 1]} : vector<2x96xf32> to vector<2x32xf32>
    %299 = vector.extract_strided_slice %295 {offsets = [0, 0], sizes = [2, 32], strides = [1, 1]} : vector<2x96xf32> to vector<2x32xf32>
    %300 = arith.addf %298, %299 : vector<2x32xf32>
    %301 = arith.negf %300 : vector<2x32xf32>
    %302 = math.exp %301 : vector<2x32xf32>
    %cst_58 = arith.constant 1.000000e+00 : f32
    %303 = vector.broadcast %cst_58 : f32 to vector<2x32xf32>
    %304 = arith.addf %303, %302 : vector<2x32xf32>
    %305 = arith.divf %303, %304 : vector<2x32xf32>
    %306 = vector.extract_strided_slice %297 {offsets = [0, 32], sizes = [2, 32], strides = [1, 1]} : vector<2x96xf32> to vector<2x32xf32>
    %307 = vector.extract_strided_slice %295 {offsets = [0, 32], sizes = [2, 32], strides = [1, 1]} : vector<2x96xf32> to vector<2x32xf32>
    %308 = arith.addf %306, %307 : vector<2x32xf32>
    %309 = arith.negf %308 : vector<2x32xf32>
    %310 = math.exp %309 : vector<2x32xf32>
    %cst_59 = arith.constant 1.000000e+00 : f32
    %311 = vector.broadcast %cst_59 : f32 to vector<2x32xf32>
    %312 = arith.addf %311, %310 : vector<2x32xf32>
    %313 = arith.divf %311, %312 : vector<2x32xf32>
    %314 = vector.extract_strided_slice %297 {offsets = [0, 64], sizes = [2, 32], strides = [1, 1]} : vector<2x96xf32> to vector<2x32xf32>
    %315 = vector.extract_strided_slice %295 {offsets = [0, 64], sizes = [2, 32], strides = [1, 1]} : vector<2x96xf32> to vector<2x32xf32>
    %316 = arith.mulf %305, %315 : vector<2x32xf32>
    %317 = arith.addf %314, %316 : vector<2x32xf32>
    %318 = math.tanh %317 : vector<2x32xf32>
    %319 = arith.subf %292, %318 : vector<2x32xf32>
    %320 = arith.mulf %313, %319 : vector<2x32xf32>
    %321 = arith.addf %318, %320 : vector<2x32xf32>
    %cst_60 = arith.constant dense<0.000000e+00> : vector<2x96xf32>
    %322 = tpu.matmul %321, %0, %cst_60 {dimension_numbers = #tpu.dot_dimension_numbers<[1], [0], [0], [1], [0, 0, 1, 1], [], []>} : vector<2x32xf32>, vector<32x96xf32>, vector<2x96xf32> -> vector<2x96xf32>
    %323 = vector.broadcast %1 : vector<1x96xf32> to vector<2x96xf32>
    %324 = arith.addf %322, %323 : vector<2x96xf32>
    %c11 = arith.constant 11 : index
    %c0_61 = arith.constant 0 : index
    %c0_62 = arith.constant 0 : index
    %325 = vector.load %arg0[%c11, %c0_61, %c0_62] : memref<16x2x96xf32, #tpu.memory_space<vmem>>, vector<1x2x96xf32>
    %326 = vector.shape_cast %325 : vector<1x2x96xf32> to vector<2x96xf32>
    %327 = vector.extract_strided_slice %326 {offsets = [0, 0], sizes = [2, 32], strides = [1, 1]} : vector<2x96xf32> to vector<2x32xf32>
    %328 = vector.extract_strided_slice %324 {offsets = [0, 0], sizes = [2, 32], strides = [1, 1]} : vector<2x96xf32> to vector<2x32xf32>
    %329 = arith.addf %327, %328 : vector<2x32xf32>
    %330 = arith.negf %329 : vector<2x32xf32>
    %331 = math.exp %330 : vector<2x32xf32>
    %cst_63 = arith.constant 1.000000e+00 : f32
    %332 = vector.broadcast %cst_63 : f32 to vector<2x32xf32>
    %333 = arith.addf %332, %331 : vector<2x32xf32>
    %334 = arith.divf %332, %333 : vector<2x32xf32>
    %335 = vector.extract_strided_slice %326 {offsets = [0, 32], sizes = [2, 32], strides = [1, 1]} : vector<2x96xf32> to vector<2x32xf32>
    %336 = vector.extract_strided_slice %324 {offsets = [0, 32], sizes = [2, 32], strides = [1, 1]} : vector<2x96xf32> to vector<2x32xf32>
    %337 = arith.addf %335, %336 : vector<2x32xf32>
    %338 = arith.negf %337 : vector<2x32xf32>
    %339 = math.exp %338 : vector<2x32xf32>
    %cst_64 = arith.constant 1.000000e+00 : f32
    %340 = vector.broadcast %cst_64 : f32 to vector<2x32xf32>
    %341 = arith.addf %340, %339 : vector<2x32xf32>
    %342 = arith.divf %340, %341 : vector<2x32xf32>
    %343 = vector.extract_strided_slice %326 {offsets = [0, 64], sizes = [2, 32], strides = [1, 1]} : vector<2x96xf32> to vector<2x32xf32>
    %344 = vector.extract_strided_slice %324 {offsets = [0, 64], sizes = [2, 32], strides = [1, 1]} : vector<2x96xf32> to vector<2x32xf32>
    %345 = arith.mulf %334, %344 : vector<2x32xf32>
    %346 = arith.addf %343, %345 : vector<2x32xf32>
    %347 = math.tanh %346 : vector<2x32xf32>
    %348 = arith.subf %321, %347 : vector<2x32xf32>
    %349 = arith.mulf %342, %348 : vector<2x32xf32>
    %350 = arith.addf %347, %349 : vector<2x32xf32>
    %cst_65 = arith.constant dense<0.000000e+00> : vector<2x96xf32>
    %351 = tpu.matmul %350, %0, %cst_65 {dimension_numbers = #tpu.dot_dimension_numbers<[1], [0], [0], [1], [0, 0, 1, 1], [], []>} : vector<2x32xf32>, vector<32x96xf32>, vector<2x96xf32> -> vector<2x96xf32>
    %352 = vector.broadcast %1 : vector<1x96xf32> to vector<2x96xf32>
    %353 = arith.addf %351, %352 : vector<2x96xf32>
    %c12 = arith.constant 12 : index
    %c0_66 = arith.constant 0 : index
    %c0_67 = arith.constant 0 : index
    %354 = vector.load %arg0[%c12, %c0_66, %c0_67] : memref<16x2x96xf32, #tpu.memory_space<vmem>>, vector<1x2x96xf32>
    %355 = vector.shape_cast %354 : vector<1x2x96xf32> to vector<2x96xf32>
    %356 = vector.extract_strided_slice %355 {offsets = [0, 0], sizes = [2, 32], strides = [1, 1]} : vector<2x96xf32> to vector<2x32xf32>
    %357 = vector.extract_strided_slice %353 {offsets = [0, 0], sizes = [2, 32], strides = [1, 1]} : vector<2x96xf32> to vector<2x32xf32>
    %358 = arith.addf %356, %357 : vector<2x32xf32>
    %359 = arith.negf %358 : vector<2x32xf32>
    %360 = math.exp %359 : vector<2x32xf32>
    %cst_68 = arith.constant 1.000000e+00 : f32
    %361 = vector.broadcast %cst_68 : f32 to vector<2x32xf32>
    %362 = arith.addf %361, %360 : vector<2x32xf32>
    %363 = arith.divf %361, %362 : vector<2x32xf32>
    %364 = vector.extract_strided_slice %355 {offsets = [0, 32], sizes = [2, 32], strides = [1, 1]} : vector<2x96xf32> to vector<2x32xf32>
    %365 = vector.extract_strided_slice %353 {offsets = [0, 32], sizes = [2, 32], strides = [1, 1]} : vector<2x96xf32> to vector<2x32xf32>
    %366 = arith.addf %364, %365 : vector<2x32xf32>
    %367 = arith.negf %366 : vector<2x32xf32>
    %368 = math.exp %367 : vector<2x32xf32>
    %cst_69 = arith.constant 1.000000e+00 : f32
    %369 = vector.broadcast %cst_69 : f32 to vector<2x32xf32>
    %370 = arith.addf %369, %368 : vector<2x32xf32>
    %371 = arith.divf %369, %370 : vector<2x32xf32>
    %372 = vector.extract_strided_slice %355 {offsets = [0, 64], sizes = [2, 32], strides = [1, 1]} : vector<2x96xf32> to vector<2x32xf32>
    %373 = vector.extract_strided_slice %353 {offsets = [0, 64], sizes = [2, 32], strides = [1, 1]} : vector<2x96xf32> to vector<2x32xf32>
    %374 = arith.mulf %363, %373 : vector<2x32xf32>
    %375 = arith.addf %372, %374 : vector<2x32xf32>
    %376 = math.tanh %375 : vector<2x32xf32>
    %377 = arith.subf %350, %376 : vector<2x32xf32>
    %378 = arith.mulf %371, %377 : vector<2x32xf32>
    %379 = arith.addf %376, %378 : vector<2x32xf32>
    %cst_70 = arith.constant dense<0.000000e+00> : vector<2x96xf32>
    %380 = tpu.matmul %379, %0, %cst_70 {dimension_numbers = #tpu.dot_dimension_numbers<[1], [0], [0], [1], [0, 0, 1, 1], [], []>} : vector<2x32xf32>, vector<32x96xf32>, vector<2x96xf32> -> vector<2x96xf32>
    %381 = vector.broadcast %1 : vector<1x96xf32> to vector<2x96xf32>
    %382 = arith.addf %380, %381 : vector<2x96xf32>
    %c13 = arith.constant 13 : index
    %c0_71 = arith.constant 0 : index
    %c0_72 = arith.constant 0 : index
    %383 = vector.load %arg0[%c13, %c0_71, %c0_72] : memref<16x2x96xf32, #tpu.memory_space<vmem>>, vector<1x2x96xf32>
    %384 = vector.shape_cast %383 : vector<1x2x96xf32> to vector<2x96xf32>
    %385 = vector.extract_strided_slice %384 {offsets = [0, 0], sizes = [2, 32], strides = [1, 1]} : vector<2x96xf32> to vector<2x32xf32>
    %386 = vector.extract_strided_slice %382 {offsets = [0, 0], sizes = [2, 32], strides = [1, 1]} : vector<2x96xf32> to vector<2x32xf32>
    %387 = arith.addf %385, %386 : vector<2x32xf32>
    %388 = arith.negf %387 : vector<2x32xf32>
    %389 = math.exp %388 : vector<2x32xf32>
    %cst_73 = arith.constant 1.000000e+00 : f32
    %390 = vector.broadcast %cst_73 : f32 to vector<2x32xf32>
    %391 = arith.addf %390, %389 : vector<2x32xf32>
    %392 = arith.divf %390, %391 : vector<2x32xf32>
    %393 = vector.extract_strided_slice %384 {offsets = [0, 32], sizes = [2, 32], strides = [1, 1]} : vector<2x96xf32> to vector<2x32xf32>
    %394 = vector.extract_strided_slice %382 {offsets = [0, 32], sizes = [2, 32], strides = [1, 1]} : vector<2x96xf32> to vector<2x32xf32>
    %395 = arith.addf %393, %394 : vector<2x32xf32>
    %396 = arith.negf %395 : vector<2x32xf32>
    %397 = math.exp %396 : vector<2x32xf32>
    %cst_74 = arith.constant 1.000000e+00 : f32
    %398 = vector.broadcast %cst_74 : f32 to vector<2x32xf32>
    %399 = arith.addf %398, %397 : vector<2x32xf32>
    %400 = arith.divf %398, %399 : vector<2x32xf32>
    %401 = vector.extract_strided_slice %384 {offsets = [0, 64], sizes = [2, 32], strides = [1, 1]} : vector<2x96xf32> to vector<2x32xf32>
    %402 = vector.extract_strided_slice %382 {offsets = [0, 64], sizes = [2, 32], strides = [1, 1]} : vector<2x96xf32> to vector<2x32xf32>
    %403 = arith.mulf %392, %402 : vector<2x32xf32>
    %404 = arith.addf %401, %403 : vector<2x32xf32>
    %405 = math.tanh %404 : vector<2x32xf32>
    %406 = arith.subf %379, %405 : vector<2x32xf32>
    %407 = arith.mulf %400, %406 : vector<2x32xf32>
    %408 = arith.addf %405, %407 : vector<2x32xf32>
    %cst_75 = arith.constant dense<0.000000e+00> : vector<2x96xf32>
    %409 = tpu.matmul %408, %0, %cst_75 {dimension_numbers = #tpu.dot_dimension_numbers<[1], [0], [0], [1], [0, 0, 1, 1], [], []>} : vector<2x32xf32>, vector<32x96xf32>, vector<2x96xf32> -> vector<2x96xf32>
    %410 = vector.broadcast %1 : vector<1x96xf32> to vector<2x96xf32>
    %411 = arith.addf %409, %410 : vector<2x96xf32>
    %c14 = arith.constant 14 : index
    %c0_76 = arith.constant 0 : index
    %c0_77 = arith.constant 0 : index
    %412 = vector.load %arg0[%c14, %c0_76, %c0_77] : memref<16x2x96xf32, #tpu.memory_space<vmem>>, vector<1x2x96xf32>
    %413 = vector.shape_cast %412 : vector<1x2x96xf32> to vector<2x96xf32>
    %414 = vector.extract_strided_slice %413 {offsets = [0, 0], sizes = [2, 32], strides = [1, 1]} : vector<2x96xf32> to vector<2x32xf32>
    %415 = vector.extract_strided_slice %411 {offsets = [0, 0], sizes = [2, 32], strides = [1, 1]} : vector<2x96xf32> to vector<2x32xf32>
    %416 = arith.addf %414, %415 : vector<2x32xf32>
    %417 = arith.negf %416 : vector<2x32xf32>
    %418 = math.exp %417 : vector<2x32xf32>
    %cst_78 = arith.constant 1.000000e+00 : f32
    %419 = vector.broadcast %cst_78 : f32 to vector<2x32xf32>
    %420 = arith.addf %419, %418 : vector<2x32xf32>
    %421 = arith.divf %419, %420 : vector<2x32xf32>
    %422 = vector.extract_strided_slice %413 {offsets = [0, 32], sizes = [2, 32], strides = [1, 1]} : vector<2x96xf32> to vector<2x32xf32>
    %423 = vector.extract_strided_slice %411 {offsets = [0, 32], sizes = [2, 32], strides = [1, 1]} : vector<2x96xf32> to vector<2x32xf32>
    %424 = arith.addf %422, %423 : vector<2x32xf32>
    %425 = arith.negf %424 : vector<2x32xf32>
    %426 = math.exp %425 : vector<2x32xf32>
    %cst_79 = arith.constant 1.000000e+00 : f32
    %427 = vector.broadcast %cst_79 : f32 to vector<2x32xf32>
    %428 = arith.addf %427, %426 : vector<2x32xf32>
    %429 = arith.divf %427, %428 : vector<2x32xf32>
    %430 = vector.extract_strided_slice %413 {offsets = [0, 64], sizes = [2, 32], strides = [1, 1]} : vector<2x96xf32> to vector<2x32xf32>
    %431 = vector.extract_strided_slice %411 {offsets = [0, 64], sizes = [2, 32], strides = [1, 1]} : vector<2x96xf32> to vector<2x32xf32>
    %432 = arith.mulf %421, %431 : vector<2x32xf32>
    %433 = arith.addf %430, %432 : vector<2x32xf32>
    %434 = math.tanh %433 : vector<2x32xf32>
    %435 = arith.subf %408, %434 : vector<2x32xf32>
    %436 = arith.mulf %429, %435 : vector<2x32xf32>
    %437 = arith.addf %434, %436 : vector<2x32xf32>
    %cst_80 = arith.constant dense<0.000000e+00> : vector<2x96xf32>
    %438 = tpu.matmul %437, %0, %cst_80 {dimension_numbers = #tpu.dot_dimension_numbers<[1], [0], [0], [1], [0, 0, 1, 1], [], []>} : vector<2x32xf32>, vector<32x96xf32>, vector<2x96xf32> -> vector<2x96xf32>
    %439 = vector.broadcast %1 : vector<1x96xf32> to vector<2x96xf32>
    %440 = arith.addf %438, %439 : vector<2x96xf32>
    %c15 = arith.constant 15 : index
    %c0_81 = arith.constant 0 : index
    %c0_82 = arith.constant 0 : index
    %441 = vector.load %arg0[%c15, %c0_81, %c0_82] : memref<16x2x96xf32, #tpu.memory_space<vmem>>, vector<1x2x96xf32>
    %442 = vector.shape_cast %441 : vector<1x2x96xf32> to vector<2x96xf32>
    %443 = vector.extract_strided_slice %442 {offsets = [0, 0], sizes = [2, 32], strides = [1, 1]} : vector<2x96xf32> to vector<2x32xf32>
    %444 = vector.extract_strided_slice %440 {offsets = [0, 0], sizes = [2, 32], strides = [1, 1]} : vector<2x96xf32> to vector<2x32xf32>
    %445 = arith.addf %443, %444 : vector<2x32xf32>
    %446 = arith.negf %445 : vector<2x32xf32>
    %447 = math.exp %446 : vector<2x32xf32>
    %cst_83 = arith.constant 1.000000e+00 : f32
    %448 = vector.broadcast %cst_83 : f32 to vector<2x32xf32>
    %449 = arith.addf %448, %447 : vector<2x32xf32>
    %450 = arith.divf %448, %449 : vector<2x32xf32>
    %451 = vector.extract_strided_slice %442 {offsets = [0, 32], sizes = [2, 32], strides = [1, 1]} : vector<2x96xf32> to vector<2x32xf32>
    %452 = vector.extract_strided_slice %440 {offsets = [0, 32], sizes = [2, 32], strides = [1, 1]} : vector<2x96xf32> to vector<2x32xf32>
    %453 = arith.addf %451, %452 : vector<2x32xf32>
    %454 = arith.negf %453 : vector<2x32xf32>
    %455 = math.exp %454 : vector<2x32xf32>
    %cst_84 = arith.constant 1.000000e+00 : f32
    %456 = vector.broadcast %cst_84 : f32 to vector<2x32xf32>
    %457 = arith.addf %456, %455 : vector<2x32xf32>
    %458 = arith.divf %456, %457 : vector<2x32xf32>
    %459 = vector.extract_strided_slice %442 {offsets = [0, 64], sizes = [2, 32], strides = [1, 1]} : vector<2x96xf32> to vector<2x32xf32>
    %460 = vector.extract_strided_slice %440 {offsets = [0, 64], sizes = [2, 32], strides = [1, 1]} : vector<2x96xf32> to vector<2x32xf32>
    %461 = arith.mulf %450, %460 : vector<2x32xf32>
    %462 = arith.addf %459, %461 : vector<2x32xf32>
    %463 = math.tanh %462 : vector<2x32xf32>
    %464 = arith.subf %437, %463 : vector<2x32xf32>
    %465 = arith.mulf %458, %464 : vector<2x32xf32>
    %466 = arith.addf %463, %465 : vector<2x32xf32>
    %c0_85 = arith.constant 0 : index
    %c0_86 = arith.constant 0 : index
    %467 = vector.load %arg5[%c0_85, %c0_86] : memref<32x48xf32, #tpu.memory_space<vmem>>, vector<32x48xf32>
    %c0_87 = arith.constant 0 : index
    %c0_88 = arith.constant 0 : index
    %468 = vector.load %arg6[%c0_87, %c0_88] : memref<1x48xf32, #tpu.memory_space<vmem>>, vector<1x48xf32>
    %c0_89 = arith.constant 0 : index
    %c0_90 = arith.constant 0 : index
    %469 = vector.load %arg7[%c0_89, %c0_90] : memref<16x48xf32, #tpu.memory_space<vmem>>, vector<16x48xf32>
    %c0_91 = arith.constant 0 : index
    %c0_92 = arith.constant 0 : index
    %470 = vector.load %arg8[%c0_91, %c0_92] : memref<1x48xf32, #tpu.memory_space<vmem>>, vector<1x48xf32>
    %c0_93 = arith.constant 0 : index
    %c0_94 = arith.constant 0 : index
    %471 = vector.load %arg4[%c0_93, %c0_94] : memref<2x16xf32, #tpu.memory_space<vmem>>, vector<2x16xf32>
    %cst_95 = arith.constant dense<0.000000e+00> : vector<2x48xf32>
    %472 = tpu.matmul %31, %467, %cst_95 {dimension_numbers = #tpu.dot_dimension_numbers<[1], [0], [0], [1], [0, 0, 1, 1], [], []>} : vector<2x32xf32>, vector<32x48xf32>, vector<2x48xf32> -> vector<2x48xf32>
    %473 = vector.broadcast %468 : vector<1x48xf32> to vector<2x48xf32>
    %474 = arith.addf %472, %473 : vector<2x48xf32>
    %cst_96 = arith.constant dense<0.000000e+00> : vector<2x48xf32>
    %475 = tpu.matmul %471, %469, %cst_96 {dimension_numbers = #tpu.dot_dimension_numbers<[1], [0], [0], [1], [0, 0, 1, 1], [], []>} : vector<2x16xf32>, vector<16x48xf32>, vector<2x48xf32> -> vector<2x48xf32>
    %476 = vector.broadcast %470 : vector<1x48xf32> to vector<2x48xf32>
    %477 = arith.addf %475, %476 : vector<2x48xf32>
    %478 = vector.extract_strided_slice %474 {offsets = [0, 0], sizes = [2, 16], strides = [1, 1]} : vector<2x48xf32> to vector<2x16xf32>
    %479 = vector.extract_strided_slice %477 {offsets = [0, 0], sizes = [2, 16], strides = [1, 1]} : vector<2x48xf32> to vector<2x16xf32>
    %480 = arith.addf %478, %479 : vector<2x16xf32>
    %481 = arith.negf %480 : vector<2x16xf32>
    %482 = math.exp %481 : vector<2x16xf32>
    %cst_97 = arith.constant 1.000000e+00 : f32
    %483 = vector.broadcast %cst_97 : f32 to vector<2x16xf32>
    %484 = arith.addf %483, %482 : vector<2x16xf32>
    %485 = arith.divf %483, %484 : vector<2x16xf32>
    %486 = vector.extract_strided_slice %474 {offsets = [0, 16], sizes = [2, 16], strides = [1, 1]} : vector<2x48xf32> to vector<2x16xf32>
    %487 = vector.extract_strided_slice %477 {offsets = [0, 16], sizes = [2, 16], strides = [1, 1]} : vector<2x48xf32> to vector<2x16xf32>
    %488 = arith.addf %486, %487 : vector<2x16xf32>
    %489 = arith.negf %488 : vector<2x16xf32>
    %490 = math.exp %489 : vector<2x16xf32>
    %cst_98 = arith.constant 1.000000e+00 : f32
    %491 = vector.broadcast %cst_98 : f32 to vector<2x16xf32>
    %492 = arith.addf %491, %490 : vector<2x16xf32>
    %493 = arith.divf %491, %492 : vector<2x16xf32>
    %494 = vector.extract_strided_slice %474 {offsets = [0, 32], sizes = [2, 16], strides = [1, 1]} : vector<2x48xf32> to vector<2x16xf32>
    %495 = vector.extract_strided_slice %477 {offsets = [0, 32], sizes = [2, 16], strides = [1, 1]} : vector<2x48xf32> to vector<2x16xf32>
    %496 = arith.mulf %485, %495 : vector<2x16xf32>
    %497 = arith.addf %494, %496 : vector<2x16xf32>
    %498 = math.tanh %497 : vector<2x16xf32>
    %499 = arith.subf %471, %498 : vector<2x16xf32>
    %500 = arith.mulf %493, %499 : vector<2x16xf32>
    %501 = arith.addf %498, %500 : vector<2x16xf32>
    %cst_99 = arith.constant dense<0.000000e+00> : vector<2x48xf32>
    %502 = tpu.matmul %60, %467, %cst_99 {dimension_numbers = #tpu.dot_dimension_numbers<[1], [0], [0], [1], [0, 0, 1, 1], [], []>} : vector<2x32xf32>, vector<32x48xf32>, vector<2x48xf32> -> vector<2x48xf32>
    %503 = vector.broadcast %468 : vector<1x48xf32> to vector<2x48xf32>
    %504 = arith.addf %502, %503 : vector<2x48xf32>
    %cst_100 = arith.constant dense<0.000000e+00> : vector<2x48xf32>
    %505 = tpu.matmul %501, %469, %cst_100 {dimension_numbers = #tpu.dot_dimension_numbers<[1], [0], [0], [1], [0, 0, 1, 1], [], []>} : vector<2x16xf32>, vector<16x48xf32>, vector<2x48xf32> -> vector<2x48xf32>
    %506 = vector.broadcast %470 : vector<1x48xf32> to vector<2x48xf32>
    %507 = arith.addf %505, %506 : vector<2x48xf32>
    %508 = vector.extract_strided_slice %504 {offsets = [0, 0], sizes = [2, 16], strides = [1, 1]} : vector<2x48xf32> to vector<2x16xf32>
    %509 = vector.extract_strided_slice %507 {offsets = [0, 0], sizes = [2, 16], strides = [1, 1]} : vector<2x48xf32> to vector<2x16xf32>
    %510 = arith.addf %508, %509 : vector<2x16xf32>
    %511 = arith.negf %510 : vector<2x16xf32>
    %512 = math.exp %511 : vector<2x16xf32>
    %cst_101 = arith.constant 1.000000e+00 : f32
    %513 = vector.broadcast %cst_101 : f32 to vector<2x16xf32>
    %514 = arith.addf %513, %512 : vector<2x16xf32>
    %515 = arith.divf %513, %514 : vector<2x16xf32>
    %516 = vector.extract_strided_slice %504 {offsets = [0, 16], sizes = [2, 16], strides = [1, 1]} : vector<2x48xf32> to vector<2x16xf32>
    %517 = vector.extract_strided_slice %507 {offsets = [0, 16], sizes = [2, 16], strides = [1, 1]} : vector<2x48xf32> to vector<2x16xf32>
    %518 = arith.addf %516, %517 : vector<2x16xf32>
    %519 = arith.negf %518 : vector<2x16xf32>
    %520 = math.exp %519 : vector<2x16xf32>
    %cst_102 = arith.constant 1.000000e+00 : f32
    %521 = vector.broadcast %cst_102 : f32 to vector<2x16xf32>
    %522 = arith.addf %521, %520 : vector<2x16xf32>
    %523 = arith.divf %521, %522 : vector<2x16xf32>
    %524 = vector.extract_strided_slice %504 {offsets = [0, 32], sizes = [2, 16], strides = [1, 1]} : vector<2x48xf32> to vector<2x16xf32>
    %525 = vector.extract_strided_slice %507 {offsets = [0, 32], sizes = [2, 16], strides = [1, 1]} : vector<2x48xf32> to vector<2x16xf32>
    %526 = arith.mulf %515, %525 : vector<2x16xf32>
    %527 = arith.addf %524, %526 : vector<2x16xf32>
    %528 = math.tanh %527 : vector<2x16xf32>
    %529 = arith.subf %501, %528 : vector<2x16xf32>
    %530 = arith.mulf %523, %529 : vector<2x16xf32>
    %531 = arith.addf %528, %530 : vector<2x16xf32>
    %cst_103 = arith.constant dense<0.000000e+00> : vector<2x48xf32>
    %532 = tpu.matmul %89, %467, %cst_103 {dimension_numbers = #tpu.dot_dimension_numbers<[1], [0], [0], [1], [0, 0, 1, 1], [], []>} : vector<2x32xf32>, vector<32x48xf32>, vector<2x48xf32> -> vector<2x48xf32>
    %533 = vector.broadcast %468 : vector<1x48xf32> to vector<2x48xf32>
    %534 = arith.addf %532, %533 : vector<2x48xf32>
    %cst_104 = arith.constant dense<0.000000e+00> : vector<2x48xf32>
    %535 = tpu.matmul %531, %469, %cst_104 {dimension_numbers = #tpu.dot_dimension_numbers<[1], [0], [0], [1], [0, 0, 1, 1], [], []>} : vector<2x16xf32>, vector<16x48xf32>, vector<2x48xf32> -> vector<2x48xf32>
    %536 = vector.broadcast %470 : vector<1x48xf32> to vector<2x48xf32>
    %537 = arith.addf %535, %536 : vector<2x48xf32>
    %538 = vector.extract_strided_slice %534 {offsets = [0, 0], sizes = [2, 16], strides = [1, 1]} : vector<2x48xf32> to vector<2x16xf32>
    %539 = vector.extract_strided_slice %537 {offsets = [0, 0], sizes = [2, 16], strides = [1, 1]} : vector<2x48xf32> to vector<2x16xf32>
    %540 = arith.addf %538, %539 : vector<2x16xf32>
    %541 = arith.negf %540 : vector<2x16xf32>
    %542 = math.exp %541 : vector<2x16xf32>
    %cst_105 = arith.constant 1.000000e+00 : f32
    %543 = vector.broadcast %cst_105 : f32 to vector<2x16xf32>
    %544 = arith.addf %543, %542 : vector<2x16xf32>
    %545 = arith.divf %543, %544 : vector<2x16xf32>
    %546 = vector.extract_strided_slice %534 {offsets = [0, 16], sizes = [2, 16], strides = [1, 1]} : vector<2x48xf32> to vector<2x16xf32>
    %547 = vector.extract_strided_slice %537 {offsets = [0, 16], sizes = [2, 16], strides = [1, 1]} : vector<2x48xf32> to vector<2x16xf32>
    %548 = arith.addf %546, %547 : vector<2x16xf32>
    %549 = arith.negf %548 : vector<2x16xf32>
    %550 = math.exp %549 : vector<2x16xf32>
    %cst_106 = arith.constant 1.000000e+00 : f32
    %551 = vector.broadcast %cst_106 : f32 to vector<2x16xf32>
    %552 = arith.addf %551, %550 : vector<2x16xf32>
    %553 = arith.divf %551, %552 : vector<2x16xf32>
    %554 = vector.extract_strided_slice %534 {offsets = [0, 32], sizes = [2, 16], strides = [1, 1]} : vector<2x48xf32> to vector<2x16xf32>
    %555 = vector.extract_strided_slice %537 {offsets = [0, 32], sizes = [2, 16], strides = [1, 1]} : vector<2x48xf32> to vector<2x16xf32>
    %556 = arith.mulf %545, %555 : vector<2x16xf32>
    %557 = arith.addf %554, %556 : vector<2x16xf32>
    %558 = math.tanh %557 : vector<2x16xf32>
    %559 = arith.subf %531, %558 : vector<2x16xf32>
    %560 = arith.mulf %553, %559 : vector<2x16xf32>
    %561 = arith.addf %558, %560 : vector<2x16xf32>
    %cst_107 = arith.constant dense<0.000000e+00> : vector<2x48xf32>
    %562 = tpu.matmul %118, %467, %cst_107 {dimension_numbers = #tpu.dot_dimension_numbers<[1], [0], [0], [1], [0, 0, 1, 1], [], []>} : vector<2x32xf32>, vector<32x48xf32>, vector<2x48xf32> -> vector<2x48xf32>
    %563 = vector.broadcast %468 : vector<1x48xf32> to vector<2x48xf32>
    %564 = arith.addf %562, %563 : vector<2x48xf32>
    %cst_108 = arith.constant dense<0.000000e+00> : vector<2x48xf32>
    %565 = tpu.matmul %561, %469, %cst_108 {dimension_numbers = #tpu.dot_dimension_numbers<[1], [0], [0], [1], [0, 0, 1, 1], [], []>} : vector<2x16xf32>, vector<16x48xf32>, vector<2x48xf32> -> vector<2x48xf32>
    %566 = vector.broadcast %470 : vector<1x48xf32> to vector<2x48xf32>
    %567 = arith.addf %565, %566 : vector<2x48xf32>
    %568 = vector.extract_strided_slice %564 {offsets = [0, 0], sizes = [2, 16], strides = [1, 1]} : vector<2x48xf32> to vector<2x16xf32>
    %569 = vector.extract_strided_slice %567 {offsets = [0, 0], sizes = [2, 16], strides = [1, 1]} : vector<2x48xf32> to vector<2x16xf32>
    %570 = arith.addf %568, %569 : vector<2x16xf32>
    %571 = arith.negf %570 : vector<2x16xf32>
    %572 = math.exp %571 : vector<2x16xf32>
    %cst_109 = arith.constant 1.000000e+00 : f32
    %573 = vector.broadcast %cst_109 : f32 to vector<2x16xf32>
    %574 = arith.addf %573, %572 : vector<2x16xf32>
    %575 = arith.divf %573, %574 : vector<2x16xf32>
    %576 = vector.extract_strided_slice %564 {offsets = [0, 16], sizes = [2, 16], strides = [1, 1]} : vector<2x48xf32> to vector<2x16xf32>
    %577 = vector.extract_strided_slice %567 {offsets = [0, 16], sizes = [2, 16], strides = [1, 1]} : vector<2x48xf32> to vector<2x16xf32>
    %578 = arith.addf %576, %577 : vector<2x16xf32>
    %579 = arith.negf %578 : vector<2x16xf32>
    %580 = math.exp %579 : vector<2x16xf32>
    %cst_110 = arith.constant 1.000000e+00 : f32
    %581 = vector.broadcast %cst_110 : f32 to vector<2x16xf32>
    %582 = arith.addf %581, %580 : vector<2x16xf32>
    %583 = arith.divf %581, %582 : vector<2x16xf32>
    %584 = vector.extract_strided_slice %564 {offsets = [0, 32], sizes = [2, 16], strides = [1, 1]} : vector<2x48xf32> to vector<2x16xf32>
    %585 = vector.extract_strided_slice %567 {offsets = [0, 32], sizes = [2, 16], strides = [1, 1]} : vector<2x48xf32> to vector<2x16xf32>
    %586 = arith.mulf %575, %585 : vector<2x16xf32>
    %587 = arith.addf %584, %586 : vector<2x16xf32>
    %588 = math.tanh %587 : vector<2x16xf32>
    %589 = arith.subf %561, %588 : vector<2x16xf32>
    %590 = arith.mulf %583, %589 : vector<2x16xf32>
    %591 = arith.addf %588, %590 : vector<2x16xf32>
    %cst_111 = arith.constant dense<0.000000e+00> : vector<2x48xf32>
    %592 = tpu.matmul %147, %467, %cst_111 {dimension_numbers = #tpu.dot_dimension_numbers<[1], [0], [0], [1], [0, 0, 1, 1], [], []>} : vector<2x32xf32>, vector<32x48xf32>, vector<2x48xf32> -> vector<2x48xf32>
    %593 = vector.broadcast %468 : vector<1x48xf32> to vector<2x48xf32>
    %594 = arith.addf %592, %593 : vector<2x48xf32>
    %cst_112 = arith.constant dense<0.000000e+00> : vector<2x48xf32>
    %595 = tpu.matmul %591, %469, %cst_112 {dimension_numbers = #tpu.dot_dimension_numbers<[1], [0], [0], [1], [0, 0, 1, 1], [], []>} : vector<2x16xf32>, vector<16x48xf32>, vector<2x48xf32> -> vector<2x48xf32>
    %596 = vector.broadcast %470 : vector<1x48xf32> to vector<2x48xf32>
    %597 = arith.addf %595, %596 : vector<2x48xf32>
    %598 = vector.extract_strided_slice %594 {offsets = [0, 0], sizes = [2, 16], strides = [1, 1]} : vector<2x48xf32> to vector<2x16xf32>
    %599 = vector.extract_strided_slice %597 {offsets = [0, 0], sizes = [2, 16], strides = [1, 1]} : vector<2x48xf32> to vector<2x16xf32>
    %600 = arith.addf %598, %599 : vector<2x16xf32>
    %601 = arith.negf %600 : vector<2x16xf32>
    %602 = math.exp %601 : vector<2x16xf32>
    %cst_113 = arith.constant 1.000000e+00 : f32
    %603 = vector.broadcast %cst_113 : f32 to vector<2x16xf32>
    %604 = arith.addf %603, %602 : vector<2x16xf32>
    %605 = arith.divf %603, %604 : vector<2x16xf32>
    %606 = vector.extract_strided_slice %594 {offsets = [0, 16], sizes = [2, 16], strides = [1, 1]} : vector<2x48xf32> to vector<2x16xf32>
    %607 = vector.extract_strided_slice %597 {offsets = [0, 16], sizes = [2, 16], strides = [1, 1]} : vector<2x48xf32> to vector<2x16xf32>
    %608 = arith.addf %606, %607 : vector<2x16xf32>
    %609 = arith.negf %608 : vector<2x16xf32>
    %610 = math.exp %609 : vector<2x16xf32>
    %cst_114 = arith.constant 1.000000e+00 : f32
    %611 = vector.broadcast %cst_114 : f32 to vector<2x16xf32>
    %612 = arith.addf %611, %610 : vector<2x16xf32>
    %613 = arith.divf %611, %612 : vector<2x16xf32>
    %614 = vector.extract_strided_slice %594 {offsets = [0, 32], sizes = [2, 16], strides = [1, 1]} : vector<2x48xf32> to vector<2x16xf32>
    %615 = vector.extract_strided_slice %597 {offsets = [0, 32], sizes = [2, 16], strides = [1, 1]} : vector<2x48xf32> to vector<2x16xf32>
    %616 = arith.mulf %605, %615 : vector<2x16xf32>
    %617 = arith.addf %614, %616 : vector<2x16xf32>
    %618 = math.tanh %617 : vector<2x16xf32>
    %619 = arith.subf %591, %618 : vector<2x16xf32>
    %620 = arith.mulf %613, %619 : vector<2x16xf32>
    %621 = arith.addf %618, %620 : vector<2x16xf32>
    %cst_115 = arith.constant dense<0.000000e+00> : vector<2x48xf32>
    %622 = tpu.matmul %176, %467, %cst_115 {dimension_numbers = #tpu.dot_dimension_numbers<[1], [0], [0], [1], [0, 0, 1, 1], [], []>} : vector<2x32xf32>, vector<32x48xf32>, vector<2x48xf32> -> vector<2x48xf32>
    %623 = vector.broadcast %468 : vector<1x48xf32> to vector<2x48xf32>
    %624 = arith.addf %622, %623 : vector<2x48xf32>
    %cst_116 = arith.constant dense<0.000000e+00> : vector<2x48xf32>
    %625 = tpu.matmul %621, %469, %cst_116 {dimension_numbers = #tpu.dot_dimension_numbers<[1], [0], [0], [1], [0, 0, 1, 1], [], []>} : vector<2x16xf32>, vector<16x48xf32>, vector<2x48xf32> -> vector<2x48xf32>
    %626 = vector.broadcast %470 : vector<1x48xf32> to vector<2x48xf32>
    %627 = arith.addf %625, %626 : vector<2x48xf32>
    %628 = vector.extract_strided_slice %624 {offsets = [0, 0], sizes = [2, 16], strides = [1, 1]} : vector<2x48xf32> to vector<2x16xf32>
    %629 = vector.extract_strided_slice %627 {offsets = [0, 0], sizes = [2, 16], strides = [1, 1]} : vector<2x48xf32> to vector<2x16xf32>
    %630 = arith.addf %628, %629 : vector<2x16xf32>
    %631 = arith.negf %630 : vector<2x16xf32>
    %632 = math.exp %631 : vector<2x16xf32>
    %cst_117 = arith.constant 1.000000e+00 : f32
    %633 = vector.broadcast %cst_117 : f32 to vector<2x16xf32>
    %634 = arith.addf %633, %632 : vector<2x16xf32>
    %635 = arith.divf %633, %634 : vector<2x16xf32>
    %636 = vector.extract_strided_slice %624 {offsets = [0, 16], sizes = [2, 16], strides = [1, 1]} : vector<2x48xf32> to vector<2x16xf32>
    %637 = vector.extract_strided_slice %627 {offsets = [0, 16], sizes = [2, 16], strides = [1, 1]} : vector<2x48xf32> to vector<2x16xf32>
    %638 = arith.addf %636, %637 : vector<2x16xf32>
    %639 = arith.negf %638 : vector<2x16xf32>
    %640 = math.exp %639 : vector<2x16xf32>
    %cst_118 = arith.constant 1.000000e+00 : f32
    %641 = vector.broadcast %cst_118 : f32 to vector<2x16xf32>
    %642 = arith.addf %641, %640 : vector<2x16xf32>
    %643 = arith.divf %641, %642 : vector<2x16xf32>
    %644 = vector.extract_strided_slice %624 {offsets = [0, 32], sizes = [2, 16], strides = [1, 1]} : vector<2x48xf32> to vector<2x16xf32>
    %645 = vector.extract_strided_slice %627 {offsets = [0, 32], sizes = [2, 16], strides = [1, 1]} : vector<2x48xf32> to vector<2x16xf32>
    %646 = arith.mulf %635, %645 : vector<2x16xf32>
    %647 = arith.addf %644, %646 : vector<2x16xf32>
    %648 = math.tanh %647 : vector<2x16xf32>
    %649 = arith.subf %621, %648 : vector<2x16xf32>
    %650 = arith.mulf %643, %649 : vector<2x16xf32>
    %651 = arith.addf %648, %650 : vector<2x16xf32>
    %cst_119 = arith.constant dense<0.000000e+00> : vector<2x48xf32>
    %652 = tpu.matmul %205, %467, %cst_119 {dimension_numbers = #tpu.dot_dimension_numbers<[1], [0], [0], [1], [0, 0, 1, 1], [], []>} : vector<2x32xf32>, vector<32x48xf32>, vector<2x48xf32> -> vector<2x48xf32>
    %653 = vector.broadcast %468 : vector<1x48xf32> to vector<2x48xf32>
    %654 = arith.addf %652, %653 : vector<2x48xf32>
    %cst_120 = arith.constant dense<0.000000e+00> : vector<2x48xf32>
    %655 = tpu.matmul %651, %469, %cst_120 {dimension_numbers = #tpu.dot_dimension_numbers<[1], [0], [0], [1], [0, 0, 1, 1], [], []>} : vector<2x16xf32>, vector<16x48xf32>, vector<2x48xf32> -> vector<2x48xf32>
    %656 = vector.broadcast %470 : vector<1x48xf32> to vector<2x48xf32>
    %657 = arith.addf %655, %656 : vector<2x48xf32>
    %658 = vector.extract_strided_slice %654 {offsets = [0, 0], sizes = [2, 16], strides = [1, 1]} : vector<2x48xf32> to vector<2x16xf32>
    %659 = vector.extract_strided_slice %657 {offsets = [0, 0], sizes = [2, 16], strides = [1, 1]} : vector<2x48xf32> to vector<2x16xf32>
    %660 = arith.addf %658, %659 : vector<2x16xf32>
    %661 = arith.negf %660 : vector<2x16xf32>
    %662 = math.exp %661 : vector<2x16xf32>
    %cst_121 = arith.constant 1.000000e+00 : f32
    %663 = vector.broadcast %cst_121 : f32 to vector<2x16xf32>
    %664 = arith.addf %663, %662 : vector<2x16xf32>
    %665 = arith.divf %663, %664 : vector<2x16xf32>
    %666 = vector.extract_strided_slice %654 {offsets = [0, 16], sizes = [2, 16], strides = [1, 1]} : vector<2x48xf32> to vector<2x16xf32>
    %667 = vector.extract_strided_slice %657 {offsets = [0, 16], sizes = [2, 16], strides = [1, 1]} : vector<2x48xf32> to vector<2x16xf32>
    %668 = arith.addf %666, %667 : vector<2x16xf32>
    %669 = arith.negf %668 : vector<2x16xf32>
    %670 = math.exp %669 : vector<2x16xf32>
    %cst_122 = arith.constant 1.000000e+00 : f32
    %671 = vector.broadcast %cst_122 : f32 to vector<2x16xf32>
    %672 = arith.addf %671, %670 : vector<2x16xf32>
    %673 = arith.divf %671, %672 : vector<2x16xf32>
    %674 = vector.extract_strided_slice %654 {offsets = [0, 32], sizes = [2, 16], strides = [1, 1]} : vector<2x48xf32> to vector<2x16xf32>
    %675 = vector.extract_strided_slice %657 {offsets = [0, 32], sizes = [2, 16], strides = [1, 1]} : vector<2x48xf32> to vector<2x16xf32>
    %676 = arith.mulf %665, %675 : vector<2x16xf32>
    %677 = arith.addf %674, %676 : vector<2x16xf32>
    %678 = math.tanh %677 : vector<2x16xf32>
    %679 = arith.subf %651, %678 : vector<2x16xf32>
    %680 = arith.mulf %673, %679 : vector<2x16xf32>
    %681 = arith.addf %678, %680 : vector<2x16xf32>
    %cst_123 = arith.constant dense<0.000000e+00> : vector<2x48xf32>
    %682 = tpu.matmul %234, %467, %cst_123 {dimension_numbers = #tpu.dot_dimension_numbers<[1], [0], [0], [1], [0, 0, 1, 1], [], []>} : vector<2x32xf32>, vector<32x48xf32>, vector<2x48xf32> -> vector<2x48xf32>
    %683 = vector.broadcast %468 : vector<1x48xf32> to vector<2x48xf32>
    %684 = arith.addf %682, %683 : vector<2x48xf32>
    %cst_124 = arith.constant dense<0.000000e+00> : vector<2x48xf32>
    %685 = tpu.matmul %681, %469, %cst_124 {dimension_numbers = #tpu.dot_dimension_numbers<[1], [0], [0], [1], [0, 0, 1, 1], [], []>} : vector<2x16xf32>, vector<16x48xf32>, vector<2x48xf32> -> vector<2x48xf32>
    %686 = vector.broadcast %470 : vector<1x48xf32> to vector<2x48xf32>
    %687 = arith.addf %685, %686 : vector<2x48xf32>
    %688 = vector.extract_strided_slice %684 {offsets = [0, 0], sizes = [2, 16], strides = [1, 1]} : vector<2x48xf32> to vector<2x16xf32>
    %689 = vector.extract_strided_slice %687 {offsets = [0, 0], sizes = [2, 16], strides = [1, 1]} : vector<2x48xf32> to vector<2x16xf32>
    %690 = arith.addf %688, %689 : vector<2x16xf32>
    %691 = arith.negf %690 : vector<2x16xf32>
    %692 = math.exp %691 : vector<2x16xf32>
    %cst_125 = arith.constant 1.000000e+00 : f32
    %693 = vector.broadcast %cst_125 : f32 to vector<2x16xf32>
    %694 = arith.addf %693, %692 : vector<2x16xf32>
    %695 = arith.divf %693, %694 : vector<2x16xf32>
    %696 = vector.extract_strided_slice %684 {offsets = [0, 16], sizes = [2, 16], strides = [1, 1]} : vector<2x48xf32> to vector<2x16xf32>
    %697 = vector.extract_strided_slice %687 {offsets = [0, 16], sizes = [2, 16], strides = [1, 1]} : vector<2x48xf32> to vector<2x16xf32>
    %698 = arith.addf %696, %697 : vector<2x16xf32>
    %699 = arith.negf %698 : vector<2x16xf32>
    %700 = math.exp %699 : vector<2x16xf32>
    %cst_126 = arith.constant 1.000000e+00 : f32
    %701 = vector.broadcast %cst_126 : f32 to vector<2x16xf32>
    %702 = arith.addf %701, %700 : vector<2x16xf32>
    %703 = arith.divf %701, %702 : vector<2x16xf32>
    %704 = vector.extract_strided_slice %684 {offsets = [0, 32], sizes = [2, 16], strides = [1, 1]} : vector<2x48xf32> to vector<2x16xf32>
    %705 = vector.extract_strided_slice %687 {offsets = [0, 32], sizes = [2, 16], strides = [1, 1]} : vector<2x48xf32> to vector<2x16xf32>
    %706 = arith.mulf %695, %705 : vector<2x16xf32>
    %707 = arith.addf %704, %706 : vector<2x16xf32>
    %708 = math.tanh %707 : vector<2x16xf32>
    %709 = arith.subf %681, %708 : vector<2x16xf32>
    %710 = arith.mulf %703, %709 : vector<2x16xf32>
    %711 = arith.addf %708, %710 : vector<2x16xf32>
    %cst_127 = arith.constant dense<0.000000e+00> : vector<2x48xf32>
    %712 = tpu.matmul %263, %467, %cst_127 {dimension_numbers = #tpu.dot_dimension_numbers<[1], [0], [0], [1], [0, 0, 1, 1], [], []>} : vector<2x32xf32>, vector<32x48xf32>, vector<2x48xf32> -> vector<2x48xf32>
    %713 = vector.broadcast %468 : vector<1x48xf32> to vector<2x48xf32>
    %714 = arith.addf %712, %713 : vector<2x48xf32>
    %cst_128 = arith.constant dense<0.000000e+00> : vector<2x48xf32>
    %715 = tpu.matmul %711, %469, %cst_128 {dimension_numbers = #tpu.dot_dimension_numbers<[1], [0], [0], [1], [0, 0, 1, 1], [], []>} : vector<2x16xf32>, vector<16x48xf32>, vector<2x48xf32> -> vector<2x48xf32>
    %716 = vector.broadcast %470 : vector<1x48xf32> to vector<2x48xf32>
    %717 = arith.addf %715, %716 : vector<2x48xf32>
    %718 = vector.extract_strided_slice %714 {offsets = [0, 0], sizes = [2, 16], strides = [1, 1]} : vector<2x48xf32> to vector<2x16xf32>
    %719 = vector.extract_strided_slice %717 {offsets = [0, 0], sizes = [2, 16], strides = [1, 1]} : vector<2x48xf32> to vector<2x16xf32>
    %720 = arith.addf %718, %719 : vector<2x16xf32>
    %721 = arith.negf %720 : vector<2x16xf32>
    %722 = math.exp %721 : vector<2x16xf32>
    %cst_129 = arith.constant 1.000000e+00 : f32
    %723 = vector.broadcast %cst_129 : f32 to vector<2x16xf32>
    %724 = arith.addf %723, %722 : vector<2x16xf32>
    %725 = arith.divf %723, %724 : vector<2x16xf32>
    %726 = vector.extract_strided_slice %714 {offsets = [0, 16], sizes = [2, 16], strides = [1, 1]} : vector<2x48xf32> to vector<2x16xf32>
    %727 = vector.extract_strided_slice %717 {offsets = [0, 16], sizes = [2, 16], strides = [1, 1]} : vector<2x48xf32> to vector<2x16xf32>
    %728 = arith.addf %726, %727 : vector<2x16xf32>
    %729 = arith.negf %728 : vector<2x16xf32>
    %730 = math.exp %729 : vector<2x16xf32>
    %cst_130 = arith.constant 1.000000e+00 : f32
    %731 = vector.broadcast %cst_130 : f32 to vector<2x16xf32>
    %732 = arith.addf %731, %730 : vector<2x16xf32>
    %733 = arith.divf %731, %732 : vector<2x16xf32>
    %734 = vector.extract_strided_slice %714 {offsets = [0, 32], sizes = [2, 16], strides = [1, 1]} : vector<2x48xf32> to vector<2x16xf32>
    %735 = vector.extract_strided_slice %717 {offsets = [0, 32], sizes = [2, 16], strides = [1, 1]} : vector<2x48xf32> to vector<2x16xf32>
    %736 = arith.mulf %725, %735 : vector<2x16xf32>
    %737 = arith.addf %734, %736 : vector<2x16xf32>
    %738 = math.tanh %737 : vector<2x16xf32>
    %739 = arith.subf %711, %738 : vector<2x16xf32>
    %740 = arith.mulf %733, %739 : vector<2x16xf32>
    %741 = arith.addf %738, %740 : vector<2x16xf32>
    %cst_131 = arith.constant dense<0.000000e+00> : vector<2x48xf32>
    %742 = tpu.matmul %292, %467, %cst_131 {dimension_numbers = #tpu.dot_dimension_numbers<[1], [0], [0], [1], [0, 0, 1, 1], [], []>} : vector<2x32xf32>, vector<32x48xf32>, vector<2x48xf32> -> vector<2x48xf32>
    %743 = vector.broadcast %468 : vector<1x48xf32> to vector<2x48xf32>
    %744 = arith.addf %742, %743 : vector<2x48xf32>
    %cst_132 = arith.constant dense<0.000000e+00> : vector<2x48xf32>
    %745 = tpu.matmul %741, %469, %cst_132 {dimension_numbers = #tpu.dot_dimension_numbers<[1], [0], [0], [1], [0, 0, 1, 1], [], []>} : vector<2x16xf32>, vector<16x48xf32>, vector<2x48xf32> -> vector<2x48xf32>
    %746 = vector.broadcast %470 : vector<1x48xf32> to vector<2x48xf32>
    %747 = arith.addf %745, %746 : vector<2x48xf32>
    %748 = vector.extract_strided_slice %744 {offsets = [0, 0], sizes = [2, 16], strides = [1, 1]} : vector<2x48xf32> to vector<2x16xf32>
    %749 = vector.extract_strided_slice %747 {offsets = [0, 0], sizes = [2, 16], strides = [1, 1]} : vector<2x48xf32> to vector<2x16xf32>
    %750 = arith.addf %748, %749 : vector<2x16xf32>
    %751 = arith.negf %750 : vector<2x16xf32>
    %752 = math.exp %751 : vector<2x16xf32>
    %cst_133 = arith.constant 1.000000e+00 : f32
    %753 = vector.broadcast %cst_133 : f32 to vector<2x16xf32>
    %754 = arith.addf %753, %752 : vector<2x16xf32>
    %755 = arith.divf %753, %754 : vector<2x16xf32>
    %756 = vector.extract_strided_slice %744 {offsets = [0, 16], sizes = [2, 16], strides = [1, 1]} : vector<2x48xf32> to vector<2x16xf32>
    %757 = vector.extract_strided_slice %747 {offsets = [0, 16], sizes = [2, 16], strides = [1, 1]} : vector<2x48xf32> to vector<2x16xf32>
    %758 = arith.addf %756, %757 : vector<2x16xf32>
    %759 = arith.negf %758 : vector<2x16xf32>
    %760 = math.exp %759 : vector<2x16xf32>
    %cst_134 = arith.constant 1.000000e+00 : f32
    %761 = vector.broadcast %cst_134 : f32 to vector<2x16xf32>
    %762 = arith.addf %761, %760 : vector<2x16xf32>
    %763 = arith.divf %761, %762 : vector<2x16xf32>
    %764 = vector.extract_strided_slice %744 {offsets = [0, 32], sizes = [2, 16], strides = [1, 1]} : vector<2x48xf32> to vector<2x16xf32>
    %765 = vector.extract_strided_slice %747 {offsets = [0, 32], sizes = [2, 16], strides = [1, 1]} : vector<2x48xf32> to vector<2x16xf32>
    %766 = arith.mulf %755, %765 : vector<2x16xf32>
    %767 = arith.addf %764, %766 : vector<2x16xf32>
    %768 = math.tanh %767 : vector<2x16xf32>
    %769 = arith.subf %741, %768 : vector<2x16xf32>
    %770 = arith.mulf %763, %769 : vector<2x16xf32>
    %771 = arith.addf %768, %770 : vector<2x16xf32>
    %cst_135 = arith.constant dense<0.000000e+00> : vector<2x48xf32>
    %772 = tpu.matmul %321, %467, %cst_135 {dimension_numbers = #tpu.dot_dimension_numbers<[1], [0], [0], [1], [0, 0, 1, 1], [], []>} : vector<2x32xf32>, vector<32x48xf32>, vector<2x48xf32> -> vector<2x48xf32>
    %773 = vector.broadcast %468 : vector<1x48xf32> to vector<2x48xf32>
    %774 = arith.addf %772, %773 : vector<2x48xf32>
    %cst_136 = arith.constant dense<0.000000e+00> : vector<2x48xf32>
    %775 = tpu.matmul %771, %469, %cst_136 {dimension_numbers = #tpu.dot_dimension_numbers<[1], [0], [0], [1], [0, 0, 1, 1], [], []>} : vector<2x16xf32>, vector<16x48xf32>, vector<2x48xf32> -> vector<2x48xf32>
    %776 = vector.broadcast %470 : vector<1x48xf32> to vector<2x48xf32>
    %777 = arith.addf %775, %776 : vector<2x48xf32>
    %778 = vector.extract_strided_slice %774 {offsets = [0, 0], sizes = [2, 16], strides = [1, 1]} : vector<2x48xf32> to vector<2x16xf32>
    %779 = vector.extract_strided_slice %777 {offsets = [0, 0], sizes = [2, 16], strides = [1, 1]} : vector<2x48xf32> to vector<2x16xf32>
    %780 = arith.addf %778, %779 : vector<2x16xf32>
    %781 = arith.negf %780 : vector<2x16xf32>
    %782 = math.exp %781 : vector<2x16xf32>
    %cst_137 = arith.constant 1.000000e+00 : f32
    %783 = vector.broadcast %cst_137 : f32 to vector<2x16xf32>
    %784 = arith.addf %783, %782 : vector<2x16xf32>
    %785 = arith.divf %783, %784 : vector<2x16xf32>
    %786 = vector.extract_strided_slice %774 {offsets = [0, 16], sizes = [2, 16], strides = [1, 1]} : vector<2x48xf32> to vector<2x16xf32>
    %787 = vector.extract_strided_slice %777 {offsets = [0, 16], sizes = [2, 16], strides = [1, 1]} : vector<2x48xf32> to vector<2x16xf32>
    %788 = arith.addf %786, %787 : vector<2x16xf32>
    %789 = arith.negf %788 : vector<2x16xf32>
    %790 = math.exp %789 : vector<2x16xf32>
    %cst_138 = arith.constant 1.000000e+00 : f32
    %791 = vector.broadcast %cst_138 : f32 to vector<2x16xf32>
    %792 = arith.addf %791, %790 : vector<2x16xf32>
    %793 = arith.divf %791, %792 : vector<2x16xf32>
    %794 = vector.extract_strided_slice %774 {offsets = [0, 32], sizes = [2, 16], strides = [1, 1]} : vector<2x48xf32> to vector<2x16xf32>
    %795 = vector.extract_strided_slice %777 {offsets = [0, 32], sizes = [2, 16], strides = [1, 1]} : vector<2x48xf32> to vector<2x16xf32>
    %796 = arith.mulf %785, %795 : vector<2x16xf32>
    %797 = arith.addf %794, %796 : vector<2x16xf32>
    %798 = math.tanh %797 : vector<2x16xf32>
    %799 = arith.subf %771, %798 : vector<2x16xf32>
    %800 = arith.mulf %793, %799 : vector<2x16xf32>
    %801 = arith.addf %798, %800 : vector<2x16xf32>
    %cst_139 = arith.constant dense<0.000000e+00> : vector<2x48xf32>
    %802 = tpu.matmul %350, %467, %cst_139 {dimension_numbers = #tpu.dot_dimension_numbers<[1], [0], [0], [1], [0, 0, 1, 1], [], []>} : vector<2x32xf32>, vector<32x48xf32>, vector<2x48xf32> -> vector<2x48xf32>
    %803 = vector.broadcast %468 : vector<1x48xf32> to vector<2x48xf32>
    %804 = arith.addf %802, %803 : vector<2x48xf32>
    %cst_140 = arith.constant dense<0.000000e+00> : vector<2x48xf32>
    %805 = tpu.matmul %801, %469, %cst_140 {dimension_numbers = #tpu.dot_dimension_numbers<[1], [0], [0], [1], [0, 0, 1, 1], [], []>} : vector<2x16xf32>, vector<16x48xf32>, vector<2x48xf32> -> vector<2x48xf32>
    %806 = vector.broadcast %470 : vector<1x48xf32> to vector<2x48xf32>
    %807 = arith.addf %805, %806 : vector<2x48xf32>
    %808 = vector.extract_strided_slice %804 {offsets = [0, 0], sizes = [2, 16], strides = [1, 1]} : vector<2x48xf32> to vector<2x16xf32>
    %809 = vector.extract_strided_slice %807 {offsets = [0, 0], sizes = [2, 16], strides = [1, 1]} : vector<2x48xf32> to vector<2x16xf32>
    %810 = arith.addf %808, %809 : vector<2x16xf32>
    %811 = arith.negf %810 : vector<2x16xf32>
    %812 = math.exp %811 : vector<2x16xf32>
    %cst_141 = arith.constant 1.000000e+00 : f32
    %813 = vector.broadcast %cst_141 : f32 to vector<2x16xf32>
    %814 = arith.addf %813, %812 : vector<2x16xf32>
    %815 = arith.divf %813, %814 : vector<2x16xf32>
    %816 = vector.extract_strided_slice %804 {offsets = [0, 16], sizes = [2, 16], strides = [1, 1]} : vector<2x48xf32> to vector<2x16xf32>
    %817 = vector.extract_strided_slice %807 {offsets = [0, 16], sizes = [2, 16], strides = [1, 1]} : vector<2x48xf32> to vector<2x16xf32>
    %818 = arith.addf %816, %817 : vector<2x16xf32>
    %819 = arith.negf %818 : vector<2x16xf32>
    %820 = math.exp %819 : vector<2x16xf32>
    %cst_142 = arith.constant 1.000000e+00 : f32
    %821 = vector.broadcast %cst_142 : f32 to vector<2x16xf32>
    %822 = arith.addf %821, %820 : vector<2x16xf32>
    %823 = arith.divf %821, %822 : vector<2x16xf32>
    %824 = vector.extract_strided_slice %804 {offsets = [0, 32], sizes = [2, 16], strides = [1, 1]} : vector<2x48xf32> to vector<2x16xf32>
    %825 = vector.extract_strided_slice %807 {offsets = [0, 32], sizes = [2, 16], strides = [1, 1]} : vector<2x48xf32> to vector<2x16xf32>
    %826 = arith.mulf %815, %825 : vector<2x16xf32>
    %827 = arith.addf %824, %826 : vector<2x16xf32>
    %828 = math.tanh %827 : vector<2x16xf32>
    %829 = arith.subf %801, %828 : vector<2x16xf32>
    %830 = arith.mulf %823, %829 : vector<2x16xf32>
    %831 = arith.addf %828, %830 : vector<2x16xf32>
    %cst_143 = arith.constant dense<0.000000e+00> : vector<2x48xf32>
    %832 = tpu.matmul %379, %467, %cst_143 {dimension_numbers = #tpu.dot_dimension_numbers<[1], [0], [0], [1], [0, 0, 1, 1], [], []>} : vector<2x32xf32>, vector<32x48xf32>, vector<2x48xf32> -> vector<2x48xf32>
    %833 = vector.broadcast %468 : vector<1x48xf32> to vector<2x48xf32>
    %834 = arith.addf %832, %833 : vector<2x48xf32>
    %cst_144 = arith.constant dense<0.000000e+00> : vector<2x48xf32>
    %835 = tpu.matmul %831, %469, %cst_144 {dimension_numbers = #tpu.dot_dimension_numbers<[1], [0], [0], [1], [0, 0, 1, 1], [], []>} : vector<2x16xf32>, vector<16x48xf32>, vector<2x48xf32> -> vector<2x48xf32>
    %836 = vector.broadcast %470 : vector<1x48xf32> to vector<2x48xf32>
    %837 = arith.addf %835, %836 : vector<2x48xf32>
    %838 = vector.extract_strided_slice %834 {offsets = [0, 0], sizes = [2, 16], strides = [1, 1]} : vector<2x48xf32> to vector<2x16xf32>
    %839 = vector.extract_strided_slice %837 {offsets = [0, 0], sizes = [2, 16], strides = [1, 1]} : vector<2x48xf32> to vector<2x16xf32>
    %840 = arith.addf %838, %839 : vector<2x16xf32>
    %841 = arith.negf %840 : vector<2x16xf32>
    %842 = math.exp %841 : vector<2x16xf32>
    %cst_145 = arith.constant 1.000000e+00 : f32
    %843 = vector.broadcast %cst_145 : f32 to vector<2x16xf32>
    %844 = arith.addf %843, %842 : vector<2x16xf32>
    %845 = arith.divf %843, %844 : vector<2x16xf32>
    %846 = vector.extract_strided_slice %834 {offsets = [0, 16], sizes = [2, 16], strides = [1, 1]} : vector<2x48xf32> to vector<2x16xf32>
    %847 = vector.extract_strided_slice %837 {offsets = [0, 16], sizes = [2, 16], strides = [1, 1]} : vector<2x48xf32> to vector<2x16xf32>
    %848 = arith.addf %846, %847 : vector<2x16xf32>
    %849 = arith.negf %848 : vector<2x16xf32>
    %850 = math.exp %849 : vector<2x16xf32>
    %cst_146 = arith.constant 1.000000e+00 : f32
    %851 = vector.broadcast %cst_146 : f32 to vector<2x16xf32>
    %852 = arith.addf %851, %850 : vector<2x16xf32>
    %853 = arith.divf %851, %852 : vector<2x16xf32>
    %854 = vector.extract_strided_slice %834 {offsets = [0, 32], sizes = [2, 16], strides = [1, 1]} : vector<2x48xf32> to vector<2x16xf32>
    %855 = vector.extract_strided_slice %837 {offsets = [0, 32], sizes = [2, 16], strides = [1, 1]} : vector<2x48xf32> to vector<2x16xf32>
    %856 = arith.mulf %845, %855 : vector<2x16xf32>
    %857 = arith.addf %854, %856 : vector<2x16xf32>
    %858 = math.tanh %857 : vector<2x16xf32>
    %859 = arith.subf %831, %858 : vector<2x16xf32>
    %860 = arith.mulf %853, %859 : vector<2x16xf32>
    %861 = arith.addf %858, %860 : vector<2x16xf32>
    %cst_147 = arith.constant dense<0.000000e+00> : vector<2x48xf32>
    %862 = tpu.matmul %408, %467, %cst_147 {dimension_numbers = #tpu.dot_dimension_numbers<[1], [0], [0], [1], [0, 0, 1, 1], [], []>} : vector<2x32xf32>, vector<32x48xf32>, vector<2x48xf32> -> vector<2x48xf32>
    %863 = vector.broadcast %468 : vector<1x48xf32> to vector<2x48xf32>
    %864 = arith.addf %862, %863 : vector<2x48xf32>
    %cst_148 = arith.constant dense<0.000000e+00> : vector<2x48xf32>
    %865 = tpu.matmul %861, %469, %cst_148 {dimension_numbers = #tpu.dot_dimension_numbers<[1], [0], [0], [1], [0, 0, 1, 1], [], []>} : vector<2x16xf32>, vector<16x48xf32>, vector<2x48xf32> -> vector<2x48xf32>
    %866 = vector.broadcast %470 : vector<1x48xf32> to vector<2x48xf32>
    %867 = arith.addf %865, %866 : vector<2x48xf32>
    %868 = vector.extract_strided_slice %864 {offsets = [0, 0], sizes = [2, 16], strides = [1, 1]} : vector<2x48xf32> to vector<2x16xf32>
    %869 = vector.extract_strided_slice %867 {offsets = [0, 0], sizes = [2, 16], strides = [1, 1]} : vector<2x48xf32> to vector<2x16xf32>
    %870 = arith.addf %868, %869 : vector<2x16xf32>
    %871 = arith.negf %870 : vector<2x16xf32>
    %872 = math.exp %871 : vector<2x16xf32>
    %cst_149 = arith.constant 1.000000e+00 : f32
    %873 = vector.broadcast %cst_149 : f32 to vector<2x16xf32>
    %874 = arith.addf %873, %872 : vector<2x16xf32>
    %875 = arith.divf %873, %874 : vector<2x16xf32>
    %876 = vector.extract_strided_slice %864 {offsets = [0, 16], sizes = [2, 16], strides = [1, 1]} : vector<2x48xf32> to vector<2x16xf32>
    %877 = vector.extract_strided_slice %867 {offsets = [0, 16], sizes = [2, 16], strides = [1, 1]} : vector<2x48xf32> to vector<2x16xf32>
    %878 = arith.addf %876, %877 : vector<2x16xf32>
    %879 = arith.negf %878 : vector<2x16xf32>
    %880 = math.exp %879 : vector<2x16xf32>
    %cst_150 = arith.constant 1.000000e+00 : f32
    %881 = vector.broadcast %cst_150 : f32 to vector<2x16xf32>
    %882 = arith.addf %881, %880 : vector<2x16xf32>
    %883 = arith.divf %881, %882 : vector<2x16xf32>
    %884 = vector.extract_strided_slice %864 {offsets = [0, 32], sizes = [2, 16], strides = [1, 1]} : vector<2x48xf32> to vector<2x16xf32>
    %885 = vector.extract_strided_slice %867 {offsets = [0, 32], sizes = [2, 16], strides = [1, 1]} : vector<2x48xf32> to vector<2x16xf32>
    %886 = arith.mulf %875, %885 : vector<2x16xf32>
    %887 = arith.addf %884, %886 : vector<2x16xf32>
    %888 = math.tanh %887 : vector<2x16xf32>
    %889 = arith.subf %861, %888 : vector<2x16xf32>
    %890 = arith.mulf %883, %889 : vector<2x16xf32>
    %891 = arith.addf %888, %890 : vector<2x16xf32>
    %cst_151 = arith.constant dense<0.000000e+00> : vector<2x48xf32>
    %892 = tpu.matmul %437, %467, %cst_151 {dimension_numbers = #tpu.dot_dimension_numbers<[1], [0], [0], [1], [0, 0, 1, 1], [], []>} : vector<2x32xf32>, vector<32x48xf32>, vector<2x48xf32> -> vector<2x48xf32>
    %893 = vector.broadcast %468 : vector<1x48xf32> to vector<2x48xf32>
    %894 = arith.addf %892, %893 : vector<2x48xf32>
    %cst_152 = arith.constant dense<0.000000e+00> : vector<2x48xf32>
    %895 = tpu.matmul %891, %469, %cst_152 {dimension_numbers = #tpu.dot_dimension_numbers<[1], [0], [0], [1], [0, 0, 1, 1], [], []>} : vector<2x16xf32>, vector<16x48xf32>, vector<2x48xf32> -> vector<2x48xf32>
    %896 = vector.broadcast %470 : vector<1x48xf32> to vector<2x48xf32>
    %897 = arith.addf %895, %896 : vector<2x48xf32>
    %898 = vector.extract_strided_slice %894 {offsets = [0, 0], sizes = [2, 16], strides = [1, 1]} : vector<2x48xf32> to vector<2x16xf32>
    %899 = vector.extract_strided_slice %897 {offsets = [0, 0], sizes = [2, 16], strides = [1, 1]} : vector<2x48xf32> to vector<2x16xf32>
    %900 = arith.addf %898, %899 : vector<2x16xf32>
    %901 = arith.negf %900 : vector<2x16xf32>
    %902 = math.exp %901 : vector<2x16xf32>
    %cst_153 = arith.constant 1.000000e+00 : f32
    %903 = vector.broadcast %cst_153 : f32 to vector<2x16xf32>
    %904 = arith.addf %903, %902 : vector<2x16xf32>
    %905 = arith.divf %903, %904 : vector<2x16xf32>
    %906 = vector.extract_strided_slice %894 {offsets = [0, 16], sizes = [2, 16], strides = [1, 1]} : vector<2x48xf32> to vector<2x16xf32>
    %907 = vector.extract_strided_slice %897 {offsets = [0, 16], sizes = [2, 16], strides = [1, 1]} : vector<2x48xf32> to vector<2x16xf32>
    %908 = arith.addf %906, %907 : vector<2x16xf32>
    %909 = arith.negf %908 : vector<2x16xf32>
    %910 = math.exp %909 : vector<2x16xf32>
    %cst_154 = arith.constant 1.000000e+00 : f32
    %911 = vector.broadcast %cst_154 : f32 to vector<2x16xf32>
    %912 = arith.addf %911, %910 : vector<2x16xf32>
    %913 = arith.divf %911, %912 : vector<2x16xf32>
    %914 = vector.extract_strided_slice %894 {offsets = [0, 32], sizes = [2, 16], strides = [1, 1]} : vector<2x48xf32> to vector<2x16xf32>
    %915 = vector.extract_strided_slice %897 {offsets = [0, 32], sizes = [2, 16], strides = [1, 1]} : vector<2x48xf32> to vector<2x16xf32>
    %916 = arith.mulf %905, %915 : vector<2x16xf32>
    %917 = arith.addf %914, %916 : vector<2x16xf32>
    %918 = math.tanh %917 : vector<2x16xf32>
    %919 = arith.subf %891, %918 : vector<2x16xf32>
    %920 = arith.mulf %913, %919 : vector<2x16xf32>
    %921 = arith.addf %918, %920 : vector<2x16xf32>
    %cst_155 = arith.constant dense<0.000000e+00> : vector<2x48xf32>
    %922 = tpu.matmul %466, %467, %cst_155 {dimension_numbers = #tpu.dot_dimension_numbers<[1], [0], [0], [1], [0, 0, 1, 1], [], []>} : vector<2x32xf32>, vector<32x48xf32>, vector<2x48xf32> -> vector<2x48xf32>
    %923 = vector.broadcast %468 : vector<1x48xf32> to vector<2x48xf32>
    %924 = arith.addf %922, %923 : vector<2x48xf32>
    %cst_156 = arith.constant dense<0.000000e+00> : vector<2x48xf32>
    %925 = tpu.matmul %921, %469, %cst_156 {dimension_numbers = #tpu.dot_dimension_numbers<[1], [0], [0], [1], [0, 0, 1, 1], [], []>} : vector<2x16xf32>, vector<16x48xf32>, vector<2x48xf32> -> vector<2x48xf32>
    %926 = vector.broadcast %470 : vector<1x48xf32> to vector<2x48xf32>
    %927 = arith.addf %925, %926 : vector<2x48xf32>
    %928 = vector.extract_strided_slice %924 {offsets = [0, 0], sizes = [2, 16], strides = [1, 1]} : vector<2x48xf32> to vector<2x16xf32>
    %929 = vector.extract_strided_slice %927 {offsets = [0, 0], sizes = [2, 16], strides = [1, 1]} : vector<2x48xf32> to vector<2x16xf32>
    %930 = arith.addf %928, %929 : vector<2x16xf32>
    %931 = arith.negf %930 : vector<2x16xf32>
    %932 = math.exp %931 : vector<2x16xf32>
    %cst_157 = arith.constant 1.000000e+00 : f32
    %933 = vector.broadcast %cst_157 : f32 to vector<2x16xf32>
    %934 = arith.addf %933, %932 : vector<2x16xf32>
    %935 = arith.divf %933, %934 : vector<2x16xf32>
    %936 = vector.extract_strided_slice %924 {offsets = [0, 16], sizes = [2, 16], strides = [1, 1]} : vector<2x48xf32> to vector<2x16xf32>
    %937 = vector.extract_strided_slice %927 {offsets = [0, 16], sizes = [2, 16], strides = [1, 1]} : vector<2x48xf32> to vector<2x16xf32>
    %938 = arith.addf %936, %937 : vector<2x16xf32>
    %939 = arith.negf %938 : vector<2x16xf32>
    %940 = math.exp %939 : vector<2x16xf32>
    %cst_158 = arith.constant 1.000000e+00 : f32
    %941 = vector.broadcast %cst_158 : f32 to vector<2x16xf32>
    %942 = arith.addf %941, %940 : vector<2x16xf32>
    %943 = arith.divf %941, %942 : vector<2x16xf32>
    %944 = vector.extract_strided_slice %924 {offsets = [0, 32], sizes = [2, 16], strides = [1, 1]} : vector<2x48xf32> to vector<2x16xf32>
    %945 = vector.extract_strided_slice %927 {offsets = [0, 32], sizes = [2, 16], strides = [1, 1]} : vector<2x48xf32> to vector<2x16xf32>
    %946 = arith.mulf %935, %945 : vector<2x16xf32>
    %947 = arith.addf %944, %946 : vector<2x16xf32>
    %948 = math.tanh %947 : vector<2x16xf32>
    %949 = arith.subf %921, %948 : vector<2x16xf32>
    %950 = arith.mulf %943, %949 : vector<2x16xf32>
    %951 = arith.addf %948, %950 : vector<2x16xf32>
    %c0_159 = arith.constant 0 : index
    %c0_160 = arith.constant 0 : index
    %952 = vector.load %arg10[%c0_159, %c0_160] : memref<16x6xf32, #tpu.memory_space<vmem>>, vector<16x6xf32>
    %c0_161 = arith.constant 0 : index
    %c0_162 = arith.constant 0 : index
    %953 = vector.load %arg11[%c0_161, %c0_162] : memref<1x6xf32, #tpu.memory_space<vmem>>, vector<1x6xf32>
    %c0_163 = arith.constant 0 : index
    %c0_164 = arith.constant 0 : index
    %954 = vector.load %arg12[%c0_163, %c0_164] : memref<2x6xf32, #tpu.memory_space<vmem>>, vector<2x6xf32>
    %c0_165 = arith.constant 0 : index
    %c0_166 = arith.constant 0 : index
    %955 = vector.load %arg13[%c0_165, %c0_166] : memref<1x6xf32, #tpu.memory_space<vmem>>, vector<1x6xf32>
    %c0_167 = arith.constant 0 : index
    %c0_168 = arith.constant 0 : index
    %956 = vector.load %arg9[%c0_167, %c0_168] : memref<2x2xf32, #tpu.memory_space<vmem>>, vector<2x2xf32>
    %cst_169 = arith.constant dense<0.000000e+00> : vector<2x6xf32>
    %957 = tpu.matmul %501, %952, %cst_169 {dimension_numbers = #tpu.dot_dimension_numbers<[1], [0], [0], [1], [0, 0, 1, 1], [], []>} : vector<2x16xf32>, vector<16x6xf32>, vector<2x6xf32> -> vector<2x6xf32>
    %958 = vector.broadcast %953 : vector<1x6xf32> to vector<2x6xf32>
    %959 = arith.addf %957, %958 : vector<2x6xf32>
    %cst_170 = arith.constant dense<0.000000e+00> : vector<2x6xf32>
    %960 = tpu.matmul %956, %954, %cst_170 {dimension_numbers = #tpu.dot_dimension_numbers<[1], [0], [0], [1], [0, 0, 1, 1], [], []>} : vector<2x2xf32>, vector<2x6xf32>, vector<2x6xf32> -> vector<2x6xf32>
    %961 = vector.broadcast %955 : vector<1x6xf32> to vector<2x6xf32>
    %962 = arith.addf %960, %961 : vector<2x6xf32>
    %963 = vector.extract_strided_slice %959 {offsets = [0, 0], sizes = [2, 2], strides = [1, 1]} : vector<2x6xf32> to vector<2x2xf32>
    %964 = vector.extract_strided_slice %962 {offsets = [0, 0], sizes = [2, 2], strides = [1, 1]} : vector<2x6xf32> to vector<2x2xf32>
    %965 = arith.addf %963, %964 : vector<2x2xf32>
    %966 = arith.negf %965 : vector<2x2xf32>
    %967 = math.exp %966 : vector<2x2xf32>
    %cst_171 = arith.constant 1.000000e+00 : f32
    %968 = vector.broadcast %cst_171 : f32 to vector<2x2xf32>
    %969 = arith.addf %968, %967 : vector<2x2xf32>
    %970 = arith.divf %968, %969 : vector<2x2xf32>
    %971 = vector.extract_strided_slice %959 {offsets = [0, 2], sizes = [2, 2], strides = [1, 1]} : vector<2x6xf32> to vector<2x2xf32>
    %972 = vector.extract_strided_slice %962 {offsets = [0, 2], sizes = [2, 2], strides = [1, 1]} : vector<2x6xf32> to vector<2x2xf32>
    %973 = arith.addf %971, %972 : vector<2x2xf32>
    %974 = arith.negf %973 : vector<2x2xf32>
    %975 = math.exp %974 : vector<2x2xf32>
    %cst_172 = arith.constant 1.000000e+00 : f32
    %976 = vector.broadcast %cst_172 : f32 to vector<2x2xf32>
    %977 = arith.addf %976, %975 : vector<2x2xf32>
    %978 = arith.divf %976, %977 : vector<2x2xf32>
    %979 = vector.extract_strided_slice %959 {offsets = [0, 4], sizes = [2, 2], strides = [1, 1]} : vector<2x6xf32> to vector<2x2xf32>
    %980 = vector.extract_strided_slice %962 {offsets = [0, 4], sizes = [2, 2], strides = [1, 1]} : vector<2x6xf32> to vector<2x2xf32>
    %981 = arith.mulf %970, %980 : vector<2x2xf32>
    %982 = arith.addf %979, %981 : vector<2x2xf32>
    %983 = math.tanh %982 : vector<2x2xf32>
    %984 = arith.subf %956, %983 : vector<2x2xf32>
    %985 = arith.mulf %978, %984 : vector<2x2xf32>
    %986 = arith.addf %983, %985 : vector<2x2xf32>
    %c0_173 = arith.constant 0 : index
    %c0_174 = arith.constant 0 : index
    %c0_175 = arith.constant 0 : index
    %987 = vector.load %arg14[%c0_173, %c0_174, %c0_175] : memref<16x2x2xf32, #tpu.memory_space<vmem>>, vector<1x2x2xf32>
    %988 = vector.shape_cast %987 : vector<1x2x2xf32> to vector<2x2xf32>
    %989 = vector.shape_cast %986 : vector<2x2xf32> to vector<1x2x2xf32>
    tpu.vector_store %arg14[%c0_173, %c0_174, %c0_175], %989 {strides = array<i32>} : memref<16x2x2xf32, #tpu.memory_space<vmem>>, vector<1x2x2xf32>,
    %cst_176 = arith.constant dense<0.000000e+00> : vector<2x6xf32>
    %990 = tpu.matmul %531, %952, %cst_176 {dimension_numbers = #tpu.dot_dimension_numbers<[1], [0], [0], [1], [0, 0, 1, 1], [], []>} : vector<2x16xf32>, vector<16x6xf32>, vector<2x6xf32> -> vector<2x6xf32>
    %991 = vector.broadcast %953 : vector<1x6xf32> to vector<2x6xf32>
    %992 = arith.addf %990, %991 : vector<2x6xf32>
    %cst_177 = arith.constant dense<0.000000e+00> : vector<2x6xf32>
    %993 = tpu.matmul %986, %954, %cst_177 {dimension_numbers = #tpu.dot_dimension_numbers<[1], [0], [0], [1], [0, 0, 1, 1], [], []>} : vector<2x2xf32>, vector<2x6xf32>, vector<2x6xf32> -> vector<2x6xf32>
    %994 = vector.broadcast %955 : vector<1x6xf32> to vector<2x6xf32>
    %995 = arith.addf %993, %994 : vector<2x6xf32>
    %996 = vector.extract_strided_slice %992 {offsets = [0, 0], sizes = [2, 2], strides = [1, 1]} : vector<2x6xf32> to vector<2x2xf32>
    %997 = vector.extract_strided_slice %995 {offsets = [0, 0], sizes = [2, 2], strides = [1, 1]} : vector<2x6xf32> to vector<2x2xf32>
    %998 = arith.addf %996, %997 : vector<2x2xf32>
    %999 = arith.negf %998 : vector<2x2xf32>
    %1000 = math.exp %999 : vector<2x2xf32>
    %cst_178 = arith.constant 1.000000e+00 : f32
    %1001 = vector.broadcast %cst_178 : f32 to vector<2x2xf32>
    %1002 = arith.addf %1001, %1000 : vector<2x2xf32>
    %1003 = arith.divf %1001, %1002 : vector<2x2xf32>
    %1004 = vector.extract_strided_slice %992 {offsets = [0, 2], sizes = [2, 2], strides = [1, 1]} : vector<2x6xf32> to vector<2x2xf32>
    %1005 = vector.extract_strided_slice %995 {offsets = [0, 2], sizes = [2, 2], strides = [1, 1]} : vector<2x6xf32> to vector<2x2xf32>
    %1006 = arith.addf %1004, %1005 : vector<2x2xf32>
    %1007 = arith.negf %1006 : vector<2x2xf32>
    %1008 = math.exp %1007 : vector<2x2xf32>
    %cst_179 = arith.constant 1.000000e+00 : f32
    %1009 = vector.broadcast %cst_179 : f32 to vector<2x2xf32>
    %1010 = arith.addf %1009, %1008 : vector<2x2xf32>
    %1011 = arith.divf %1009, %1010 : vector<2x2xf32>
    %1012 = vector.extract_strided_slice %992 {offsets = [0, 4], sizes = [2, 2], strides = [1, 1]} : vector<2x6xf32> to vector<2x2xf32>
    %1013 = vector.extract_strided_slice %995 {offsets = [0, 4], sizes = [2, 2], strides = [1, 1]} : vector<2x6xf32> to vector<2x2xf32>
    %1014 = arith.mulf %1003, %1013 : vector<2x2xf32>
    %1015 = arith.addf %1012, %1014 : vector<2x2xf32>
    %1016 = math.tanh %1015 : vector<2x2xf32>
    %1017 = arith.subf %986, %1016 : vector<2x2xf32>
    %1018 = arith.mulf %1011, %1017 : vector<2x2xf32>
    %1019 = arith.addf %1016, %1018 : vector<2x2xf32>
    %c1_180 = arith.constant 1 : index
    %c0_181 = arith.constant 0 : index
    %c0_182 = arith.constant 0 : index
    %1020 = vector.load %arg14[%c1_180, %c0_181, %c0_182] : memref<16x2x2xf32, #tpu.memory_space<vmem>>, vector<1x2x2xf32>
    %1021 = vector.shape_cast %1020 : vector<1x2x2xf32> to vector<2x2xf32>
    %1022 = vector.shape_cast %1019 : vector<2x2xf32> to vector<1x2x2xf32>
    tpu.vector_store %arg14[%c1_180, %c0_181, %c0_182], %1022 {strides = array<i32>} : memref<16x2x2xf32, #tpu.memory_space<vmem>>, vector<1x2x2xf32>,
    %cst_183 = arith.constant dense<0.000000e+00> : vector<2x6xf32>
    %1023 = tpu.matmul %561, %952, %cst_183 {dimension_numbers = #tpu.dot_dimension_numbers<[1], [0], [0], [1], [0, 0, 1, 1], [], []>} : vector<2x16xf32>, vector<16x6xf32>, vector<2x6xf32> -> vector<2x6xf32>
    %1024 = vector.broadcast %953 : vector<1x6xf32> to vector<2x6xf32>
    %1025 = arith.addf %1023, %1024 : vector<2x6xf32>
    %cst_184 = arith.constant dense<0.000000e+00> : vector<2x6xf32>
    %1026 = tpu.matmul %1019, %954, %cst_184 {dimension_numbers = #tpu.dot_dimension_numbers<[1], [0], [0], [1], [0, 0, 1, 1], [], []>} : vector<2x2xf32>, vector<2x6xf32>, vector<2x6xf32> -> vector<2x6xf32>
    %1027 = vector.broadcast %955 : vector<1x6xf32> to vector<2x6xf32>
    %1028 = arith.addf %1026, %1027 : vector<2x6xf32>
    %1029 = vector.extract_strided_slice %1025 {offsets = [0, 0], sizes = [2, 2], strides = [1, 1]} : vector<2x6xf32> to vector<2x2xf32>
    %1030 = vector.extract_strided_slice %1028 {offsets = [0, 0], sizes = [2, 2], strides = [1, 1]} : vector<2x6xf32> to vector<2x2xf32>
    %1031 = arith.addf %1029, %1030 : vector<2x2xf32>
    %1032 = arith.negf %1031 : vector<2x2xf32>
    %1033 = math.exp %1032 : vector<2x2xf32>
    %cst_185 = arith.constant 1.000000e+00 : f32
    %1034 = vector.broadcast %cst_185 : f32 to vector<2x2xf32>
    %1035 = arith.addf %1034, %1033 : vector<2x2xf32>
    %1036 = arith.divf %1034, %1035 : vector<2x2xf32>
    %1037 = vector.extract_strided_slice %1025 {offsets = [0, 2], sizes = [2, 2], strides = [1, 1]} : vector<2x6xf32> to vector<2x2xf32>
    %1038 = vector.extract_strided_slice %1028 {offsets = [0, 2], sizes = [2, 2], strides = [1, 1]} : vector<2x6xf32> to vector<2x2xf32>
    %1039 = arith.addf %1037, %1038 : vector<2x2xf32>
    %1040 = arith.negf %1039 : vector<2x2xf32>
    %1041 = math.exp %1040 : vector<2x2xf32>
    %cst_186 = arith.constant 1.000000e+00 : f32
    %1042 = vector.broadcast %cst_186 : f32 to vector<2x2xf32>
    %1043 = arith.addf %1042, %1041 : vector<2x2xf32>
    %1044 = arith.divf %1042, %1043 : vector<2x2xf32>
    %1045 = vector.extract_strided_slice %1025 {offsets = [0, 4], sizes = [2, 2], strides = [1, 1]} : vector<2x6xf32> to vector<2x2xf32>
    %1046 = vector.extract_strided_slice %1028 {offsets = [0, 4], sizes = [2, 2], strides = [1, 1]} : vector<2x6xf32> to vector<2x2xf32>
    %1047 = arith.mulf %1036, %1046 : vector<2x2xf32>
    %1048 = arith.addf %1045, %1047 : vector<2x2xf32>
    %1049 = math.tanh %1048 : vector<2x2xf32>
    %1050 = arith.subf %1019, %1049 : vector<2x2xf32>
    %1051 = arith.mulf %1044, %1050 : vector<2x2xf32>
    %1052 = arith.addf %1049, %1051 : vector<2x2xf32>
    %c2_187 = arith.constant 2 : index
    %c0_188 = arith.constant 0 : index
    %c0_189 = arith.constant 0 : index
    %1053 = vector.load %arg14[%c2_187, %c0_188, %c0_189] : memref<16x2x2xf32, #tpu.memory_space<vmem>>, vector<1x2x2xf32>
    %1054 = vector.shape_cast %1053 : vector<1x2x2xf32> to vector<2x2xf32>
    %1055 = vector.shape_cast %1052 : vector<2x2xf32> to vector<1x2x2xf32>
    tpu.vector_store %arg14[%c2_187, %c0_188, %c0_189], %1055 {strides = array<i32>} : memref<16x2x2xf32, #tpu.memory_space<vmem>>, vector<1x2x2xf32>,
    %cst_190 = arith.constant dense<0.000000e+00> : vector<2x6xf32>
    %1056 = tpu.matmul %591, %952, %cst_190 {dimension_numbers = #tpu.dot_dimension_numbers<[1], [0], [0], [1], [0, 0, 1, 1], [], []>} : vector<2x16xf32>, vector<16x6xf32>, vector<2x6xf32> -> vector<2x6xf32>
    %1057 = vector.broadcast %953 : vector<1x6xf32> to vector<2x6xf32>
    %1058 = arith.addf %1056, %1057 : vector<2x6xf32>
    %cst_191 = arith.constant dense<0.000000e+00> : vector<2x6xf32>
    %1059 = tpu.matmul %1052, %954, %cst_191 {dimension_numbers = #tpu.dot_dimension_numbers<[1], [0], [0], [1], [0, 0, 1, 1], [], []>} : vector<2x2xf32>, vector<2x6xf32>, vector<2x6xf32> -> vector<2x6xf32>
    %1060 = vector.broadcast %955 : vector<1x6xf32> to vector<2x6xf32>
    %1061 = arith.addf %1059, %1060 : vector<2x6xf32>
    %1062 = vector.extract_strided_slice %1058 {offsets = [0, 0], sizes = [2, 2], strides = [1, 1]} : vector<2x6xf32> to vector<2x2xf32>
    %1063 = vector.extract_strided_slice %1061 {offsets = [0, 0], sizes = [2, 2], strides = [1, 1]} : vector<2x6xf32> to vector<2x2xf32>
    %1064 = arith.addf %1062, %1063 : vector<2x2xf32>
    %1065 = arith.negf %1064 : vector<2x2xf32>
    %1066 = math.exp %1065 : vector<2x2xf32>
    %cst_192 = arith.constant 1.000000e+00 : f32
    %1067 = vector.broadcast %cst_192 : f32 to vector<2x2xf32>
    %1068 = arith.addf %1067, %1066 : vector<2x2xf32>
    %1069 = arith.divf %1067, %1068 : vector<2x2xf32>
    %1070 = vector.extract_strided_slice %1058 {offsets = [0, 2], sizes = [2, 2], strides = [1, 1]} : vector<2x6xf32> to vector<2x2xf32>
    %1071 = vector.extract_strided_slice %1061 {offsets = [0, 2], sizes = [2, 2], strides = [1, 1]} : vector<2x6xf32> to vector<2x2xf32>
    %1072 = arith.addf %1070, %1071 : vector<2x2xf32>
    %1073 = arith.negf %1072 : vector<2x2xf32>
    %1074 = math.exp %1073 : vector<2x2xf32>
    %cst_193 = arith.constant 1.000000e+00 : f32
    %1075 = vector.broadcast %cst_193 : f32 to vector<2x2xf32>
    %1076 = arith.addf %1075, %1074 : vector<2x2xf32>
    %1077 = arith.divf %1075, %1076 : vector<2x2xf32>
    %1078 = vector.extract_strided_slice %1058 {offsets = [0, 4], sizes = [2, 2], strides = [1, 1]} : vector<2x6xf32> to vector<2x2xf32>
    %1079 = vector.extract_strided_slice %1061 {offsets = [0, 4], sizes = [2, 2], strides = [1, 1]} : vector<2x6xf32> to vector<2x2xf32>
    %1080 = arith.mulf %1069, %1079 : vector<2x2xf32>
    %1081 = arith.addf %1078, %1080 : vector<2x2xf32>
    %1082 = math.tanh %1081 : vector<2x2xf32>
    %1083 = arith.subf %1052, %1082 : vector<2x2xf32>
    %1084 = arith.mulf %1077, %1083 : vector<2x2xf32>
    %1085 = arith.addf %1082, %1084 : vector<2x2xf32>
    %c3_194 = arith.constant 3 : index
    %c0_195 = arith.constant 0 : index
    %c0_196 = arith.constant 0 : index
    %1086 = vector.load %arg14[%c3_194, %c0_195, %c0_196] : memref<16x2x2xf32, #tpu.memory_space<vmem>>, vector<1x2x2xf32>
    %1087 = vector.shape_cast %1086 : vector<1x2x2xf32> to vector<2x2xf32>
    %1088 = vector.shape_cast %1085 : vector<2x2xf32> to vector<1x2x2xf32>
    tpu.vector_store %arg14[%c3_194, %c0_195, %c0_196], %1088 {strides = array<i32>} : memref<16x2x2xf32, #tpu.memory_space<vmem>>, vector<1x2x2xf32>,
    %cst_197 = arith.constant dense<0.000000e+00> : vector<2x6xf32>
    %1089 = tpu.matmul %621, %952, %cst_197 {dimension_numbers = #tpu.dot_dimension_numbers<[1], [0], [0], [1], [0, 0, 1, 1], [], []>} : vector<2x16xf32>, vector<16x6xf32>, vector<2x6xf32> -> vector<2x6xf32>
    %1090 = vector.broadcast %953 : vector<1x6xf32> to vector<2x6xf32>
    %1091 = arith.addf %1089, %1090 : vector<2x6xf32>
    %cst_198 = arith.constant dense<0.000000e+00> : vector<2x6xf32>
    %1092 = tpu.matmul %1085, %954, %cst_198 {dimension_numbers = #tpu.dot_dimension_numbers<[1], [0], [0], [1], [0, 0, 1, 1], [], []>} : vector<2x2xf32>, vector<2x6xf32>, vector<2x6xf32> -> vector<2x6xf32>
    %1093 = vector.broadcast %955 : vector<1x6xf32> to vector<2x6xf32>
    %1094 = arith.addf %1092, %1093 : vector<2x6xf32>
    %1095 = vector.extract_strided_slice %1091 {offsets = [0, 0], sizes = [2, 2], strides = [1, 1]} : vector<2x6xf32> to vector<2x2xf32>
    %1096 = vector.extract_strided_slice %1094 {offsets = [0, 0], sizes = [2, 2], strides = [1, 1]} : vector<2x6xf32> to vector<2x2xf32>
    %1097 = arith.addf %1095, %1096 : vector<2x2xf32>
    %1098 = arith.negf %1097 : vector<2x2xf32>
    %1099 = math.exp %1098 : vector<2x2xf32>
    %cst_199 = arith.constant 1.000000e+00 : f32
    %1100 = vector.broadcast %cst_199 : f32 to vector<2x2xf32>
    %1101 = arith.addf %1100, %1099 : vector<2x2xf32>
    %1102 = arith.divf %1100, %1101 : vector<2x2xf32>
    %1103 = vector.extract_strided_slice %1091 {offsets = [0, 2], sizes = [2, 2], strides = [1, 1]} : vector<2x6xf32> to vector<2x2xf32>
    %1104 = vector.extract_strided_slice %1094 {offsets = [0, 2], sizes = [2, 2], strides = [1, 1]} : vector<2x6xf32> to vector<2x2xf32>
    %1105 = arith.addf %1103, %1104 : vector<2x2xf32>
    %1106 = arith.negf %1105 : vector<2x2xf32>
    %1107 = math.exp %1106 : vector<2x2xf32>
    %cst_200 = arith.constant 1.000000e+00 : f32
    %1108 = vector.broadcast %cst_200 : f32 to vector<2x2xf32>
    %1109 = arith.addf %1108, %1107 : vector<2x2xf32>
    %1110 = arith.divf %1108, %1109 : vector<2x2xf32>
    %1111 = vector.extract_strided_slice %1091 {offsets = [0, 4], sizes = [2, 2], strides = [1, 1]} : vector<2x6xf32> to vector<2x2xf32>
    %1112 = vector.extract_strided_slice %1094 {offsets = [0, 4], sizes = [2, 2], strides = [1, 1]} : vector<2x6xf32> to vector<2x2xf32>
    %1113 = arith.mulf %1102, %1112 : vector<2x2xf32>
    %1114 = arith.addf %1111, %1113 : vector<2x2xf32>
    %1115 = math.tanh %1114 : vector<2x2xf32>
    %1116 = arith.subf %1085, %1115 : vector<2x2xf32>
    %1117 = arith.mulf %1110, %1116 : vector<2x2xf32>
    %1118 = arith.addf %1115, %1117 : vector<2x2xf32>
    %c4_201 = arith.constant 4 : index
    %c0_202 = arith.constant 0 : index
    %c0_203 = arith.constant 0 : index
    %1119 = vector.load %arg14[%c4_201, %c0_202, %c0_203] : memref<16x2x2xf32, #tpu.memory_space<vmem>>, vector<1x2x2xf32>
    %1120 = vector.shape_cast %1119 : vector<1x2x2xf32> to vector<2x2xf32>
    %1121 = vector.shape_cast %1118 : vector<2x2xf32> to vector<1x2x2xf32>
    tpu.vector_store %arg14[%c4_201, %c0_202, %c0_203], %1121 {strides = array<i32>} : memref<16x2x2xf32, #tpu.memory_space<vmem>>, vector<1x2x2xf32>,
    %cst_204 = arith.constant dense<0.000000e+00> : vector<2x6xf32>
    %1122 = tpu.matmul %651, %952, %cst_204 {dimension_numbers = #tpu.dot_dimension_numbers<[1], [0], [0], [1], [0, 0, 1, 1], [], []>} : vector<2x16xf32>, vector<16x6xf32>, vector<2x6xf32> -> vector<2x6xf32>
    %1123 = vector.broadcast %953 : vector<1x6xf32> to vector<2x6xf32>
    %1124 = arith.addf %1122, %1123 : vector<2x6xf32>
    %cst_205 = arith.constant dense<0.000000e+00> : vector<2x6xf32>
    %1125 = tpu.matmul %1118, %954, %cst_205 {dimension_numbers = #tpu.dot_dimension_numbers<[1], [0], [0], [1], [0, 0, 1, 1], [], []>} : vector<2x2xf32>, vector<2x6xf32>, vector<2x6xf32> -> vector<2x6xf32>
    %1126 = vector.broadcast %955 : vector<1x6xf32> to vector<2x6xf32>
    %1127 = arith.addf %1125, %1126 : vector<2x6xf32>
    %1128 = vector.extract_strided_slice %1124 {offsets = [0, 0], sizes = [2, 2], strides = [1, 1]} : vector<2x6xf32> to vector<2x2xf32>
    %1129 = vector.extract_strided_slice %1127 {offsets = [0, 0], sizes = [2, 2], strides = [1, 1]} : vector<2x6xf32> to vector<2x2xf32>
    %1130 = arith.addf %1128, %1129 : vector<2x2xf32>
    %1131 = arith.negf %1130 : vector<2x2xf32>
    %1132 = math.exp %1131 : vector<2x2xf32>
    %cst_206 = arith.constant 1.000000e+00 : f32
    %1133 = vector.broadcast %cst_206 : f32 to vector<2x2xf32>
    %1134 = arith.addf %1133, %1132 : vector<2x2xf32>
    %1135 = arith.divf %1133, %1134 : vector<2x2xf32>
    %1136 = vector.extract_strided_slice %1124 {offsets = [0, 2], sizes = [2, 2], strides = [1, 1]} : vector<2x6xf32> to vector<2x2xf32>
    %1137 = vector.extract_strided_slice %1127 {offsets = [0, 2], sizes = [2, 2], strides = [1, 1]} : vector<2x6xf32> to vector<2x2xf32>
    %1138 = arith.addf %1136, %1137 : vector<2x2xf32>
    %1139 = arith.negf %1138 : vector<2x2xf32>
    %1140 = math.exp %1139 : vector<2x2xf32>
    %cst_207 = arith.constant 1.000000e+00 : f32
    %1141 = vector.broadcast %cst_207 : f32 to vector<2x2xf32>
    %1142 = arith.addf %1141, %1140 : vector<2x2xf32>
    %1143 = arith.divf %1141, %1142 : vector<2x2xf32>
    %1144 = vector.extract_strided_slice %1124 {offsets = [0, 4], sizes = [2, 2], strides = [1, 1]} : vector<2x6xf32> to vector<2x2xf32>
    %1145 = vector.extract_strided_slice %1127 {offsets = [0, 4], sizes = [2, 2], strides = [1, 1]} : vector<2x6xf32> to vector<2x2xf32>
    %1146 = arith.mulf %1135, %1145 : vector<2x2xf32>
    %1147 = arith.addf %1144, %1146 : vector<2x2xf32>
    %1148 = math.tanh %1147 : vector<2x2xf32>
    %1149 = arith.subf %1118, %1148 : vector<2x2xf32>
    %1150 = arith.mulf %1143, %1149 : vector<2x2xf32>
    %1151 = arith.addf %1148, %1150 : vector<2x2xf32>
    %c5_208 = arith.constant 5 : index
    %c0_209 = arith.constant 0 : index
    %c0_210 = arith.constant 0 : index
    %1152 = vector.load %arg14[%c5_208, %c0_209, %c0_210] : memref<16x2x2xf32, #tpu.memory_space<vmem>>, vector<1x2x2xf32>
    %1153 = vector.shape_cast %1152 : vector<1x2x2xf32> to vector<2x2xf32>
    %1154 = vector.shape_cast %1151 : vector<2x2xf32> to vector<1x2x2xf32>
    tpu.vector_store %arg14[%c5_208, %c0_209, %c0_210], %1154 {strides = array<i32>} : memref<16x2x2xf32, #tpu.memory_space<vmem>>, vector<1x2x2xf32>,
    %cst_211 = arith.constant dense<0.000000e+00> : vector<2x6xf32>
    %1155 = tpu.matmul %681, %952, %cst_211 {dimension_numbers = #tpu.dot_dimension_numbers<[1], [0], [0], [1], [0, 0, 1, 1], [], []>} : vector<2x16xf32>, vector<16x6xf32>, vector<2x6xf32> -> vector<2x6xf32>
    %1156 = vector.broadcast %953 : vector<1x6xf32> to vector<2x6xf32>
    %1157 = arith.addf %1155, %1156 : vector<2x6xf32>
    %cst_212 = arith.constant dense<0.000000e+00> : vector<2x6xf32>
    %1158 = tpu.matmul %1151, %954, %cst_212 {dimension_numbers = #tpu.dot_dimension_numbers<[1], [0], [0], [1], [0, 0, 1, 1], [], []>} : vector<2x2xf32>, vector<2x6xf32>, vector<2x6xf32> -> vector<2x6xf32>
    %1159 = vector.broadcast %955 : vector<1x6xf32> to vector<2x6xf32>
    %1160 = arith.addf %1158, %1159 : vector<2x6xf32>
    %1161 = vector.extract_strided_slice %1157 {offsets = [0, 0], sizes = [2, 2], strides = [1, 1]} : vector<2x6xf32> to vector<2x2xf32>
    %1162 = vector.extract_strided_slice %1160 {offsets = [0, 0], sizes = [2, 2], strides = [1, 1]} : vector<2x6xf32> to vector<2x2xf32>
    %1163 = arith.addf %1161, %1162 : vector<2x2xf32>
    %1164 = arith.negf %1163 : vector<2x2xf32>
    %1165 = math.exp %1164 : vector<2x2xf32>
    %cst_213 = arith.constant 1.000000e+00 : f32
    %1166 = vector.broadcast %cst_213 : f32 to vector<2x2xf32>
    %1167 = arith.addf %1166, %1165 : vector<2x2xf32>
    %1168 = arith.divf %1166, %1167 : vector<2x2xf32>
    %1169 = vector.extract_strided_slice %1157 {offsets = [0, 2], sizes = [2, 2], strides = [1, 1]} : vector<2x6xf32> to vector<2x2xf32>
    %1170 = vector.extract_strided_slice %1160 {offsets = [0, 2], sizes = [2, 2], strides = [1, 1]} : vector<2x6xf32> to vector<2x2xf32>
    %1171 = arith.addf %1169, %1170 : vector<2x2xf32>
    %1172 = arith.negf %1171 : vector<2x2xf32>
    %1173 = math.exp %1172 : vector<2x2xf32>
    %cst_214 = arith.constant 1.000000e+00 : f32
    %1174 = vector.broadcast %cst_214 : f32 to vector<2x2xf32>
    %1175 = arith.addf %1174, %1173 : vector<2x2xf32>
    %1176 = arith.divf %1174, %1175 : vector<2x2xf32>
    %1177 = vector.extract_strided_slice %1157 {offsets = [0, 4], sizes = [2, 2], strides = [1, 1]} : vector<2x6xf32> to vector<2x2xf32>
    %1178 = vector.extract_strided_slice %1160 {offsets = [0, 4], sizes = [2, 2], strides = [1, 1]} : vector<2x6xf32> to vector<2x2xf32>
    %1179 = arith.mulf %1168, %1178 : vector<2x2xf32>
    %1180 = arith.addf %1177, %1179 : vector<2x2xf32>
    %1181 = math.tanh %1180 : vector<2x2xf32>
    %1182 = arith.subf %1151, %1181 : vector<2x2xf32>
    %1183 = arith.mulf %1176, %1182 : vector<2x2xf32>
    %1184 = arith.addf %1181, %1183 : vector<2x2xf32>
    %c6_215 = arith.constant 6 : index
    %c0_216 = arith.constant 0 : index
    %c0_217 = arith.constant 0 : index
    %1185 = vector.load %arg14[%c6_215, %c0_216, %c0_217] : memref<16x2x2xf32, #tpu.memory_space<vmem>>, vector<1x2x2xf32>
    %1186 = vector.shape_cast %1185 : vector<1x2x2xf32> to vector<2x2xf32>
    %1187 = vector.shape_cast %1184 : vector<2x2xf32> to vector<1x2x2xf32>
    tpu.vector_store %arg14[%c6_215, %c0_216, %c0_217], %1187 {strides = array<i32>} : memref<16x2x2xf32, #tpu.memory_space<vmem>>, vector<1x2x2xf32>,
    %cst_218 = arith.constant dense<0.000000e+00> : vector<2x6xf32>
    %1188 = tpu.matmul %711, %952, %cst_218 {dimension_numbers = #tpu.dot_dimension_numbers<[1], [0], [0], [1], [0, 0, 1, 1], [], []>} : vector<2x16xf32>, vector<16x6xf32>, vector<2x6xf32> -> vector<2x6xf32>
    %1189 = vector.broadcast %953 : vector<1x6xf32> to vector<2x6xf32>
    %1190 = arith.addf %1188, %1189 : vector<2x6xf32>
    %cst_219 = arith.constant dense<0.000000e+00> : vector<2x6xf32>
    %1191 = tpu.matmul %1184, %954, %cst_219 {dimension_numbers = #tpu.dot_dimension_numbers<[1], [0], [0], [1], [0, 0, 1, 1], [], []>} : vector<2x2xf32>, vector<2x6xf32>, vector<2x6xf32> -> vector<2x6xf32>
    %1192 = vector.broadcast %955 : vector<1x6xf32> to vector<2x6xf32>
    %1193 = arith.addf %1191, %1192 : vector<2x6xf32>
    %1194 = vector.extract_strided_slice %1190 {offsets = [0, 0], sizes = [2, 2], strides = [1, 1]} : vector<2x6xf32> to vector<2x2xf32>
    %1195 = vector.extract_strided_slice %1193 {offsets = [0, 0], sizes = [2, 2], strides = [1, 1]} : vector<2x6xf32> to vector<2x2xf32>
    %1196 = arith.addf %1194, %1195 : vector<2x2xf32>
    %1197 = arith.negf %1196 : vector<2x2xf32>
    %1198 = math.exp %1197 : vector<2x2xf32>
    %cst_220 = arith.constant 1.000000e+00 : f32
    %1199 = vector.broadcast %cst_220 : f32 to vector<2x2xf32>
    %1200 = arith.addf %1199, %1198 : vector<2x2xf32>
    %1201 = arith.divf %1199, %1200 : vector<2x2xf32>
    %1202 = vector.extract_strided_slice %1190 {offsets = [0, 2], sizes = [2, 2], strides = [1, 1]} : vector<2x6xf32> to vector<2x2xf32>
    %1203 = vector.extract_strided_slice %1193 {offsets = [0, 2], sizes = [2, 2], strides = [1, 1]} : vector<2x6xf32> to vector<2x2xf32>
    %1204 = arith.addf %1202, %1203 : vector<2x2xf32>
    %1205 = arith.negf %1204 : vector<2x2xf32>
    %1206 = math.exp %1205 : vector<2x2xf32>
    %cst_221 = arith.constant 1.000000e+00 : f32
    %1207 = vector.broadcast %cst_221 : f32 to vector<2x2xf32>
    %1208 = arith.addf %1207, %1206 : vector<2x2xf32>
    %1209 = arith.divf %1207, %1208 : vector<2x2xf32>
    %1210 = vector.extract_strided_slice %1190 {offsets = [0, 4], sizes = [2, 2], strides = [1, 1]} : vector<2x6xf32> to vector<2x2xf32>
    %1211 = vector.extract_strided_slice %1193 {offsets = [0, 4], sizes = [2, 2], strides = [1, 1]} : vector<2x6xf32> to vector<2x2xf32>
    %1212 = arith.mulf %1201, %1211 : vector<2x2xf32>
    %1213 = arith.addf %1210, %1212 : vector<2x2xf32>
    %1214 = math.tanh %1213 : vector<2x2xf32>
    %1215 = arith.subf %1184, %1214 : vector<2x2xf32>
    %1216 = arith.mulf %1209, %1215 : vector<2x2xf32>
    %1217 = arith.addf %1214, %1216 : vector<2x2xf32>
    %c7_222 = arith.constant 7 : index
    %c0_223 = arith.constant 0 : index
    %c0_224 = arith.constant 0 : index
    %1218 = vector.load %arg14[%c7_222, %c0_223, %c0_224] : memref<16x2x2xf32, #tpu.memory_space<vmem>>, vector<1x2x2xf32>
    %1219 = vector.shape_cast %1218 : vector<1x2x2xf32> to vector<2x2xf32>
    %1220 = vector.shape_cast %1217 : vector<2x2xf32> to vector<1x2x2xf32>
    tpu.vector_store %arg14[%c7_222, %c0_223, %c0_224], %1220 {strides = array<i32>} : memref<16x2x2xf32, #tpu.memory_space<vmem>>, vector<1x2x2xf32>,
    %cst_225 = arith.constant dense<0.000000e+00> : vector<2x6xf32>
    %1221 = tpu.matmul %741, %952, %cst_225 {dimension_numbers = #tpu.dot_dimension_numbers<[1], [0], [0], [1], [0, 0, 1, 1], [], []>} : vector<2x16xf32>, vector<16x6xf32>, vector<2x6xf32> -> vector<2x6xf32>
    %1222 = vector.broadcast %953 : vector<1x6xf32> to vector<2x6xf32>
    %1223 = arith.addf %1221, %1222 : vector<2x6xf32>
    %cst_226 = arith.constant dense<0.000000e+00> : vector<2x6xf32>
    %1224 = tpu.matmul %1217, %954, %cst_226 {dimension_numbers = #tpu.dot_dimension_numbers<[1], [0], [0], [1], [0, 0, 1, 1], [], []>} : vector<2x2xf32>, vector<2x6xf32>, vector<2x6xf32> -> vector<2x6xf32>
    %1225 = vector.broadcast %955 : vector<1x6xf32> to vector<2x6xf32>
    %1226 = arith.addf %1224, %1225 : vector<2x6xf32>
    %1227 = vector.extract_strided_slice %1223 {offsets = [0, 0], sizes = [2, 2], strides = [1, 1]} : vector<2x6xf32> to vector<2x2xf32>
    %1228 = vector.extract_strided_slice %1226 {offsets = [0, 0], sizes = [2, 2], strides = [1, 1]} : vector<2x6xf32> to vector<2x2xf32>
    %1229 = arith.addf %1227, %1228 : vector<2x2xf32>
    %1230 = arith.negf %1229 : vector<2x2xf32>
    %1231 = math.exp %1230 : vector<2x2xf32>
    %cst_227 = arith.constant 1.000000e+00 : f32
    %1232 = vector.broadcast %cst_227 : f32 to vector<2x2xf32>
    %1233 = arith.addf %1232, %1231 : vector<2x2xf32>
    %1234 = arith.divf %1232, %1233 : vector<2x2xf32>
    %1235 = vector.extract_strided_slice %1223 {offsets = [0, 2], sizes = [2, 2], strides = [1, 1]} : vector<2x6xf32> to vector<2x2xf32>
    %1236 = vector.extract_strided_slice %1226 {offsets = [0, 2], sizes = [2, 2], strides = [1, 1]} : vector<2x6xf32> to vector<2x2xf32>
    %1237 = arith.addf %1235, %1236 : vector<2x2xf32>
    %1238 = arith.negf %1237 : vector<2x2xf32>
    %1239 = math.exp %1238 : vector<2x2xf32>
    %cst_228 = arith.constant 1.000000e+00 : f32
    %1240 = vector.broadcast %cst_228 : f32 to vector<2x2xf32>
    %1241 = arith.addf %1240, %1239 : vector<2x2xf32>
    %1242 = arith.divf %1240, %1241 : vector<2x2xf32>
    %1243 = vector.extract_strided_slice %1223 {offsets = [0, 4], sizes = [2, 2], strides = [1, 1]} : vector<2x6xf32> to vector<2x2xf32>
    %1244 = vector.extract_strided_slice %1226 {offsets = [0, 4], sizes = [2, 2], strides = [1, 1]} : vector<2x6xf32> to vector<2x2xf32>
    %1245 = arith.mulf %1234, %1244 : vector<2x2xf32>
    %1246 = arith.addf %1243, %1245 : vector<2x2xf32>
    %1247 = math.tanh %1246 : vector<2x2xf32>
    %1248 = arith.subf %1217, %1247 : vector<2x2xf32>
    %1249 = arith.mulf %1242, %1248 : vector<2x2xf32>
    %1250 = arith.addf %1247, %1249 : vector<2x2xf32>
    %c8_229 = arith.constant 8 : index
    %c0_230 = arith.constant 0 : index
    %c0_231 = arith.constant 0 : index
    %1251 = vector.load %arg14[%c8_229, %c0_230, %c0_231] : memref<16x2x2xf32, #tpu.memory_space<vmem>>, vector<1x2x2xf32>
    %1252 = vector.shape_cast %1251 : vector<1x2x2xf32> to vector<2x2xf32>
    %1253 = vector.shape_cast %1250 : vector<2x2xf32> to vector<1x2x2xf32>
    tpu.vector_store %arg14[%c8_229, %c0_230, %c0_231], %1253 {strides = array<i32>} : memref<16x2x2xf32, #tpu.memory_space<vmem>>, vector<1x2x2xf32>,
    %cst_232 = arith.constant dense<0.000000e+00> : vector<2x6xf32>
    %1254 = tpu.matmul %771, %952, %cst_232 {dimension_numbers = #tpu.dot_dimension_numbers<[1], [0], [0], [1], [0, 0, 1, 1], [], []>} : vector<2x16xf32>, vector<16x6xf32>, vector<2x6xf32> -> vector<2x6xf32>
    %1255 = vector.broadcast %953 : vector<1x6xf32> to vector<2x6xf32>
    %1256 = arith.addf %1254, %1255 : vector<2x6xf32>
    %cst_233 = arith.constant dense<0.000000e+00> : vector<2x6xf32>
    %1257 = tpu.matmul %1250, %954, %cst_233 {dimension_numbers = #tpu.dot_dimension_numbers<[1], [0], [0], [1], [0, 0, 1, 1], [], []>} : vector<2x2xf32>, vector<2x6xf32>, vector<2x6xf32> -> vector<2x6xf32>
    %1258 = vector.broadcast %955 : vector<1x6xf32> to vector<2x6xf32>
    %1259 = arith.addf %1257, %1258 : vector<2x6xf32>
    %1260 = vector.extract_strided_slice %1256 {offsets = [0, 0], sizes = [2, 2], strides = [1, 1]} : vector<2x6xf32> to vector<2x2xf32>
    %1261 = vector.extract_strided_slice %1259 {offsets = [0, 0], sizes = [2, 2], strides = [1, 1]} : vector<2x6xf32> to vector<2x2xf32>
    %1262 = arith.addf %1260, %1261 : vector<2x2xf32>
    %1263 = arith.negf %1262 : vector<2x2xf32>
    %1264 = math.exp %1263 : vector<2x2xf32>
    %cst_234 = arith.constant 1.000000e+00 : f32
    %1265 = vector.broadcast %cst_234 : f32 to vector<2x2xf32>
    %1266 = arith.addf %1265, %1264 : vector<2x2xf32>
    %1267 = arith.divf %1265, %1266 : vector<2x2xf32>
    %1268 = vector.extract_strided_slice %1256 {offsets = [0, 2], sizes = [2, 2], strides = [1, 1]} : vector<2x6xf32> to vector<2x2xf32>
    %1269 = vector.extract_strided_slice %1259 {offsets = [0, 2], sizes = [2, 2], strides = [1, 1]} : vector<2x6xf32> to vector<2x2xf32>
    %1270 = arith.addf %1268, %1269 : vector<2x2xf32>
    %1271 = arith.negf %1270 : vector<2x2xf32>
    %1272 = math.exp %1271 : vector<2x2xf32>
    %cst_235 = arith.constant 1.000000e+00 : f32
    %1273 = vector.broadcast %cst_235 : f32 to vector<2x2xf32>
    %1274 = arith.addf %1273, %1272 : vector<2x2xf32>
    %1275 = arith.divf %1273, %1274 : vector<2x2xf32>
    %1276 = vector.extract_strided_slice %1256 {offsets = [0, 4], sizes = [2, 2], strides = [1, 1]} : vector<2x6xf32> to vector<2x2xf32>
    %1277 = vector.extract_strided_slice %1259 {offsets = [0, 4], sizes = [2, 2], strides = [1, 1]} : vector<2x6xf32> to vector<2x2xf32>
    %1278 = arith.mulf %1267, %1277 : vector<2x2xf32>
    %1279 = arith.addf %1276, %1278 : vector<2x2xf32>
    %1280 = math.tanh %1279 : vector<2x2xf32>
    %1281 = arith.subf %1250, %1280 : vector<2x2xf32>
    %1282 = arith.mulf %1275, %1281 : vector<2x2xf32>
    %1283 = arith.addf %1280, %1282 : vector<2x2xf32>
    %c9_236 = arith.constant 9 : index
    %c0_237 = arith.constant 0 : index
    %c0_238 = arith.constant 0 : index
    %1284 = vector.load %arg14[%c9_236, %c0_237, %c0_238] : memref<16x2x2xf32, #tpu.memory_space<vmem>>, vector<1x2x2xf32>
    %1285 = vector.shape_cast %1284 : vector<1x2x2xf32> to vector<2x2xf32>
    %1286 = vector.shape_cast %1283 : vector<2x2xf32> to vector<1x2x2xf32>
    tpu.vector_store %arg14[%c9_236, %c0_237, %c0_238], %1286 {strides = array<i32>} : memref<16x2x2xf32, #tpu.memory_space<vmem>>, vector<1x2x2xf32>,
    %cst_239 = arith.constant dense<0.000000e+00> : vector<2x6xf32>
    %1287 = tpu.matmul %801, %952, %cst_239 {dimension_numbers = #tpu.dot_dimension_numbers<[1], [0], [0], [1], [0, 0, 1, 1], [], []>} : vector<2x16xf32>, vector<16x6xf32>, vector<2x6xf32> -> vector<2x6xf32>
    %1288 = vector.broadcast %953 : vector<1x6xf32> to vector<2x6xf32>
    %1289 = arith.addf %1287, %1288 : vector<2x6xf32>
    %cst_240 = arith.constant dense<0.000000e+00> : vector<2x6xf32>
    %1290 = tpu.matmul %1283, %954, %cst_240 {dimension_numbers = #tpu.dot_dimension_numbers<[1], [0], [0], [1], [0, 0, 1, 1], [], []>} : vector<2x2xf32>, vector<2x6xf32>, vector<2x6xf32> -> vector<2x6xf32>
    %1291 = vector.broadcast %955 : vector<1x6xf32> to vector<2x6xf32>
    %1292 = arith.addf %1290, %1291 : vector<2x6xf32>
    %1293 = vector.extract_strided_slice %1289 {offsets = [0, 0], sizes = [2, 2], strides = [1, 1]} : vector<2x6xf32> to vector<2x2xf32>
    %1294 = vector.extract_strided_slice %1292 {offsets = [0, 0], sizes = [2, 2], strides = [1, 1]} : vector<2x6xf32> to vector<2x2xf32>
    %1295 = arith.addf %1293, %1294 : vector<2x2xf32>
    %1296 = arith.negf %1295 : vector<2x2xf32>
    %1297 = math.exp %1296 : vector<2x2xf32>
    %cst_241 = arith.constant 1.000000e+00 : f32
    %1298 = vector.broadcast %cst_241 : f32 to vector<2x2xf32>
    %1299 = arith.addf %1298, %1297 : vector<2x2xf32>
    %1300 = arith.divf %1298, %1299 : vector<2x2xf32>
    %1301 = vector.extract_strided_slice %1289 {offsets = [0, 2], sizes = [2, 2], strides = [1, 1]} : vector<2x6xf32> to vector<2x2xf32>
    %1302 = vector.extract_strided_slice %1292 {offsets = [0, 2], sizes = [2, 2], strides = [1, 1]} : vector<2x6xf32> to vector<2x2xf32>
    %1303 = arith.addf %1301, %1302 : vector<2x2xf32>
    %1304 = arith.negf %1303 : vector<2x2xf32>
    %1305 = math.exp %1304 : vector<2x2xf32>
    %cst_242 = arith.constant 1.000000e+00 : f32
    %1306 = vector.broadcast %cst_242 : f32 to vector<2x2xf32>
    %1307 = arith.addf %1306, %1305 : vector<2x2xf32>
    %1308 = arith.divf %1306, %1307 : vector<2x2xf32>
    %1309 = vector.extract_strided_slice %1289 {offsets = [0, 4], sizes = [2, 2], strides = [1, 1]} : vector<2x6xf32> to vector<2x2xf32>
    %1310 = vector.extract_strided_slice %1292 {offsets = [0, 4], sizes = [2, 2], strides = [1, 1]} : vector<2x6xf32> to vector<2x2xf32>
    %1311 = arith.mulf %1300, %1310 : vector<2x2xf32>
    %1312 = arith.addf %1309, %1311 : vector<2x2xf32>
    %1313 = math.tanh %1312 : vector<2x2xf32>
    %1314 = arith.subf %1283, %1313 : vector<2x2xf32>
    %1315 = arith.mulf %1308, %1314 : vector<2x2xf32>
    %1316 = arith.addf %1313, %1315 : vector<2x2xf32>
    %c10_243 = arith.constant 10 : index
    %c0_244 = arith.constant 0 : index
    %c0_245 = arith.constant 0 : index
    %1317 = vector.load %arg14[%c10_243, %c0_244, %c0_245] : memref<16x2x2xf32, #tpu.memory_space<vmem>>, vector<1x2x2xf32>
    %1318 = vector.shape_cast %1317 : vector<1x2x2xf32> to vector<2x2xf32>
    %1319 = vector.shape_cast %1316 : vector<2x2xf32> to vector<1x2x2xf32>
    tpu.vector_store %arg14[%c10_243, %c0_244, %c0_245], %1319 {strides = array<i32>} : memref<16x2x2xf32, #tpu.memory_space<vmem>>, vector<1x2x2xf32>,
    %cst_246 = arith.constant dense<0.000000e+00> : vector<2x6xf32>
    %1320 = tpu.matmul %831, %952, %cst_246 {dimension_numbers = #tpu.dot_dimension_numbers<[1], [0], [0], [1], [0, 0, 1, 1], [], []>} : vector<2x16xf32>, vector<16x6xf32>, vector<2x6xf32> -> vector<2x6xf32>
    %1321 = vector.broadcast %953 : vector<1x6xf32> to vector<2x6xf32>
    %1322 = arith.addf %1320, %1321 : vector<2x6xf32>
    %cst_247 = arith.constant dense<0.000000e+00> : vector<2x6xf32>
    %1323 = tpu.matmul %1316, %954, %cst_247 {dimension_numbers = #tpu.dot_dimension_numbers<[1], [0], [0], [1], [0, 0, 1, 1], [], []>} : vector<2x2xf32>, vector<2x6xf32>, vector<2x6xf32> -> vector<2x6xf32>
    %1324 = vector.broadcast %955 : vector<1x6xf32> to vector<2x6xf32>
    %1325 = arith.addf %1323, %1324 : vector<2x6xf32>
    %1326 = vector.extract_strided_slice %1322 {offsets = [0, 0], sizes = [2, 2], strides = [1, 1]} : vector<2x6xf32> to vector<2x2xf32>
    %1327 = vector.extract_strided_slice %1325 {offsets = [0, 0], sizes = [2, 2], strides = [1, 1]} : vector<2x6xf32> to vector<2x2xf32>
    %1328 = arith.addf %1326, %1327 : vector<2x2xf32>
    %1329 = arith.negf %1328 : vector<2x2xf32>
    %1330 = math.exp %1329 : vector<2x2xf32>
    %cst_248 = arith.constant 1.000000e+00 : f32
    %1331 = vector.broadcast %cst_248 : f32 to vector<2x2xf32>
    %1332 = arith.addf %1331, %1330 : vector<2x2xf32>
    %1333 = arith.divf %1331, %1332 : vector<2x2xf32>
    %1334 = vector.extract_strided_slice %1322 {offsets = [0, 2], sizes = [2, 2], strides = [1, 1]} : vector<2x6xf32> to vector<2x2xf32>
    %1335 = vector.extract_strided_slice %1325 {offsets = [0, 2], sizes = [2, 2], strides = [1, 1]} : vector<2x6xf32> to vector<2x2xf32>
    %1336 = arith.addf %1334, %1335 : vector<2x2xf32>
    %1337 = arith.negf %1336 : vector<2x2xf32>
    %1338 = math.exp %1337 : vector<2x2xf32>
    %cst_249 = arith.constant 1.000000e+00 : f32
    %1339 = vector.broadcast %cst_249 : f32 to vector<2x2xf32>
    %1340 = arith.addf %1339, %1338 : vector<2x2xf32>
    %1341 = arith.divf %1339, %1340 : vector<2x2xf32>
    %1342 = vector.extract_strided_slice %1322 {offsets = [0, 4], sizes = [2, 2], strides = [1, 1]} : vector<2x6xf32> to vector<2x2xf32>
    %1343 = vector.extract_strided_slice %1325 {offsets = [0, 4], sizes = [2, 2], strides = [1, 1]} : vector<2x6xf32> to vector<2x2xf32>
    %1344 = arith.mulf %1333, %1343 : vector<2x2xf32>
    %1345 = arith.addf %1342, %1344 : vector<2x2xf32>
    %1346 = math.tanh %1345 : vector<2x2xf32>
    %1347 = arith.subf %1316, %1346 : vector<2x2xf32>
    %1348 = arith.mulf %1341, %1347 : vector<2x2xf32>
    %1349 = arith.addf %1346, %1348 : vector<2x2xf32>
    %c11_250 = arith.constant 11 : index
    %c0_251 = arith.constant 0 : index
    %c0_252 = arith.constant 0 : index
    %1350 = vector.load %arg14[%c11_250, %c0_251, %c0_252] : memref<16x2x2xf32, #tpu.memory_space<vmem>>, vector<1x2x2xf32>
    %1351 = vector.shape_cast %1350 : vector<1x2x2xf32> to vector<2x2xf32>
    %1352 = vector.shape_cast %1349 : vector<2x2xf32> to vector<1x2x2xf32>
    tpu.vector_store %arg14[%c11_250, %c0_251, %c0_252], %1352 {strides = array<i32>} : memref<16x2x2xf32, #tpu.memory_space<vmem>>, vector<1x2x2xf32>,
    %cst_253 = arith.constant dense<0.000000e+00> : vector<2x6xf32>
    %1353 = tpu.matmul %861, %952, %cst_253 {dimension_numbers = #tpu.dot_dimension_numbers<[1], [0], [0], [1], [0, 0, 1, 1], [], []>} : vector<2x16xf32>, vector<16x6xf32>, vector<2x6xf32> -> vector<2x6xf32>
    %1354 = vector.broadcast %953 : vector<1x6xf32> to vector<2x6xf32>
    %1355 = arith.addf %1353, %1354 : vector<2x6xf32>
    %cst_254 = arith.constant dense<0.000000e+00> : vector<2x6xf32>
    %1356 = tpu.matmul %1349, %954, %cst_254 {dimension_numbers = #tpu.dot_dimension_numbers<[1], [0], [0], [1], [0, 0, 1, 1], [], []>} : vector<2x2xf32>, vector<2x6xf32>, vector<2x6xf32> -> vector<2x6xf32>
    %1357 = vector.broadcast %955 : vector<1x6xf32> to vector<2x6xf32>
    %1358 = arith.addf %1356, %1357 : vector<2x6xf32>
    %1359 = vector.extract_strided_slice %1355 {offsets = [0, 0], sizes = [2, 2], strides = [1, 1]} : vector<2x6xf32> to vector<2x2xf32>
    %1360 = vector.extract_strided_slice %1358 {offsets = [0, 0], sizes = [2, 2], strides = [1, 1]} : vector<2x6xf32> to vector<2x2xf32>
    %1361 = arith.addf %1359, %1360 : vector<2x2xf32>
    %1362 = arith.negf %1361 : vector<2x2xf32>
    %1363 = math.exp %1362 : vector<2x2xf32>
    %cst_255 = arith.constant 1.000000e+00 : f32
    %1364 = vector.broadcast %cst_255 : f32 to vector<2x2xf32>
    %1365 = arith.addf %1364, %1363 : vector<2x2xf32>
    %1366 = arith.divf %1364, %1365 : vector<2x2xf32>
    %1367 = vector.extract_strided_slice %1355 {offsets = [0, 2], sizes = [2, 2], strides = [1, 1]} : vector<2x6xf32> to vector<2x2xf32>
    %1368 = vector.extract_strided_slice %1358 {offsets = [0, 2], sizes = [2, 2], strides = [1, 1]} : vector<2x6xf32> to vector<2x2xf32>
    %1369 = arith.addf %1367, %1368 : vector<2x2xf32>
    %1370 = arith.negf %1369 : vector<2x2xf32>
    %1371 = math.exp %1370 : vector<2x2xf32>
    %cst_256 = arith.constant 1.000000e+00 : f32
    %1372 = vector.broadcast %cst_256 : f32 to vector<2x2xf32>
    %1373 = arith.addf %1372, %1371 : vector<2x2xf32>
    %1374 = arith.divf %1372, %1373 : vector<2x2xf32>
    %1375 = vector.extract_strided_slice %1355 {offsets = [0, 4], sizes = [2, 2], strides = [1, 1]} : vector<2x6xf32> to vector<2x2xf32>
    %1376 = vector.extract_strided_slice %1358 {offsets = [0, 4], sizes = [2, 2], strides = [1, 1]} : vector<2x6xf32> to vector<2x2xf32>
    %1377 = arith.mulf %1366, %1376 : vector<2x2xf32>
    %1378 = arith.addf %1375, %1377 : vector<2x2xf32>
    %1379 = math.tanh %1378 : vector<2x2xf32>
    %1380 = arith.subf %1349, %1379 : vector<2x2xf32>
    %1381 = arith.mulf %1374, %1380 : vector<2x2xf32>
    %1382 = arith.addf %1379, %1381 : vector<2x2xf32>
    %c12_257 = arith.constant 12 : index
    %c0_258 = arith.constant 0 : index
    %c0_259 = arith.constant 0 : index
    %1383 = vector.load %arg14[%c12_257, %c0_258, %c0_259] : memref<16x2x2xf32, #tpu.memory_space<vmem>>, vector<1x2x2xf32>
    %1384 = vector.shape_cast %1383 : vector<1x2x2xf32> to vector<2x2xf32>
    %1385 = vector.shape_cast %1382 : vector<2x2xf32> to vector<1x2x2xf32>
    tpu.vector_store %arg14[%c12_257, %c0_258, %c0_259], %1385 {strides = array<i32>} : memref<16x2x2xf32, #tpu.memory_space<vmem>>, vector<1x2x2xf32>,
    %cst_260 = arith.constant dense<0.000000e+00> : vector<2x6xf32>
    %1386 = tpu.matmul %891, %952, %cst_260 {dimension_numbers = #tpu.dot_dimension_numbers<[1], [0], [0], [1], [0, 0, 1, 1], [], []>} : vector<2x16xf32>, vector<16x6xf32>, vector<2x6xf32> -> vector<2x6xf32>
    %1387 = vector.broadcast %953 : vector<1x6xf32> to vector<2x6xf32>
    %1388 = arith.addf %1386, %1387 : vector<2x6xf32>
    %cst_261 = arith.constant dense<0.000000e+00> : vector<2x6xf32>
    %1389 = tpu.matmul %1382, %954, %cst_261 {dimension_numbers = #tpu.dot_dimension_numbers<[1], [0], [0], [1], [0, 0, 1, 1], [], []>} : vector<2x2xf32>, vector<2x6xf32>, vector<2x6xf32> -> vector<2x6xf32>
    %1390 = vector.broadcast %955 : vector<1x6xf32> to vector<2x6xf32>
    %1391 = arith.addf %1389, %1390 : vector<2x6xf32>
    %1392 = vector.extract_strided_slice %1388 {offsets = [0, 0], sizes = [2, 2], strides = [1, 1]} : vector<2x6xf32> to vector<2x2xf32>
    %1393 = vector.extract_strided_slice %1391 {offsets = [0, 0], sizes = [2, 2], strides = [1, 1]} : vector<2x6xf32> to vector<2x2xf32>
    %1394 = arith.addf %1392, %1393 : vector<2x2xf32>
    %1395 = arith.negf %1394 : vector<2x2xf32>
    %1396 = math.exp %1395 : vector<2x2xf32>
    %cst_262 = arith.constant 1.000000e+00 : f32
    %1397 = vector.broadcast %cst_262 : f32 to vector<2x2xf32>
    %1398 = arith.addf %1397, %1396 : vector<2x2xf32>
    %1399 = arith.divf %1397, %1398 : vector<2x2xf32>
    %1400 = vector.extract_strided_slice %1388 {offsets = [0, 2], sizes = [2, 2], strides = [1, 1]} : vector<2x6xf32> to vector<2x2xf32>
    %1401 = vector.extract_strided_slice %1391 {offsets = [0, 2], sizes = [2, 2], strides = [1, 1]} : vector<2x6xf32> to vector<2x2xf32>
    %1402 = arith.addf %1400, %1401 : vector<2x2xf32>
    %1403 = arith.negf %1402 : vector<2x2xf32>
    %1404 = math.exp %1403 : vector<2x2xf32>
    %cst_263 = arith.constant 1.000000e+00 : f32
    %1405 = vector.broadcast %cst_263 : f32 to vector<2x2xf32>
    %1406 = arith.addf %1405, %1404 : vector<2x2xf32>
    %1407 = arith.divf %1405, %1406 : vector<2x2xf32>
    %1408 = vector.extract_strided_slice %1388 {offsets = [0, 4], sizes = [2, 2], strides = [1, 1]} : vector<2x6xf32> to vector<2x2xf32>
    %1409 = vector.extract_strided_slice %1391 {offsets = [0, 4], sizes = [2, 2], strides = [1, 1]} : vector<2x6xf32> to vector<2x2xf32>
    %1410 = arith.mulf %1399, %1409 : vector<2x2xf32>
    %1411 = arith.addf %1408, %1410 : vector<2x2xf32>
    %1412 = math.tanh %1411 : vector<2x2xf32>
    %1413 = arith.subf %1382, %1412 : vector<2x2xf32>
    %1414 = arith.mulf %1407, %1413 : vector<2x2xf32>
    %1415 = arith.addf %1412, %1414 : vector<2x2xf32>
    %c13_264 = arith.constant 13 : index
    %c0_265 = arith.constant 0 : index
    %c0_266 = arith.constant 0 : index
    %1416 = vector.load %arg14[%c13_264, %c0_265, %c0_266] : memref<16x2x2xf32, #tpu.memory_space<vmem>>, vector<1x2x2xf32>
    %1417 = vector.shape_cast %1416 : vector<1x2x2xf32> to vector<2x2xf32>
    %1418 = vector.shape_cast %1415 : vector<2x2xf32> to vector<1x2x2xf32>
    tpu.vector_store %arg14[%c13_264, %c0_265, %c0_266], %1418 {strides = array<i32>} : memref<16x2x2xf32, #tpu.memory_space<vmem>>, vector<1x2x2xf32>,
    %cst_267 = arith.constant dense<0.000000e+00> : vector<2x6xf32>
    %1419 = tpu.matmul %921, %952, %cst_267 {dimension_numbers = #tpu.dot_dimension_numbers<[1], [0], [0], [1], [0, 0, 1, 1], [], []>} : vector<2x16xf32>, vector<16x6xf32>, vector<2x6xf32> -> vector<2x6xf32>
    %1420 = vector.broadcast %953 : vector<1x6xf32> to vector<2x6xf32>
    %1421 = arith.addf %1419, %1420 : vector<2x6xf32>
    %cst_268 = arith.constant dense<0.000000e+00> : vector<2x6xf32>
    %1422 = tpu.matmul %1415, %954, %cst_268 {dimension_numbers = #tpu.dot_dimension_numbers<[1], [0], [0], [1], [0, 0, 1, 1], [], []>} : vector<2x2xf32>, vector<2x6xf32>, vector<2x6xf32> -> vector<2x6xf32>
    %1423 = vector.broadcast %955 : vector<1x6xf32> to vector<2x6xf32>
    %1424 = arith.addf %1422, %1423 : vector<2x6xf32>
    %1425 = vector.extract_strided_slice %1421 {offsets = [0, 0], sizes = [2, 2], strides = [1, 1]} : vector<2x6xf32> to vector<2x2xf32>
    %1426 = vector.extract_strided_slice %1424 {offsets = [0, 0], sizes = [2, 2], strides = [1, 1]} : vector<2x6xf32> to vector<2x2xf32>
    %1427 = arith.addf %1425, %1426 : vector<2x2xf32>
    %1428 = arith.negf %1427 : vector<2x2xf32>
    %1429 = math.exp %1428 : vector<2x2xf32>
    %cst_269 = arith.constant 1.000000e+00 : f32
    %1430 = vector.broadcast %cst_269 : f32 to vector<2x2xf32>
    %1431 = arith.addf %1430, %1429 : vector<2x2xf32>
    %1432 = arith.divf %1430, %1431 : vector<2x2xf32>
    %1433 = vector.extract_strided_slice %1421 {offsets = [0, 2], sizes = [2, 2], strides = [1, 1]} : vector<2x6xf32> to vector<2x2xf32>
    %1434 = vector.extract_strided_slice %1424 {offsets = [0, 2], sizes = [2, 2], strides = [1, 1]} : vector<2x6xf32> to vector<2x2xf32>
    %1435 = arith.addf %1433, %1434 : vector<2x2xf32>
    %1436 = arith.negf %1435 : vector<2x2xf32>
    %1437 = math.exp %1436 : vector<2x2xf32>
    %cst_270 = arith.constant 1.000000e+00 : f32
    %1438 = vector.broadcast %cst_270 : f32 to vector<2x2xf32>
    %1439 = arith.addf %1438, %1437 : vector<2x2xf32>
    %1440 = arith.divf %1438, %1439 : vector<2x2xf32>
    %1441 = vector.extract_strided_slice %1421 {offsets = [0, 4], sizes = [2, 2], strides = [1, 1]} : vector<2x6xf32> to vector<2x2xf32>
    %1442 = vector.extract_strided_slice %1424 {offsets = [0, 4], sizes = [2, 2], strides = [1, 1]} : vector<2x6xf32> to vector<2x2xf32>
    %1443 = arith.mulf %1432, %1442 : vector<2x2xf32>
    %1444 = arith.addf %1441, %1443 : vector<2x2xf32>
    %1445 = math.tanh %1444 : vector<2x2xf32>
    %1446 = arith.subf %1415, %1445 : vector<2x2xf32>
    %1447 = arith.mulf %1440, %1446 : vector<2x2xf32>
    %1448 = arith.addf %1445, %1447 : vector<2x2xf32>
    %c14_271 = arith.constant 14 : index
    %c0_272 = arith.constant 0 : index
    %c0_273 = arith.constant 0 : index
    %1449 = vector.load %arg14[%c14_271, %c0_272, %c0_273] : memref<16x2x2xf32, #tpu.memory_space<vmem>>, vector<1x2x2xf32>
    %1450 = vector.shape_cast %1449 : vector<1x2x2xf32> to vector<2x2xf32>
    %1451 = vector.shape_cast %1448 : vector<2x2xf32> to vector<1x2x2xf32>
    tpu.vector_store %arg14[%c14_271, %c0_272, %c0_273], %1451 {strides = array<i32>} : memref<16x2x2xf32, #tpu.memory_space<vmem>>, vector<1x2x2xf32>,
    %cst_274 = arith.constant dense<0.000000e+00> : vector<2x6xf32>
    %1452 = tpu.matmul %951, %952, %cst_274 {dimension_numbers = #tpu.dot_dimension_numbers<[1], [0], [0], [1], [0, 0, 1, 1], [], []>} : vector<2x16xf32>, vector<16x6xf32>, vector<2x6xf32> -> vector<2x6xf32>
    %1453 = vector.broadcast %953 : vector<1x6xf32> to vector<2x6xf32>
    %1454 = arith.addf %1452, %1453 : vector<2x6xf32>
    %cst_275 = arith.constant dense<0.000000e+00> : vector<2x6xf32>
    %1455 = tpu.matmul %1448, %954, %cst_275 {dimension_numbers = #tpu.dot_dimension_numbers<[1], [0], [0], [1], [0, 0, 1, 1], [], []>} : vector<2x2xf32>, vector<2x6xf32>, vector<2x6xf32> -> vector<2x6xf32>
    %1456 = vector.broadcast %955 : vector<1x6xf32> to vector<2x6xf32>
    %1457 = arith.addf %1455, %1456 : vector<2x6xf32>
    %1458 = vector.extract_strided_slice %1454 {offsets = [0, 0], sizes = [2, 2], strides = [1, 1]} : vector<2x6xf32> to vector<2x2xf32>
    %1459 = vector.extract_strided_slice %1457 {offsets = [0, 0], sizes = [2, 2], strides = [1, 1]} : vector<2x6xf32> to vector<2x2xf32>
    %1460 = arith.addf %1458, %1459 : vector<2x2xf32>
    %1461 = arith.negf %1460 : vector<2x2xf32>
    %1462 = math.exp %1461 : vector<2x2xf32>
    %cst_276 = arith.constant 1.000000e+00 : f32
    %1463 = vector.broadcast %cst_276 : f32 to vector<2x2xf32>
    %1464 = arith.addf %1463, %1462 : vector<2x2xf32>
    %1465 = arith.divf %1463, %1464 : vector<2x2xf32>
    %1466 = vector.extract_strided_slice %1454 {offsets = [0, 2], sizes = [2, 2], strides = [1, 1]} : vector<2x6xf32> to vector<2x2xf32>
    %1467 = vector.extract_strided_slice %1457 {offsets = [0, 2], sizes = [2, 2], strides = [1, 1]} : vector<2x6xf32> to vector<2x2xf32>
    %1468 = arith.addf %1466, %1467 : vector<2x2xf32>
    %1469 = arith.negf %1468 : vector<2x2xf32>
    %1470 = math.exp %1469 : vector<2x2xf32>
    %cst_277 = arith.constant 1.000000e+00 : f32
    %1471 = vector.broadcast %cst_277 : f32 to vector<2x2xf32>
    %1472 = arith.addf %1471, %1470 : vector<2x2xf32>
    %1473 = arith.divf %1471, %1472 : vector<2x2xf32>
    %1474 = vector.extract_strided_slice %1454 {offsets = [0, 4], sizes = [2, 2], strides = [1, 1]} : vector<2x6xf32> to vector<2x2xf32>
    %1475 = vector.extract_strided_slice %1457 {offsets = [0, 4], sizes = [2, 2], strides = [1, 1]} : vector<2x6xf32> to vector<2x2xf32>
    %1476 = arith.mulf %1465, %1475 : vector<2x2xf32>
    %1477 = arith.addf %1474, %1476 : vector<2x2xf32>
    %1478 = math.tanh %1477 : vector<2x2xf32>
    %1479 = arith.subf %1448, %1478 : vector<2x2xf32>
    %1480 = arith.mulf %1473, %1479 : vector<2x2xf32>
    %1481 = arith.addf %1478, %1480 : vector<2x2xf32>
    %c15_278 = arith.constant 15 : index
    %c0_279 = arith.constant 0 : index
    %c0_280 = arith.constant 0 : index
    %1482 = vector.load %arg14[%c15_278, %c0_279, %c0_280] : memref<16x2x2xf32, #tpu.memory_space<vmem>>, vector<1x2x2xf32>
    %1483 = vector.shape_cast %1482 : vector<1x2x2xf32> to vector<2x2xf32>
    %1484 = vector.shape_cast %1481 : vector<2x2xf32> to vector<1x2x2xf32>
    tpu.vector_store %arg14[%c15_278, %c0_279, %c0_280], %1484 {strides = array<i32>} : memref<16x2x2xf32, #tpu.memory_space<vmem>>, vector<1x2x2xf32>,
    return
  }
}

</mosaic_0001>

<bundles_post_ra>
// kernel: deap_gru_forward.1
= control target key start
LH: loop header
LB: loop body
LE: loop exit
PB: predicated region body
PF: predicated region fallthrough
CT: control target
= control target key end

     0   :  { %v9158_v0 = vmov 0.0|0.0   ;;  %vm9159_vm0 = vmmov 0   ;;  %v9160_v4 = vmov 0.0   ;;  %vm59_vm1 = vcmask 261120   ;;  %s9161_s23 = smov 64   ;;  %s9162_s26 = smov 32   ;;  %s10452_s2 = inlined_call_operand.vmem [shape: f32[32,96], index: 2, kind: input, shape index: {}]   ;;  %s10453_s1 = inlined_call_operand.vmem [shape: f32[2,32], index: 1, kind: input, shape index: {}]   ;;  %s10454_s3 = inlined_call_operand.vmem [shape: f32[1,96], index: 3, kind: input, shape index: {}]   ;;  %s10455_s0 = inlined_call_operand.vmem [shape: f32[16,2,96], index: 0, kind: input, shape index: {}]   ;;  %s10456_s5 = inlined_call_operand.vmem [shape: f32[32,48], index: 5, kind: input, shape index: {}]   ;;  %s10457_s7 = inlined_call_operand.vmem [shape: f32[16,48], index: 7, kind: input, shape index: {}]   ;;  %s10458_s4 = inlined_call_operand.vmem [shape: f32[2,16], index: 4, kind: input, shape index: {}]   ;;  %s10459_s8 = inlined_call_operand.vmem [shape: f32[1,48], index: 8, kind: input, shape index: {}]   ;;  %s10460_s6 = inlined_call_operand.vmem [shape: f32[1,48], index: 6, kind: input, shape index: {}]   ;;  %s10461_s12 = inlined_call_operand.vmem [shape: f32[2,6], index: 12, kind: input, shape index: {}]   ;;  %s10462_s9 = inlined_call_operand.vmem [shape: f32[2,2], index: 9, kind: input, shape index: {}]   ;;  %s10463_s13 = inlined_call_operand.vmem [shape: f32[1,6], index: 13, kind: input, shape index: {}]   ;;  %s10464_s10 = inlined_call_operand.vmem [shape: f32[16,6], index: 10, kind: input, shape index: {}]   ;;  %s10465_s11 = inlined_call_operand.vmem [shape: f32[1,6], index: 11, kind: input, shape index: {}]   ;;  %s10466_s14 = inlined_call_operand.vmem [shape: f32[16,2,2], index: 14, kind: output, shape index: {}]  }
   0x1   :  { %8562 = vmatprep.subr.bf16.mxu0 %v9158_v0  ;;  %v47_v1 = vld [vmem:[%s10452_s2] sm:$0xff]  ;;  %v48_v2 = vld [vmem:[%s10452_s2 + $0x8] sm:$0xff]  ;;  %v49_v3 = vld [vmem:[%s10452_s2 + $0x10] sm:$0xff]  ;;  %7914 = vmatprep.mubr.msk.f32.mxu0 %vm9159_vm0, %v9160_v4  ;;  %s9163_s29 = smov 96   ;;  %vm1848_vm2 = vcmask 130048   ;;  %s9164_s24 = smov 16  }
   0x2   :  { %v9257_v5 = vpack.c.bf16 %v48_v2, %v47_v1  ;;  %v50_v6 = vld [vmem:[%s10452_s2 + $0x18] sm:$0xff]  ;;  %8568 = vmatprep.subr.bf16.mxu1 %v9158_v0  ;;  %7925 = vmatprep.mubr.msk.f32.mxu1 %vm9159_vm0, %v9160_v4  ;;  %v52_v8 = vld [vmem:[%s10453_s1] sm:$0x3]  ;;  %v7443_v34 = vld [vmem:[%s10455_s0 + $0x2] sm:$0x3]  ;;  %s9165_s25 = smov 112  }
   0x3   :  { %v9266_v7 = vpack.c.bf16 %v50_v6, %v49_v3  ;;  %v9288_v9 = vld [vmem:[%s10454_s3] ss:$0 sm:$0xff]  ;;  %v7446_v54 = vld [vmem:[%s10455_s0 + $0x4] sm:$0x3]  ;;  %vm4662_vm3 = vcmask 1041408   ;;  %vm4658_vm4 = vcmask 15360  }
   0x4   :  { %8564 = vmatpush3.bf16.msra.mxu0 %v9257_v5  ;;  %8570 = vmatpush3.bf16.msra.mxu1 %v9257_v5  ;;  %v133_v13 = vld [vmem:[%s10455_s0] sm:$0x3]  ;;  %s9167_s27 = smov 4   ;;  %s9168_s28 = smov 2   ;;  %vm4773_vm5 = vcmask 9216  }
   0x5   :  { %8565 = vmatprep.subr.bf16.mxu0 %v9158_v0  ;;  %8571 = vmatprep.subr.bf16.mxu1 %v9158_v0 }
   0x8   :  { %8567 = vmatpush3.bf16.msra.mxu0 %v9266_v7  ;;  %8573 = vmatpush3.bf16.msra.mxu1 %v9266_v7 }
   0x9   :  { %8574 = vmatprep.subr.bf16.mxu0 %v9158_v0  ;;  %8580 = vmatprep.subr.bf16.mxu1 %v9158_v0 }
   0xb   :  { %7915 = vmatmul.mubr.msk.f32.vlgmr.msra.gmra.mrb[0].mxu0 %vm59_vm1, %v52_v8 }
   0xc   :  { %8576 = vmatpush3.bf16.msra.mxu0 %v9257_v5  ;;  %7936 = vmatprep.mubr.msk.f32.mxu0 %vm9159_vm0, %v9160_v4 }
   0xd   :  { %8577 = vmatprep.subr.bf16.mxu0 %v9158_v0 }
  0x10   :  { %8579 = vmatpush3.bf16.msra.mxu0 %v9266_v7 }
  0x11   :  { %8586 = vmatprep.subr.bf16.mxu0 %v9158_v0 }
  0xde   :  { %v129_v10 = vpop.f32.mrb[0].mxu0 }
  0xdf   :  { %v130_v11 = vadd.f32 %v9288_v9, %v129_v10  ;;  %v7916_v12 = vpop.f32.mrb[1].mxu0 }
  0xe1   :  { %142 = vrot.lane.b32.xlu0 %v130_v11, %s9161_s23  ;;  %v134_v14 = vadd.f32 %v133_v13, %v130_v11 }
  0xe3   :  { %v7441_v15 = vmul.f32 -1.442695, %v134_v14 }
  0xe5   :  { %8862 = vpow2.f32 %v7441_v15  ;;  %v7449_v15 = vld [vmem:[%s10455_s0 + $0x6] sm:$0x3] }
  0xef   :  { %v8863_v16 = vpop.eup %8862 }
  0xf0   :  { %v138_v17 = vadd.f32 1.0, %v8863_v16 }
  0xf2   :  { %8864 = vrcp.f32 %v138_v17 }
  0xfc   :  { %v8865_v18 = vpop.eup %8864 }
 0x153   :  { %v143_v19 = vpop.permute.xlu0 %142 }
 0x154   :  { %v145_v20 = vmul.f32 %v8865_v18, %v143_v19 }
 0x156   :  { %147 = vrot.lane.b32.xlu0 %v145_v20, %s9161_s23 }
 0x1c8   :  { %v148_v21 = vpop.permute.xlu0 %147 }
 0x1c9   :  { %v150_v22 = vadd.f32 %v148_v21, %v133_v13 }
 0x1cb   :  { %8866 = vtanh.f32 %v150_v22 }
 0x1d5   :  { %v8867_v23 = vpop.eup %8866 }
 0x1d6   :  { %153 = vrot.lane.b32.xlu1 %v8867_v23, %s9161_s23 }
 0x248   :  { %v154_v24 = vpop.permute.xlu1 %153 }
 0x249   :  { %v156_v25 = vsub.f32 %v52_v8, %v154_v24 }
 0x24b   :  { %158 = vrot.lane.b32.xlu1 %v156_v25, %s9162_s26 }
 0x2bd   :  { %v159_v26 = vpop.permute.xlu1 %158 }
 0x2be   :  { %v161_v27 = vmul.f32 %v8865_v18, %v159_v26 }
 0x2c0   :  { %163 = vrot.lane.b32.xlu0 %v161_v27, %s9162_s26 }
 0x332   :  { %v164_v28 = vpop.permute.xlu0 %163 }
 0x333   :  { %v166_v29 = vadd.f32 %v8867_v23, %v164_v28 }
 0x335   :  { %168 = vrot.lane.b32.xlu1 %v166_v29, %s9161_s23 }
 0x3a7   :  { %v9300_v30 = vpop.permute.xlu1 %168 }
 0x3a8   :  { %7926 = vmatmul.mubr.msk.f32.vlgmr.msra.gmra.mrb[0].mxu1 %vm59_vm1, %v9300_v30 }
 0x3a9   :  { %8582 = vmatpush3.bf16.msra.mxu1 %v9257_v5  ;;  %7947 = vmatprep.mubr.msk.f32.mxu1 %vm9159_vm0, %v9160_v4 }
 0x3aa   :  { %8583 = vmatprep.subr.bf16.mxu1 %v9158_v0 }
 0x3ad   :  { %8585 = vmatpush3.bf16.msra.mxu1 %v9266_v7 }
 0x3ae   :  { %8592 = vmatprep.subr.bf16.mxu1 %v9158_v0 }
 0x47b   :  { %v238_v31 = vpop.f32.mrb[0].mxu1 }
 0x47c   :  { %v239_v32 = vadd.f32 %v9288_v9, %v238_v31  ;;  %v7927_v33 = vpop.f32.mrb[1].mxu1 }
 0x47e   :  { %252 = vrot.lane.b32.xlu0 %v239_v32, %s9161_s23  ;;  %v244_v35 = vadd.f32 %v7443_v34, %v239_v32 }
 0x480   :  { %v7444_v36 = vmul.f32 -1.442695, %v244_v35 }
 0x482   :  { %8868 = vpow2.f32 %v7444_v36  ;;  %v7452_v36 = vld [vmem:[%s10455_s0 + $0x8] sm:$0x3] }
 0x48c   :  { %v8869_v37 = vpop.eup %8868 }
 0x48d   :  { %v248_v38 = vadd.f32 1.0, %v8869_v37 }
 0x48f   :  { %8870 = vrcp.f32 %v248_v38 }
 0x499   :  { %v8871_v39 = vpop.eup %8870 }
 0x4f0   :  { %v253_v40 = vpop.permute.xlu0 %252 }
 0x4f1   :  { %v255_v41 = vmul.f32 %v8871_v39, %v253_v40 }
 0x4f3   :  { %257 = vrot.lane.b32.xlu1 %v255_v41, %s9161_s23 }
 0x565   :  { %v258_v42 = vpop.permute.xlu1 %257 }
 0x566   :  { %v260_v43 = vadd.f32 %v7443_v34, %v258_v42 }
 0x568   :  { %8872 = vtanh.f32 %v260_v43 }
 0x572   :  { %v8873_v44 = vpop.eup %8872 }
 0x573   :  { %v262_v45 = vsub.f32 %v166_v29, %v8873_v44 }
 0x575   :  { %264 = vrot.lane.b32.xlu0 %v262_v45, %s9163_s29 }
 0x5e7   :  { %v265_v46 = vpop.permute.xlu0 %264 }
 0x5e8   :  { %v267_v47 = vmul.f32 %v8871_v39, %v265_v46 }
 0x5ea   :  { %269 = vrot.lane.b32.xlu1 %v267_v47, %s9162_s26 }
 0x65c   :  { %v270_v48 = vpop.permute.xlu1 %269 }
 0x65d   :  { %v272_v49 = vadd.f32 %v8873_v44, %v270_v48 }
 0x65f   :  { %274 = vrot.lane.b32.xlu0 %v272_v49, %s9161_s23 }
 0x6d1   :  { %v9319_v50 = vpop.permute.xlu0 %274 }
 0x6d2   :  { %7937 = vmatmul.mubr.msk.f32.vlgmr.msra.gmra.mrb[2].mxu0 %vm59_vm1, %v9319_v50 }
 0x6d3   :  { %8588 = vmatpush3.bf16.msra.mxu0 %v9257_v5  ;;  %7958 = vmatprep.mubr.msk.f32.mxu0 %vm9159_vm0, %v9160_v4 }
 0x6d4   :  { %8589 = vmatprep.subr.bf16.mxu0 %v9158_v0 }
 0x6d7   :  { %8591 = vmatpush3.bf16.msra.mxu0 %v9266_v7 }
 0x6d8   :  { %8598 = vmatprep.subr.bf16.mxu0 %v9158_v0 }
 0x7a5   :  { %v344_v51 = vpop.f32.mrb[2].mxu0 }
 0x7a6   :  { %v345_v52 = vadd.f32 %v9288_v9, %v344_v51  ;;  %v7938_v53 = vpop.f32.mrb[3].mxu0 }
 0x7a8   :  { %358 = vrot.lane.b32.xlu1 %v345_v52, %s9161_s23  ;;  %v350_v55 = vadd.f32 %v7446_v54, %v345_v52 }
 0x7aa   :  { %v7447_v56 = vmul.f32 -1.442695, %v350_v55 }
 0x7ac   :  { %8874 = vpow2.f32 %v7447_v56 }
 0x7b6   :  { %v8875_v57 = vpop.eup %8874 }
 0x7b7   :  { %v354_v58 = vadd.f32 1.0, %v8875_v57  ;;  %v7455_v57 = vld [vmem:[%s10455_s0 + $0xa] sm:$0x3] }
 0x7b9   :  { %8876 = vrcp.f32 %v354_v58 }
 0x7c3   :  { %v8877_v59 = vpop.eup %8876 }
 0x81a   :  { %v359_v60 = vpop.permute.xlu1 %358 }
 0x81b   :  { %v361_v61 = vmul.f32 %v8877_v59, %v359_v60 }
 0x81d   :  { %363 = vrot.lane.b32.xlu0 %v361_v61, %s9161_s23 }
 0x88f   :  { %v364_v62 = vpop.permute.xlu0 %363 }
 0x890   :  { %v366_v63 = vadd.f32 %v7446_v54, %v364_v62 }
 0x892   :  { %8878 = vtanh.f32 %v366_v63 }
 0x89c   :  { %v8879_v1 = vpop.eup %8878 }
 0x89d   :  { %v368_v2 = vsub.f32 %v272_v49, %v8879_v1 }
 0x89f   :  { %370 = vrot.lane.b32.xlu1 %v368_v2, %s9163_s29 }
 0x911   :  { %v371_v3 = vpop.permute.xlu1 %370 }
 0x912   :  { %v373_v6 = vmul.f32 %v8877_v59, %v371_v3 }
 0x914   :  { %375 = vrot.lane.b32.xlu0 %v373_v6, %s9162_s26 }
 0x986   :  { %v376_v8 = vpop.permute.xlu0 %375 }
 0x987   :  { %v378_v10 = vadd.f32 %v8879_v1, %v376_v8 }
 0x989   :  { %380 = vrot.lane.b32.xlu1 %v378_v10, %s9161_s23 }
 0x9fb   :  { %v9338_v11 = vpop.permute.xlu1 %380 }
 0x9fc   :  { %7948 = vmatmul.mubr.msk.f32.vlgmr.msra.gmra.mrb[2].mxu1 %vm59_vm1, %v9338_v11 }
 0x9fd   :  { %8594 = vmatpush3.bf16.msra.mxu1 %v9257_v5  ;;  %7969 = vmatprep.mubr.msk.f32.mxu1 %vm9159_vm0, %v9160_v4 }
 0x9fe   :  { %8595 = vmatprep.subr.bf16.mxu1 %v9158_v0 }
 0xa01   :  { %8597 = vmatpush3.bf16.msra.mxu1 %v9266_v7 }
 0xa02   :  { %8604 = vmatprep.subr.bf16.mxu1 %v9158_v0 }
 0xacf   :  { %v450_v12 = vpop.f32.mrb[2].mxu1 }
 0xad0   :  { %v451_v13 = vadd.f32 %v9288_v9, %v450_v12  ;;  %v7949_v14 = vpop.f32.mrb[3].mxu1 }
 0xad2   :  { %464 = vrot.lane.b32.xlu0 %v451_v13, %s9161_s23  ;;  %v456_v16 = vadd.f32 %v7449_v15, %v451_v13 }
 0xad4   :  { %v7450_v17 = vmul.f32 -1.442695, %v456_v16 }
 0xad6   :  { %8880 = vpow2.f32 %v7450_v17 }
 0xae0   :  { %v8881_v18 = vpop.eup %8880 }
 0xae1   :  { %v460_v19 = vadd.f32 1.0, %v8881_v18 }
 0xae3   :  { %8882 = vrcp.f32 %v460_v19  ;;  %v7458_v19 = vld [vmem:[%s10455_s0 + $0xc] sm:$0x3] }
 0xaed   :  { %v8883_v20 = vpop.eup %8882 }
 0xb44   :  { %v465_v21 = vpop.permute.xlu0 %464 }
 0xb45   :  { %v467_v22 = vmul.f32 %v8883_v20, %v465_v21 }
 0xb47   :  { %469 = vrot.lane.b32.xlu1 %v467_v22, %s9161_s23 }
 0xbb9   :  { %v470_v23 = vpop.permute.xlu1 %469 }
 0xbba   :  { %v472_v24 = vadd.f32 %v7449_v15, %v470_v23 }
 0xbbc   :  { %8884 = vtanh.f32 %v472_v24 }
 0xbc6   :  { %v8885_v25 = vpop.eup %8884 }
 0xbc7   :  { %v474_v26 = vsub.f32 %v378_v10, %v8885_v25 }
 0xbc9   :  { %476 = vrot.lane.b32.xlu0 %v474_v26, %s9163_s29 }
 0xc3b   :  { %v477_v27 = vpop.permute.xlu0 %476 }
 0xc3c   :  { %v479_v28 = vmul.f32 %v8883_v20, %v477_v27 }
 0xc3e   :  { %481 = vrot.lane.b32.xlu1 %v479_v28, %s9162_s26 }
 0xcb0   :  { %v482_v29 = vpop.permute.xlu1 %481 }
 0xcb1   :  { %v484_v31 = vadd.f32 %v8885_v25, %v482_v29 }
 0xcb3   :  { %486 = vrot.lane.b32.xlu0 %v484_v31, %s9161_s23 }
 0xd25   :  { %v9357_v32 = vpop.permute.xlu0 %486 }
 0xd26   :  { %7959 = vmatmul.mubr.msk.f32.vlgmr.msra.gmra.mrb[4].mxu0 %vm59_vm1, %v9357_v32 }
 0xd27   :  { %8600 = vmatpush3.bf16.msra.mxu0 %v9257_v5  ;;  %7980 = vmatprep.mubr.msk.f32.mxu0 %vm9159_vm0, %v9160_v4 }
 0xd28   :  { %8601 = vmatprep.subr.bf16.mxu0 %v9158_v0 }
 0xd2b   :  { %8603 = vmatpush3.bf16.msra.mxu0 %v9266_v7 }
 0xd2c   :  { %8610 = vmatprep.subr.bf16.mxu0 %v9158_v0 }
 0xdf9   :  { %v556_v33 = vpop.f32.mrb[4].mxu0 }
 0xdfa   :  { %v557_v34 = vadd.f32 %v9288_v9, %v556_v33  ;;  %v7960_v35 = vpop.f32.mrb[5].mxu0 }
 0xdfc   :  { %570 = vrot.lane.b32.xlu1 %v557_v34, %s9161_s23  ;;  %v562_v37 = vadd.f32 %v7452_v36, %v557_v34 }
 0xdfe   :  { %v7453_v38 = vmul.f32 -1.442695, %v562_v37 }
 0xe00   :  { %8886 = vpow2.f32 %v7453_v38 }
 0xe0a   :  { %v8887_v39 = vpop.eup %8886 }
 0xe0b   :  { %v566_v40 = vadd.f32 1.0, %v8887_v39 }
 0xe0d   :  { %8888 = vrcp.f32 %v566_v40 }
 0xe17   :  { %v8889_v41 = vpop.eup %8888 }
 0xe6e   :  { %v571_v42 = vpop.permute.xlu1 %570 }
 0xe6f   :  { %v573_v43 = vmul.f32 %v8889_v41, %v571_v42 }
 0xe71   :  { %575 = vrot.lane.b32.xlu0 %v573_v43, %s9161_s23 }
 0xee3   :  { %v576_v44 = vpop.permute.xlu0 %575 }
 0xee4   :  { %v578_v45 = vadd.f32 %v7452_v36, %v576_v44 }
 0xee6   :  { %8890 = vtanh.f32 %v578_v45 }
 0xef0   :  { %v8891_v46 = vpop.eup %8890 }
 0xef1   :  { %v580_v47 = vsub.f32 %v484_v31, %v8891_v46 }
 0xef3   :  { %582 = vrot.lane.b32.xlu1 %v580_v47, %s9163_s29 }
 0xf65   :  { %v583_v48 = vpop.permute.xlu1 %582 }
 0xf66   :  { %v585_v49 = vmul.f32 %v8889_v41, %v583_v48  ;;  %v7461_v41 = vld [vmem:[%s10455_s0 + $0xe] sm:$0x3] }
 0xf68   :  { %587 = vrot.lane.b32.xlu0 %v585_v49, %s9162_s26 }
 0xfda   :  { %v588_v51 = vpop.permute.xlu0 %587 }
 0xfdb   :  { %v590_v52 = vadd.f32 %v8891_v46, %v588_v51 }
 0xfdd   :  { %592 = vrot.lane.b32.xlu1 %v590_v52, %s9161_s23 }
0x104f   :  { %v9376_v53 = vpop.permute.xlu1 %592 }
0x1050   :  { %7970 = vmatmul.mubr.msk.f32.vlgmr.msra.gmra.mrb[4].mxu1 %vm59_vm1, %v9376_v53 }
0x1051   :  { %8606 = vmatpush3.bf16.msra.mxu1 %v9257_v5  ;;  %7991 = vmatprep.mubr.msk.f32.mxu1 %vm9159_vm0, %v9160_v4 }
0x1052   :  { %8607 = vmatprep.subr.bf16.mxu1 %v9158_v0 }
0x1055   :  { %8609 = vmatpush3.bf16.msra.mxu1 %v9266_v7 }
0x1056   :  { %8616 = vmatprep.subr.bf16.mxu1 %v9158_v0 }
0x1123   :  { %v662_v54 = vpop.f32.mrb[4].mxu1 }
0x1124   :  { %v663_v55 = vadd.f32 %v9288_v9, %v662_v54  ;;  %v7971_v56 = vpop.f32.mrb[5].mxu1 }
0x1126   :  { %676 = vrot.lane.b32.xlu0 %v663_v55, %s9161_s23  ;;  %v668_v58 = vadd.f32 %v7455_v57, %v663_v55 }
0x1128   :  { %v7456_v59 = vmul.f32 -1.442695, %v668_v58 }
0x112a   :  { %8892 = vpow2.f32 %v7456_v59 }
0x1134   :  { %v8893_v60 = vpop.eup %8892 }
0x1135   :  { %v672_v61 = vadd.f32 1.0, %v8893_v60 }
0x1137   :  { %8894 = vrcp.f32 %v672_v61 }
0x1141   :  { %v8895_v62 = vpop.eup %8894 }
0x1198   :  { %v677_v63 = vpop.permute.xlu0 %676 }
0x1199   :  { %v679_v1 = vmul.f32 %v8895_v62, %v677_v63  ;;  %v7464_v63 = vld [vmem:[%s10455_s0 + $0x10] sm:$0x3] }
0x119b   :  { %681 = vrot.lane.b32.xlu1 %v679_v1, %s9161_s23 }
0x120d   :  { %v682_v2 = vpop.permute.xlu1 %681 }
0x120e   :  { %v684_v3 = vadd.f32 %v7455_v57, %v682_v2 }
0x1210   :  { %8896 = vtanh.f32 %v684_v3 }
0x121a   :  { %v8897_v6 = vpop.eup %8896 }
0x121b   :  { %v686_v8 = vsub.f32 %v590_v52, %v8897_v6 }
0x121d   :  { %688 = vrot.lane.b32.xlu0 %v686_v8, %s9163_s29 }
0x128f   :  { %v689_v10 = vpop.permute.xlu0 %688 }
0x1290   :  { %v691_v12 = vmul.f32 %v8895_v62, %v689_v10 }
0x1292   :  { %693 = vrot.lane.b32.xlu1 %v691_v12, %s9162_s26 }
0x1304   :  { %v694_v13 = vpop.permute.xlu1 %693 }
0x1305   :  { %v696_v14 = vadd.f32 %v8897_v6, %v694_v13 }
0x1307   :  { %698 = vrot.lane.b32.xlu0 %v696_v14, %s9161_s23 }
0x1379   :  { %v9395_v15 = vpop.permute.xlu0 %698 }
0x137a   :  { %7981 = vmatmul.mubr.msk.f32.vlgmr.msra.gmra.mrb[6].mxu0 %vm59_vm1, %v9395_v15 }
0x137b   :  { %8612 = vmatpush3.bf16.msra.mxu0 %v9257_v5  ;;  %8002 = vmatprep.mubr.msk.f32.mxu0 %vm9159_vm0, %v9160_v4 }
0x137c   :  { %8613 = vmatprep.subr.bf16.mxu0 %v9158_v0 }
0x137f   :  { %8615 = vmatpush3.bf16.msra.mxu0 %v9266_v7 }
0x1380   :  { %8622 = vmatprep.subr.bf16.mxu0 %v9158_v0 }
0x144d   :  { %v768_v16 = vpop.f32.mrb[6].mxu0 }
0x144e   :  { %v769_v17 = vadd.f32 %v9288_v9, %v768_v16  ;;  %v7982_v18 = vpop.f32.mrb[7].mxu0 }
0x1450   :  { %782 = vrot.lane.b32.xlu1 %v769_v17, %s9161_s23  ;;  %v774_v20 = vadd.f32 %v7458_v19, %v769_v17 }
0x1452   :  { %v7459_v21 = vmul.f32 -1.442695, %v774_v20 }
0x1454   :  { %8898 = vpow2.f32 %v7459_v21 }
0x145e   :  { %v8899_v22 = vpop.eup %8898 }
0x145f   :  { %v778_v23 = vadd.f32 1.0, %v8899_v22 }
0x1461   :  { %8900 = vrcp.f32 %v778_v23 }
0x146b   :  { %v8901_v24 = vpop.eup %8900 }
0x14c2   :  { %v783_v25 = vpop.permute.xlu1 %782 }
0x14c3   :  { %v785_v26 = vmul.f32 %v8901_v24, %v783_v25 }
0x14c5   :  { %787 = vrot.lane.b32.xlu0 %v785_v26, %s9161_s23  ;;  %v7467_v26 = vld [vmem:[%s10455_s0 + $0x12] sm:$0x3] }
0x1537   :  { %v788_v27 = vpop.permute.xlu0 %787 }
0x1538   :  { %v790_v28 = vadd.f32 %v7458_v19, %v788_v27 }
0x153a   :  { %8902 = vtanh.f32 %v790_v28 }
0x1544   :  { %v8903_v29 = vpop.eup %8902 }
0x1545   :  { %v792_v31 = vsub.f32 %v696_v14, %v8903_v29 }
0x1547   :  { %794 = vrot.lane.b32.xlu1 %v792_v31, %s9163_s29 }
0x15b9   :  { %v795_v33 = vpop.permute.xlu1 %794 }
0x15ba   :  { %v797_v34 = vmul.f32 %v8901_v24, %v795_v33 }
0x15bc   :  { %799 = vrot.lane.b32.xlu0 %v797_v34, %s9162_s26 }
0x162e   :  { %v800_v35 = vpop.permute.xlu0 %799 }
0x162f   :  { %v802_v36 = vadd.f32 %v8903_v29, %v800_v35 }
0x1631   :  { %804 = vrot.lane.b32.xlu1 %v802_v36, %s9161_s23 }
0x16a3   :  { %v9414_v37 = vpop.permute.xlu1 %804 }
0x16a4   :  { %7992 = vmatmul.mubr.msk.f32.vlgmr.msra.gmra.mrb[6].mxu1 %vm59_vm1, %v9414_v37 }
0x16a5   :  { %8618 = vmatpush3.bf16.msra.mxu1 %v9257_v5  ;;  %8013 = vmatprep.mubr.msk.f32.mxu1 %vm9159_vm0, %v9160_v4 }
0x16a6   :  { %8619 = vmatprep.subr.bf16.mxu1 %v9158_v0 }
0x16a9   :  { %8621 = vmatpush3.bf16.msra.mxu1 %v9266_v7 }
0x16aa   :  { %8628 = vmatprep.subr.bf16.mxu1 %v9158_v0 }
0x1777   :  { %v874_v38 = vpop.f32.mrb[6].mxu1 }
0x1778   :  { %v875_v39 = vadd.f32 %v9288_v9, %v874_v38  ;;  %v7993_v40 = vpop.f32.mrb[7].mxu1 }
0x177a   :  { %888 = vrot.lane.b32.xlu0 %v875_v39, %s9161_s23  ;;  %v880_v42 = vadd.f32 %v7461_v41, %v875_v39 }
0x177c   :  { %v7462_v43 = vmul.f32 -1.442695, %v880_v42 }
0x177e   :  { %8904 = vpow2.f32 %v7462_v43 }
0x1788   :  { %v8905_v44 = vpop.eup %8904 }
0x1789   :  { %v884_v45 = vadd.f32 1.0, %v8905_v44 }
0x178b   :  { %8906 = vrcp.f32 %v884_v45 }
0x1795   :  { %v8907_v46 = vpop.eup %8906 }
0x17ec   :  { %v889_v47 = vpop.permute.xlu0 %888 }
0x17ed   :  { %v891_v48 = vmul.f32 %v8907_v46, %v889_v47 }
0x17ef   :  { %893 = vrot.lane.b32.xlu1 %v891_v48, %s9161_s23 }
0x1861   :  { %v894_v49 = vpop.permute.xlu1 %893 }
0x1862   :  { %v896_v51 = vadd.f32 %v7461_v41, %v894_v49  ;;  %v7470_v49 = vld [vmem:[%s10455_s0 + $0x14] sm:$0x3] }
0x1864   :  { %8908 = vtanh.f32 %v896_v51 }
0x186e   :  { %v8909_v52 = vpop.eup %8908 }
0x186f   :  { %v898_v54 = vsub.f32 %v802_v36, %v8909_v52 }
0x1871   :  { %900 = vrot.lane.b32.xlu0 %v898_v54, %s9163_s29 }
0x18e3   :  { %v901_v55 = vpop.permute.xlu0 %900 }
0x18e4   :  { %v903_v56 = vmul.f32 %v8907_v46, %v901_v55 }
0x18e6   :  { %905 = vrot.lane.b32.xlu1 %v903_v56, %s9162_s26 }
0x1958   :  { %v906_v57 = vpop.permute.xlu1 %905 }
0x1959   :  { %v908_v58 = vadd.f32 %v8909_v52, %v906_v57 }
0x195b   :  { %910 = vrot.lane.b32.xlu0 %v908_v58, %s9161_s23 }
0x19cd   :  { %v9433_v59 = vpop.permute.xlu0 %910 }
0x19ce   :  { %8003 = vmatmul.mubr.msk.f32.vlgmr.msra.gmra.mrb[8].mxu0 %vm59_vm1, %v9433_v59 }
0x19cf   :  { %8624 = vmatpush3.bf16.msra.mxu0 %v9257_v5  ;;  %8024 = vmatprep.mubr.msk.f32.mxu0 %vm9159_vm0, %v9160_v4 }
0x19d0   :  { %8625 = vmatprep.subr.bf16.mxu0 %v9158_v0 }
0x19d3   :  { %8627 = vmatpush3.bf16.msra.mxu0 %v9266_v7 }
0x19d4   :  { %8634 = vmatprep.subr.bf16.mxu0 %v9158_v0 }
0x1aa1   :  { %v980_v60 = vpop.f32.mrb[8].mxu0 }
0x1aa2   :  { %v981_v61 = vadd.f32 %v9288_v9, %v980_v60  ;;  %v8004_v62 = vpop.f32.mrb[9].mxu0 }
0x1aa4   :  { %994 = vrot.lane.b32.xlu1 %v981_v61, %s9161_s23  ;;  %v986_v1 = vadd.f32 %v7464_v63, %v981_v61 }
0x1aa6   :  { %v7465_v2 = vmul.f32 -1.442695, %v986_v1 }
0x1aa8   :  { %8910 = vpow2.f32 %v7465_v2 }
0x1ab2   :  { %v8911_v3 = vpop.eup %8910 }
0x1ab3   :  { %v990_v6 = vadd.f32 1.0, %v8911_v3 }
0x1ab5   :  { %8912 = vrcp.f32 %v990_v6 }
0x1abf   :  { %v8913_v8 = vpop.eup %8912 }
0x1b16   :  { %v995_v10 = vpop.permute.xlu1 %994 }
0x1b17   :  { %v997_v12 = vmul.f32 %v8913_v8, %v995_v10 }
0x1b19   :  { %999 = vrot.lane.b32.xlu0 %v997_v12, %s9161_s23 }
0x1b8b   :  { %v1000_v13 = vpop.permute.xlu0 %999 }
0x1b8c   :  { %v1002_v14 = vadd.f32 %v7464_v63, %v1000_v13 }
0x1b8e   :  { %8914 = vtanh.f32 %v1002_v14  ;;  %v7473_v14 = vld [vmem:[%s10455_s0 + $0x16] sm:$0x3] }
0x1b98   :  { %v8915_v16 = vpop.eup %8914 }
0x1b99   :  { %v1004_v17 = vsub.f32 %v908_v58, %v8915_v16 }
0x1b9b   :  { %1006 = vrot.lane.b32.xlu1 %v1004_v17, %s9163_s29 }
0x1c0d   :  { %v1007_v18 = vpop.permute.xlu1 %1006 }
0x1c0e   :  { %v1009_v19 = vmul.f32 %v8913_v8, %v1007_v18 }
0x1c10   :  { %1011 = vrot.lane.b32.xlu0 %v1009_v19, %s9162_s26 }
0x1c82   :  { %v1012_v20 = vpop.permute.xlu0 %1011 }
0x1c83   :  { %v1014_v21 = vadd.f32 %v8915_v16, %v1012_v20 }
0x1c85   :  { %1016 = vrot.lane.b32.xlu1 %v1014_v21, %s9161_s23 }
0x1cf7   :  { %v9452_v22 = vpop.permute.xlu1 %1016 }
0x1cf8   :  { %8014 = vmatmul.mubr.msk.f32.vlgmr.msra.gmra.mrb[8].mxu1 %vm59_vm1, %v9452_v22 }
0x1cf9   :  { %8630 = vmatpush3.bf16.msra.mxu1 %v9257_v5  ;;  %8035 = vmatprep.mubr.msk.f32.mxu1 %vm9159_vm0, %v9160_v4 }
0x1cfa   :  { %8631 = vmatprep.subr.bf16.mxu1 %v9158_v0 }
0x1cfd   :  { %8633 = vmatpush3.bf16.msra.mxu1 %v9266_v7 }
0x1cfe   :  { %8640 = vmatprep.subr.bf16.mxu1 %v9158_v0 }
0x1dcb   :  { %v1086_v23 = vpop.f32.mrb[8].mxu1 }
0x1dcc   :  { %v1087_v24 = vadd.f32 %v9288_v9, %v1086_v23  ;;  %v8015_v25 = vpop.f32.mrb[9].mxu1 }
0x1dce   :  { %1100 = vrot.lane.b32.xlu0 %v1087_v24, %s9161_s23  ;;  %v1092_v27 = vadd.f32 %v7467_v26, %v1087_v24 }
0x1dd0   :  { %v7468_v28 = vmul.f32 -1.442695, %v1092_v27 }
0x1dd2   :  { %8916 = vpow2.f32 %v7468_v28 }
0x1ddc   :  { %v8917_v29 = vpop.eup %8916 }
0x1ddd   :  { %v1096_v31 = vadd.f32 1.0, %v8917_v29 }
0x1ddf   :  { %8918 = vrcp.f32 %v1096_v31 }
0x1de9   :  { %v8919_v33 = vpop.eup %8918 }
0x1e40   :  { %v1101_v34 = vpop.permute.xlu0 %1100 }
0x1e41   :  { %v1103_v35 = vmul.f32 %v8919_v33, %v1101_v34 }
0x1e43   :  { %1105 = vrot.lane.b32.xlu1 %v1103_v35, %s9161_s23 }
0x1eb5   :  { %v1106_v36 = vpop.permute.xlu1 %1105 }
0x1eb6   :  { %v1108_v38 = vadd.f32 %v7467_v26, %v1106_v36 }
0x1eb8   :  { %8920 = vtanh.f32 %v1108_v38 }
0x1ec2   :  { %v8921_v39 = vpop.eup %8920 }
0x1ec3   :  { %v1110_v40 = vsub.f32 %v1014_v21, %v8921_v39 }
0x1ec5   :  { %1112 = vrot.lane.b32.xlu0 %v1110_v40, %s9163_s29 }
0x1f37   :  { %v1113_v41 = vpop.permute.xlu0 %1112 }
0x1f38   :  { %v1115_v42 = vmul.f32 %v8919_v33, %v1113_v41 }
0x1f3a   :  { %1117 = vrot.lane.b32.xlu1 %v1115_v42, %s9162_s26 }
0x1fac   :  { %v1118_v43 = vpop.permute.xlu1 %1117 }
0x1fad   :  { %v1120_v44 = vadd.f32 %v8921_v39, %v1118_v43  ;;  %v7476_v39 = vld [vmem:[%s10455_s0 + $0x18] sm:$0x3] }
0x1faf   :  { %1122 = vrot.lane.b32.xlu0 %v1120_v44, %s9161_s23 }
0x2021   :  { %v9471_v45 = vpop.permute.xlu0 %1122 }
0x2022   :  { %8025 = vmatmul.mubr.msk.f32.vlgmr.msra.gmra.mrb[10].mxu0 %vm59_vm1, %v9471_v45 }
0x2023   :  { %8636 = vmatpush3.bf16.msra.mxu0 %v9257_v5  ;;  %8046 = vmatprep.mubr.msk.f32.mxu0 %vm9159_vm0, %v9160_v4 }
0x2024   :  { %8637 = vmatprep.subr.bf16.mxu0 %v9158_v0 }
0x2027   :  { %8639 = vmatpush3.bf16.msra.mxu0 %v9266_v7 }
0x2028   :  { %8646 = vmatprep.subr.bf16.mxu0 %v9158_v0 }
0x20f5   :  { %v1192_v46 = vpop.f32.mrb[10].mxu0 }
0x20f6   :  { %v1193_v47 = vadd.f32 %v9288_v9, %v1192_v46  ;;  %v8026_v48 = vpop.f32.mrb[11].mxu0 }
0x20f8   :  { %1206 = vrot.lane.b32.xlu1 %v1193_v47, %s9161_s23  ;;  %v1198_v51 = vadd.f32 %v7470_v49, %v1193_v47 }
0x20fa   :  { %v7471_v52 = vmul.f32 -1.442695, %v1198_v51 }
0x20fc   :  { %8922 = vpow2.f32 %v7471_v52 }
0x2106   :  { %v8923_v54 = vpop.eup %8922 }
0x2107   :  { %v1202_v55 = vadd.f32 1.0, %v8923_v54 }
0x2109   :  { %8924 = vrcp.f32 %v1202_v55 }
0x2113   :  { %v8925_v56 = vpop.eup %8924 }
0x216a   :  { %v1207_v57 = vpop.permute.xlu1 %1206 }
0x216b   :  { %v1209_v58 = vmul.f32 %v8925_v56, %v1207_v57 }
0x216d   :  { %1211 = vrot.lane.b32.xlu0 %v1209_v58, %s9161_s23 }
0x21df   :  { %v1212_v60 = vpop.permute.xlu0 %1211 }
0x21e0   :  { %v1214_v61 = vadd.f32 %v7470_v49, %v1212_v60 }
0x21e2   :  { %8926 = vtanh.f32 %v1214_v61 }
0x21ec   :  { %v8927_v62 = vpop.eup %8926 }
0x21ed   :  { %v1216_v63 = vsub.f32 %v1120_v44, %v8927_v62 }
0x21ef   :  { %1218 = vrot.lane.b32.xlu1 %v1216_v63, %s9163_s29  ;;  %v7479_v63 = vld [vmem:[%s10455_s0 + $0x1a] sm:$0x3] }
0x2261   :  { %v1219_v1 = vpop.permute.xlu1 %1218 }
0x2262   :  { %v1221_v2 = vmul.f32 %v8925_v56, %v1219_v1 }
0x2264   :  { %1223 = vrot.lane.b32.xlu0 %v1221_v2, %s9162_s26 }
0x22d6   :  { %v1224_v3 = vpop.permute.xlu0 %1223 }
0x22d7   :  { %v1226_v6 = vadd.f32 %v8927_v62, %v1224_v3 }
0x22d9   :  { %1228 = vrot.lane.b32.xlu1 %v1226_v6, %s9161_s23 }
0x234b   :  { %v9490_v8 = vpop.permute.xlu1 %1228 }
0x234c   :  { %8036 = vmatmul.mubr.msk.f32.vlgmr.msra.gmra.mrb[10].mxu1 %vm59_vm1, %v9490_v8 }
0x234d   :  { %8642 = vmatpush3.bf16.msra.mxu1 %v9257_v5  ;;  %8057 = vmatprep.mubr.msk.f32.mxu1 %vm9159_vm0, %v9160_v4 }
0x234e   :  { %8643 = vmatprep.subr.bf16.mxu1 %v9158_v0 }
0x2351   :  { %8645 = vmatpush3.bf16.msra.mxu1 %v9266_v7 }
0x2352   :  { %8652 = vmatprep.subr.bf16.mxu1 %v9158_v0 }
0x241f   :  { %v1298_v10 = vpop.f32.mrb[10].mxu1 }
0x2420   :  { %v1299_v12 = vadd.f32 %v9288_v9, %v1298_v10  ;;  %v8037_v13 = vpop.f32.mrb[11].mxu1 }
0x2422   :  { %1312 = vrot.lane.b32.xlu0 %v1299_v12, %s9161_s23  ;;  %v1304_v16 = vadd.f32 %v7473_v14, %v1299_v12 }
0x2424   :  { %v7474_v17 = vmul.f32 -1.442695, %v1304_v16 }
0x2426   :  { %8928 = vpow2.f32 %v7474_v17 }
0x2430   :  { %v8929_v18 = vpop.eup %8928 }
0x2431   :  { %v1308_v19 = vadd.f32 1.0, %v8929_v18 }
0x2433   :  { %8930 = vrcp.f32 %v1308_v19 }
0x243d   :  { %v8931_v20 = vpop.eup %8930 }
0x2494   :  { %v1313_v21 = vpop.permute.xlu0 %1312 }
0x2495   :  { %v1315_v23 = vmul.f32 %v8931_v20, %v1313_v21  ;;  %v1757_v21 = vld [vmem:[%s10456_s5] sm:$0xff] }
0x2497   :  { %1317 = vrot.lane.b32.xlu1 %v1315_v23, %s9161_s23  ;;  %v1758_v23 = vld [vmem:[%s10456_s5 + $0x8] sm:$0xff] }
0x2509   :  { %v1318_v24 = vpop.permute.xlu1 %1317 }
0x250a   :  { %v1320_v25 = vadd.f32 %v7473_v14, %v1318_v24  ;;  %v9553_v24 = vpack.c.bf16 %v1758_v23, %v1757_v21 }
0x250c   :  { %8932 = vtanh.f32 %v1320_v25  ;;  %v1759_v25 = vld [vmem:[%s10456_s5 + $0x10] sm:$0xff] }
0x2516   :  { %v8933_v26 = vpop.eup %8932 }
0x2517   :  { %v1322_v27 = vsub.f32 %v1226_v6, %v8933_v26 }
0x2519   :  { %1324 = vrot.lane.b32.xlu0 %v1322_v27, %s9163_s29 }
0x258b   :  { %v1325_v28 = vpop.permute.xlu0 %1324 }
0x258c   :  { %v1327_v29 = vmul.f32 %v8931_v20, %v1325_v28 }
0x258e   :  { %1329 = vrot.lane.b32.xlu1 %v1327_v29, %s9162_s26 }
0x2600   :  { %v1330_v31 = vpop.permute.xlu1 %1329 }
0x2601   :  { %v1332_v33 = vadd.f32 %v8933_v26, %v1330_v31  ;;  %v1760_v26 = vld [vmem:[%s10456_s5 + $0x18] sm:$0xff]  ;;  %s9169_s5 = smov 126  }
0x2602   :  { %v9566_v28 = vpack.c.bf16 %v1760_v26, %v1759_v25 }
0x2603   :  { %1334 = vrot.lane.b32.xlu0 %v1332_v33, %s9161_s23 }
0x2675   :  { %v9509_v34 = vpop.permute.xlu0 %1334 }
0x2676   :  { %8047 = vmatmul.mubr.msk.f32.vlgmr.msra.gmra.mrb[12].mxu0 %vm59_vm1, %v9509_v34 }
0x2677   :  { %8648 = vmatpush3.bf16.msra.mxu0 %v9257_v5  ;;  %8068 = vmatprep.mubr.msk.f32.mxu0 %vm9159_vm0, %v9160_v4 }
0x2678   :  { %8649 = vmatprep.subr.bf16.mxu0 %v9158_v0 }
0x267b   :  { %8651 = vmatpush3.bf16.msra.mxu0 %v9266_v7 }
0x267c   :  { %8658 = vmatprep.subr.bf16.mxu0 %v9158_v0 }
0x2749   :  { %v1404_v35 = vpop.f32.mrb[12].mxu0 }
0x274a   :  { %v1405_v36 = vadd.f32 %v9288_v9, %v1404_v35  ;;  %v8048_v38 = vpop.f32.mrb[13].mxu0 }
0x274b   :  { %v7482_v38 = vld [vmem:[%s10455_s0 + $0x1c] sm:$0x3] }
0x274c   :  { %1418 = vrot.lane.b32.xlu1 %v1405_v36, %s9161_s23  ;;  %v1410_v40 = vadd.f32 %v7476_v39, %v1405_v36 }
0x274e   :  { %v7477_v41 = vmul.f32 -1.442695, %v1410_v40 }
0x2750   :  { %8934 = vpow2.f32 %v7477_v41 }
0x275a   :  { %v8935_v42 = vpop.eup %8934 }
0x275b   :  { %v1414_v43 = vadd.f32 1.0, %v8935_v42 }
0x275d   :  { %8936 = vrcp.f32 %v1414_v43 }
0x2767   :  { %v8937_v44 = vpop.eup %8936 }
0x27be   :  { %v1419_v46 = vpop.permute.xlu1 %1418 }
0x27bf   :  { %v1421_v47 = vmul.f32 %v8937_v44, %v1419_v46 }
0x27c1   :  { %1423 = vrot.lane.b32.xlu0 %v1421_v47, %s9161_s23 }
0x2833   :  { %v1424_v48 = vpop.permute.xlu0 %1423 }
0x2834   :  { %v1426_v49 = vadd.f32 %v7476_v39, %v1424_v48 }
0x2836   :  { %8938 = vtanh.f32 %v1426_v49 }
0x2840   :  { %v8939_v51 = vpop.eup %8938 }
0x2841   :  { %v1428_v52 = vsub.f32 %v1332_v33, %v8939_v51 }
0x2843   :  { %1430 = vrot.lane.b32.xlu1 %v1428_v52, %s9163_s29  ;;  %v1762_v52 = vld [vmem:[%s10457_s7] sm:$0xff] }
0x28b5   :  { %v1431_v54 = vpop.permute.xlu1 %1430 }
0x28b6   :  { %v1433_v55 = vmul.f32 %v8937_v44, %v1431_v54  ;;  %v1763_v54 = vld [vmem:[%s10457_s7 + $0x8] sm:$0xff]  ;;  %s9166_s7 = smov 124  }
0x28b8   :  { %1435 = vrot.lane.b32.xlu0 %v1433_v55, %s9162_s26  ;;  %v9591_v55 = vpack.c.bf16 %v1763_v54, %v1762_v52 }
0x292a   :  { %v1436_v56 = vpop.permute.xlu0 %1435 }
0x292b   :  { %v1438_v57 = vadd.f32 %v8939_v51, %v1436_v56 }
0x292d   :  { %1440 = vrot.lane.b32.xlu1 %v1438_v57, %s9161_s23 }
0x299f   :  { %v9528_v58 = vpop.permute.xlu1 %1440 }
0x29a0   :  { %8058 = vmatmul.mubr.msk.f32.vlgmr.msra.gmra.mrb[12].mxu1 %vm59_vm1, %v9528_v58 }
0x29a1   :  { %8654 = vmatpush3.bf16.msra.mxu1 %v9257_v5  ;;  %8079 = vmatprep.mubr.msk.f32.mxu1 %vm9159_vm0, %v9160_v4 }
0x29a2   :  { %8655 = vmatprep.subr.bf16.mxu1 %v9158_v0 }
0x29a5   :  { %8657 = vmatpush3.bf16.msra.mxu1 %v9266_v7 }
0x29a6   :  { %8664 = vmatprep.subr.bf16.mxu1 %v9158_v0 }
0x2a73   :  { %v1510_v60 = vpop.f32.mrb[12].mxu1 }
0x2a74   :  { %v1511_v61 = vadd.f32 %v9288_v9, %v1510_v60  ;;  %v8059_v62 = vpop.f32.mrb[13].mxu1 }
0x2a76   :  { %1524 = vrot.lane.b32.xlu0 %v1511_v61, %s9161_s23  ;;  %v1516_v5 = vadd.f32 %v7479_v63, %v1511_v61  ;;  %v1765_v61 = vld [vmem:[%s10458_s4] sm:$0x3] }
0x2a78   :  { %v7480_v1 = vmul.f32 -1.442695, %v1516_v5  ;;  %v9628_v5 = vld [vmem:[%s10459_s8] ss:$0 sm:$0xff] }
0x2a7a   :  { %8940 = vpow2.f32 %v7480_v1 }
0x2a84   :  { %v8941_v2 = vpop.eup %8940 }
0x2a85   :  { %v1520_v3 = vadd.f32 1.0, %v8941_v2 }
0x2a87   :  { %8942 = vrcp.f32 %v1520_v3 }
0x2a91   :  { %v8943_v6 = vpop.eup %8942 }
0x2ae8   :  { %v1525_v7 = vpop.permute.xlu0 %1524 }
0x2ae9   :  { %v1527_v10 = vmul.f32 %v8943_v6, %v1525_v7  ;;  %v9635_v7 = vld [vmem:[%s10460_s6] ss:$0 sm:$0xff] }
0x2aeb   :  { %1529 = vrot.lane.b32.xlu1 %v1527_v10, %s9161_s23 }
0x2b5d   :  { %v1530_v12 = vpop.permute.xlu1 %1529 }
0x2b5e   :  { %v1532_v13 = vadd.f32 %v7479_v63, %v1530_v12 }
0x2b60   :  { %8944 = vtanh.f32 %v1532_v13 }
0x2b6a   :  { %v8945_v14 = vpop.eup %8944 }
0x2b6b   :  { %v1534_v16 = vsub.f32 %v1438_v57, %v8945_v14 }
0x2b6d   :  { %1536 = vrot.lane.b32.xlu0 %v1534_v16, %s9163_s29 }
0x2bdf   :  { %v1537_v17 = vpop.permute.xlu0 %1536 }
0x2be0   :  { %v1539_v18 = vmul.f32 %v8943_v6, %v1537_v17 }
0x2be2   :  { %1541 = vrot.lane.b32.xlu1 %v1539_v18, %s9162_s26 }
0x2c54   :  { %v1542_v19 = vpop.permute.xlu1 %1541 }
0x2c55   :  { %v1544_v20 = vadd.f32 %v8945_v14, %v1542_v19 }
0x2c57   :  { %1546 = vrot.lane.b32.xlu0 %v1544_v20, %s9161_s23 }
0x2cc9   :  { %v9561_v27 = vpop.permute.xlu0 %1546 }
0x2cca   :  { %8069 = vmatmul.mubr.msk.f32.vlgmr.msra.gmra.mrb[14].mxu0 %vm59_vm1, %v9561_v27 }
0x2ccb   :  { %8660 = vmatpush3.bf16.msra.mxu0 %v9553_v24  ;;  %8090 = vmatprep.mubr.msk.f32.mxu0 %vm9159_vm0, %v9160_v4 }
0x2ccc   :  { %8661 = vmatprep.subr.bf16.mxu0 %v9158_v0 }
0x2ccf   :  { %8663 = vmatpush3.bf16.msra.mxu0 %v9566_v28 }
0x2cd0   :  { %8673 = vmatprep.subr.bf16.mxu0 %v9158_v0 }
0x2cd2   :  { %8091 = vmatmul.mubr.msk.f32.vlgmr.msra.gmra.mrb[16].mxu0 %vm59_vm1, %v9300_v30 }
0x2cd3   :  { %8115 = vmatprep.mubr.msk.f32.mxu0 %vm9159_vm0, %v9160_v4  ;;  %8675 = vmatpush3.bf16.msra.mxu0 %v9591_v55 }
0x2cd4   :  { %8676 = vmatprep.subr.bf16.mxu0 %v9158_v0 }
0x2d9d   :  { %v1616_v29 = vpop.f32.mrb[14].mxu0 }
0x2d9e   :  { %v1617_v31 = vadd.f32 %v9288_v9, %v1616_v29  ;;  %v8070_v33 = vpop.f32.mrb[15].mxu0 }
0x2da0   :  { %1630 = vrot.lane.b32.xlu1 %v1617_v31, %s9161_s23  ;;  %v1622_v39 = vadd.f32 %v7482_v38, %v1617_v31 }
0x2da2   :  { %v7483_v40 = vmul.f32 -1.442695, %v1622_v39 }
0x2da4   :  { %8946 = vpow2.f32 %v7483_v40 }
0x2da5   :  { %v1838_v35 = vpop.f32.mrb[16].mxu0 }
0x2da6   :  { %v8092_v36 = vpop.f32.mrb[17].mxu0  ;;  %v1839_v10 = vadd.f32 %v9635_v7, %v1838_v35 }
0x2dae   :  { %v8947_v41 = vpop.eup %8946 }
0x2daf   :  { %v1626_v30 = vadd.f32 1.0, %v8947_v41 }
0x2db1   :  { %8948 = vrcp.f32 %v1626_v30 }
0x2dbb   :  { %v8949_v42 = vpop.eup %8948 }
0x2e12   :  { %v1631_v43 = vpop.permute.xlu1 %1630 }
0x2e13   :  { %v1633_v44 = vmul.f32 %v8949_v42, %v1631_v43 }
0x2e15   :  { %1635 = vrot.lane.b32.xlu0 %v1633_v44, %s9161_s23 }
0x2e87   :  { %v1636_v9 = vpop.permute.xlu0 %1635 }
0x2e88   :  { %v1638_v46 = vadd.f32 %v7482_v38, %v1636_v9 }
0x2e8a   :  { %8950 = vtanh.f32 %v1638_v46 }
0x2e94   :  { %v8951_v47 = vpop.eup %8950 }
0x2e95   :  { %v1640_v48 = vsub.f32 %v1544_v20, %v8951_v47 }
0x2e97   :  { %1642 = vrot.lane.b32.xlu1 %v1640_v48, %s9163_s29 }
0x2f09   :  { %v1643_v49 = vpop.permute.xlu1 %1642 }
0x2f0a   :  { %v1645_v51 = vmul.f32 %v8949_v42, %v1643_v49 }
0x2f0c   :  { %1647 = vrot.lane.b32.xlu0 %v1645_v51, %s9162_s26 }
0x2f7e   :  { %v1648_v56 = vpop.permute.xlu0 %1647 }
0x2f7f   :  { %v9595_v57 = vadd.f32 %v8951_v47, %v1648_v56 }
0x2f81   :  { %1652 = vrot.lane.b32.xlu1 %v9595_v57, %s9161_s23 }
0x2ff3   :  { %v9599_v60 = vpop.permute.xlu1 %1652 }
0x2ff4   :  { %8080 = vmatmul.mubr.msk.f32.vlgmr.msra.gmra.mrb[14].mxu1 %vm59_vm1, %v9599_v60 }
0x2ff5   :  { %8666 = vmatpush3.bf16.msra.mxu1 %v9591_v55  ;;  %8097 = vmatprep.mubr.msk.f32.mxu1 %vm9159_vm0, %v9160_v4 }
0x2ff6   :  { %8667 = vmatprep.subr.bf16.mxu1 %v9158_v0 }
0x2ff8   :  { %8098 = vmatmul.mubr.msk.f32.vlgmr.msra.gmra.mrb[16].mxu1 %vm1848_vm2, %v1765_v61 }
0x2ff9   :  { %8669 = vmatpush3.bf16.msra.mxu1 %v9553_v24  ;;  %8108 = vmatprep.mubr.msk.f32.mxu1 %vm9159_vm0, %v9160_v4 }
0x2ffa   :  { %8670 = vmatprep.subr.bf16.mxu1 %v9158_v0 }
0x2ffd   :  { %8672 = vmatpush3.bf16.msra.mxu1 %v9566_v28 }
0x2ffe   :  { %8682 = vmatprep.subr.bf16.mxu1 %v9158_v0 }
0x3000   :  { %8109 = vmatmul.mubr.msk.f32.vlgmr.msra.gmra.mrb[18].mxu1 %vm59_vm1, %v9319_v50 }
0x3001   :  { %8684 = vmatpush3.bf16.msra.mxu1 %v9591_v55  ;;  %8133 = vmatprep.mubr.msk.f32.mxu1 %vm9159_vm0, %v9160_v4 }
0x3002   :  { %8685 = vmatprep.subr.bf16.mxu1 %v9158_v0 }
0x30c7   :  { %v9623_v62 = vpop.f32.mrb[14].mxu1 }
0x30c8   :  { %v8081_v63 = vpop.f32.mrb[15].mxu1 }
0x30cb   :  { %v1918_v1 = vpop.f32.mrb[16].mxu1 }
0x30cc   :  { %v1919_v2 = vadd.f32 %v9628_v5, %v1918_v1  ;;  %v8099_v3 = vpop.f32.mrb[17].mxu1 }
0x30ce   :  { %1930 = vrot.lane.b32.xlu0 %v1919_v2, %s9163_s29  ;;  %v1922_v12 = vadd.f32 %v1919_v2, %v1839_v10 }
0x30d0   :  { %v7491_v13 = vmul.f32 -1.442695, %v1922_v12 }
0x30d2   :  { %8952 = vpow2.f32 %v7491_v13 }
0x30d3   :  { %v2021_v50 = vpop.f32.mrb[18].mxu1 }
0x30d4   :  { %v8110_v6 = vpop.f32.mrb[19].mxu1  ;;  %v2022_v42 = vadd.f32 %v9635_v7, %v2021_v50 }
0x30dc   :  { %v8953_v14 = vpop.eup %8952 }
0x30dd   :  { %v1926_v16 = vadd.f32 1.0, %v8953_v14 }
0x30df   :  { %8954 = vrcp.f32 %v1926_v16 }
0x30e9   :  { %v8955_v17 = vpop.eup %8954 }
0x3140   :  { %v1931_v18 = vpop.permute.xlu0 %1930 }
0x3141   :  { %v1933_v19 = vmul.f32 %v8955_v17, %v1931_v18 }
0x3143   :  { %1935 = vrot.lane.b32.xlu1 %v1933_v19, %s9162_s26 }
0x31b5   :  { %v1936_v20 = vpop.permute.xlu1 %1935 }
0x31b6   :  { %v1938_v21 = vadd.f32 %v1936_v20, %v1839_v10 }
0x31b8   :  { %8956 = vtanh.f32 %v1938_v21 }
0x31c2   :  { %v8957_v23 = vpop.eup %8956 }
0x31c3   :  { %1941 = vrot.lane.b32.xlu0 %v8957_v23, %s9163_s29 }
0x3235   :  { %v1942_v25 = vpop.permute.xlu0 %1941 }
0x3236   :  { %v1944_v26 = vsub.f32 %v1765_v61, %v1942_v25 }
0x3238   :  { %1946 = vrot.lane.b32.xlu1 %v1944_v26, %s9164_s24 }
0x32aa   :  { %v1947_v29 = vpop.permute.xlu1 %1946 }
0x32ab   :  { %v1949_v31 = vmul.f32 %v8955_v17, %v1947_v29 }
0x32ad   :  { %1951 = vrot.lane.b32.xlu0 %v1949_v31, %s9164_s24 }
0x331f   :  { %v1952_v33 = vpop.permute.xlu0 %1951 }
0x3320   :  { %v1954_v35 = vadd.f32 %v8957_v23, %v1952_v33 }
0x3322   :  { %2026 = vrot.lane.b32.xlu1 %v1954_v35, %s9163_s29 }
0x3394   :  { %v9643_v36 = vpop.permute.xlu1 %2026 }
0x3395   :  { %8116 = vmatmul.mubr.msk.f32.vlgmr.msra.gmra.mrb[18].mxu0 %vm1848_vm2, %v9643_v36 }
0x3396   :  { %8678 = vmatpush3.bf16.msra.mxu0 %v9553_v24  ;;  %8126 = vmatprep.mubr.msk.f32.mxu0 %vm9159_vm0, %v9160_v4 }
0x3397   :  { %8679 = vmatprep.subr.bf16.mxu0 %v9158_v0 }
0x339a   :  { %8681 = vmatpush3.bf16.msra.mxu0 %v9566_v28 }
0x339b   :  { %8691 = vmatprep.subr.bf16.mxu0 %v9158_v0 }
0x339d   :  { %8127 = vmatmul.mubr.msk.f32.vlgmr.msra.gmra.mrb[20].mxu0 %vm59_vm1, %v9338_v11 }
0x339e   :  { %8693 = vmatpush3.bf16.msra.mxu0 %v9591_v55  ;;  %8151 = vmatprep.mubr.msk.f32.mxu0 %vm9159_vm0, %v9160_v4 }
0x339f   :  { %8694 = vmatprep.subr.bf16.mxu0 %v9158_v0 }
0x3468   :  { %v2096_v38 = vpop.f32.mrb[18].mxu0 }
0x3469   :  { %v2097_v39 = vadd.f32 %v9628_v5, %v2096_v38  ;;  %v8117_v40 = vpop.f32.mrb[19].mxu0 }
0x346b   :  { %2108 = vrot.lane.b32.xlu0 %v2097_v39, %s9163_s29  ;;  %v2100_v43 = vadd.f32 %v2097_v39, %v2022_v42 }
0x346d   :  { %v7494_v44 = vmul.f32 -1.442695, %v2100_v43 }
0x346f   :  { %8958 = vpow2.f32 %v7494_v44 }
0x3470   :  { %v2195_v41 = vpop.f32.mrb[20].mxu0 }
0x3471   :  { %v8128_v30 = vpop.f32.mrb[21].mxu0  ;;  %v2196_v13 = vadd.f32 %v9635_v7, %v2195_v41 }
0x3479   :  { %v8959_v11 = vpop.eup %8958 }
0x347a   :  { %v2104_v9 = vadd.f32 1.0, %v8959_v11 }
0x347c   :  { %8960 = vrcp.f32 %v2104_v9 }
0x3486   :  { %v8961_v46 = vpop.eup %8960 }
0x34dd   :  { %v2109_v47 = vpop.permute.xlu0 %2108 }
0x34de   :  { %v2111_v48 = vmul.f32 %v8961_v46, %v2109_v47 }
0x34e0   :  { %2113 = vrot.lane.b32.xlu1 %v2111_v48, %s9162_s26 }
0x3552   :  { %v2114_v49 = vpop.permute.xlu1 %2113 }
0x3553   :  { %v2116_v51 = vadd.f32 %v2114_v49, %v2022_v42 }
0x3555   :  { %8962 = vtanh.f32 %v2116_v51 }
0x355f   :  { %v8963_v52 = vpop.eup %8962 }
0x3560   :  { %v2118_v54 = vsub.f32 %v1954_v35, %v8963_v52 }
0x3562   :  { %2120 = vrot.lane.b32.xlu0 %v2118_v54, %s9165_s25 }
0x35d4   :  { %v2121_v56 = vpop.permute.xlu0 %2120 }
0x35d5   :  { %v2123_v61 = vmul.f32 %v8961_v46, %v2121_v56 }
0x35d7   :  { %2125 = vrot.lane.b32.xlu1 %v2123_v61, %s9164_s24 }
0x3649   :  { %v2126_v63 = vpop.permute.xlu1 %2125 }
0x364a   :  { %v2128_v1 = vadd.f32 %v8963_v52, %v2126_v63 }
0x364c   :  { %2200 = vrot.lane.b32.xlu0 %v2128_v1, %s9163_s29 }
0x36be   :  { %v9666_v2 = vpop.permute.xlu0 %2200 }
0x36bf   :  { %8134 = vmatmul.mubr.msk.f32.vlgmr.msra.gmra.mrb[20].mxu1 %vm1848_vm2, %v9666_v2 }
0x36c0   :  { %8687 = vmatpush3.bf16.msra.mxu1 %v9553_v24  ;;  %8144 = vmatprep.mubr.msk.f32.mxu1 %vm9159_vm0, %v9160_v4 }
0x36c1   :  { %8688 = vmatprep.subr.bf16.mxu1 %v9158_v0 }
0x36c4   :  { %8690 = vmatpush3.bf16.msra.mxu1 %v9566_v28 }
0x36c5   :  { %8700 = vmatprep.subr.bf16.mxu1 %v9158_v0 }
0x36c7   :  { %8145 = vmatmul.mubr.msk.f32.vlgmr.msra.gmra.mrb[22].mxu1 %vm59_vm1, %v9357_v32 }
0x36c8   :  { %8702 = vmatpush3.bf16.msra.mxu1 %v9591_v55  ;;  %8169 = vmatprep.mubr.msk.f32.mxu1 %vm9159_vm0, %v9160_v4 }
0x36c9   :  { %8703 = vmatprep.subr.bf16.mxu1 %v9158_v0 }
0x3792   :  { %v2270_v3 = vpop.f32.mrb[20].mxu1 }
0x3793   :  { %v2271_v50 = vadd.f32 %v9628_v5, %v2270_v3  ;;  %v8135_v6 = vpop.f32.mrb[21].mxu1 }
0x3795   :  { %2282 = vrot.lane.b32.xlu1 %v2271_v50, %s9163_s29  ;;  %v2274_v14 = vadd.f32 %v2271_v50, %v2196_v13 }
0x3797   :  { %v7497_v16 = vmul.f32 -1.442695, %v2274_v14 }
0x3799   :  { %8964 = vpow2.f32 %v7497_v16 }
0x379a   :  { %v2369_v10 = vpop.f32.mrb[22].mxu1 }
0x379b   :  { %v8146_v12 = vpop.f32.mrb[23].mxu1  ;;  %v2370_v43 = vadd.f32 %v9635_v7, %v2369_v10 }
0x37a3   :  { %v8965_v32 = vpop.eup %8964 }
0x37a4   :  { %v2278_v17 = vadd.f32 1.0, %v8965_v32 }
0x37a6   :  { %8966 = vrcp.f32 %v2278_v17 }
0x37b0   :  { %v8967_v18 = vpop.eup %8966 }
0x3807   :  { %v2283_v19 = vpop.permute.xlu1 %2282 }
0x3808   :  { %v2285_v20 = vmul.f32 %v8967_v18, %v2283_v19 }
0x380a   :  { %2287 = vrot.lane.b32.xlu0 %v2285_v20, %s9162_s26 }
0x387c   :  { %v2288_v21 = vpop.permute.xlu0 %2287 }
0x387d   :  { %v2290_v23 = vadd.f32 %v2288_v21, %v2196_v13 }
0x387f   :  { %8968 = vtanh.f32 %v2290_v23 }
0x3889   :  { %v8969_v25 = vpop.eup %8968 }
0x388a   :  { %v2292_v26 = vsub.f32 %v2128_v1, %v8969_v25 }
0x388c   :  { %2294 = vrot.lane.b32.xlu1 %v2292_v26, %s9165_s25 }
0x38fe   :  { %v2295_v29 = vpop.permute.xlu1 %2294 }
0x38ff   :  { %v2297_v31 = vmul.f32 %v8967_v18, %v2295_v29 }
0x3901   :  { %2299 = vrot.lane.b32.xlu0 %v2297_v31, %s9164_s24 }
0x3973   :  { %v2300_v33 = vpop.permute.xlu0 %2299 }
0x3974   :  { %v2302_v35 = vadd.f32 %v8969_v25, %v2300_v33 }
0x3976   :  { %2374 = vrot.lane.b32.xlu1 %v2302_v35, %s9163_s29 }
0x39e8   :  { %v9689_v38 = vpop.permute.xlu1 %2374 }
0x39e9   :  { %8152 = vmatmul.mubr.msk.f32.vlgmr.msra.gmra.mrb[22].mxu0 %vm1848_vm2, %v9689_v38 }
0x39ea   :  { %8696 = vmatpush3.bf16.msra.mxu0 %v9553_v24  ;;  %8162 = vmatprep.mubr.msk.f32.mxu0 %vm9159_vm0, %v9160_v4 }
0x39eb   :  { %8697 = vmatprep.subr.bf16.mxu0 %v9158_v0 }
0x39ee   :  { %8699 = vmatpush3.bf16.msra.mxu0 %v9566_v28 }
0x39ef   :  { %8709 = vmatprep.subr.bf16.mxu0 %v9158_v0 }
0x39f1   :  { %8163 = vmatmul.mubr.msk.f32.vlgmr.msra.gmra.mrb[24].mxu0 %vm59_vm1, %v9376_v53 }
0x39f2   :  { %8711 = vmatpush3.bf16.msra.mxu0 %v9591_v55  ;;  %8187 = vmatprep.mubr.msk.f32.mxu0 %vm9159_vm0, %v9160_v4 }
0x39f3   :  { %8712 = vmatprep.subr.bf16.mxu0 %v9158_v0 }
0x3abc   :  { %v2444_v39 = vpop.f32.mrb[22].mxu0 }
0x3abd   :  { %v2445_v40 = vadd.f32 %v9628_v5, %v2444_v39  ;;  %v8153_v41 = vpop.f32.mrb[23].mxu0 }
0x3abf   :  { %2456 = vrot.lane.b32.xlu0 %v2445_v40, %s9163_s29  ;;  %v2448_v44 = vadd.f32 %v2445_v40, %v2370_v43 }
0x3ac1   :  { %v7500_v11 = vmul.f32 -1.442695, %v2448_v44 }
0x3ac3   :  { %8970 = vpow2.f32 %v7500_v11 }
0x3ac4   :  { %v2543_v30 = vpop.f32.mrb[24].mxu0 }
0x3ac5   :  { %v8164_v42 = vpop.f32.mrb[25].mxu0  ;;  %v2544_v14 = vadd.f32 %v9635_v7, %v2543_v30 }
0x3acd   :  { %v8971_v53 = vpop.eup %8970 }
0x3ace   :  { %v2452_v9 = vadd.f32 1.0, %v8971_v53 }
0x3ad0   :  { %8972 = vrcp.f32 %v2452_v9 }
0x3ada   :  { %v8973_v46 = vpop.eup %8972 }
0x3b31   :  { %v2457_v47 = vpop.permute.xlu0 %2456 }
0x3b32   :  { %v2459_v48 = vmul.f32 %v8973_v46, %v2457_v47 }
0x3b34   :  { %2461 = vrot.lane.b32.xlu1 %v2459_v48, %s9162_s26 }
0x3ba6   :  { %v2462_v49 = vpop.permute.xlu1 %2461 }
0x3ba7   :  { %v2464_v51 = vadd.f32 %v2462_v49, %v2370_v43 }
0x3ba9   :  { %8974 = vtanh.f32 %v2464_v51 }
0x3bb3   :  { %v8975_v52 = vpop.eup %8974 }
0x3bb4   :  { %v2466_v54 = vsub.f32 %v2302_v35, %v8975_v52 }
0x3bb6   :  { %2468 = vrot.lane.b32.xlu0 %v2466_v54, %s9165_s25 }
0x3c28   :  { %v2469_v56 = vpop.permute.xlu0 %2468 }
0x3c29   :  { %v2471_v61 = vmul.f32 %v8973_v46, %v2469_v56 }
0x3c2b   :  { %2473 = vrot.lane.b32.xlu1 %v2471_v61, %s9164_s24 }
0x3c9d   :  { %v2474_v63 = vpop.permute.xlu1 %2473 }
0x3c9e   :  { %v2476_v1 = vadd.f32 %v8975_v52, %v2474_v63 }
0x3ca0   :  { %2548 = vrot.lane.b32.xlu0 %v2476_v1, %s9163_s29 }
0x3d12   :  { %v9712_v3 = vpop.permute.xlu0 %2548 }
0x3d13   :  { %8170 = vmatmul.mubr.msk.f32.vlgmr.msra.gmra.mrb[24].mxu1 %vm1848_vm2, %v9712_v3 }
0x3d14   :  { %8705 = vmatpush3.bf16.msra.mxu1 %v9553_v24  ;;  %8180 = vmatprep.mubr.msk.f32.mxu1 %vm9159_vm0, %v9160_v4 }
0x3d15   :  { %8706 = vmatprep.subr.bf16.mxu1 %v9158_v0 }
0x3d18   :  { %8708 = vmatpush3.bf16.msra.mxu1 %v9566_v28 }
0x3d19   :  { %8718 = vmatprep.subr.bf16.mxu1 %v9158_v0 }
0x3d1b   :  { %8181 = vmatmul.mubr.msk.f32.vlgmr.msra.gmra.mrb[26].mxu1 %vm59_vm1, %v9395_v15 }
0x3d1c   :  { %8720 = vmatpush3.bf16.msra.mxu1 %v9591_v55  ;;  %8205 = vmatprep.mubr.msk.f32.mxu1 %vm9159_vm0, %v9160_v4 }
0x3d1d   :  { %8721 = vmatprep.subr.bf16.mxu1 %v9158_v0 }
0x3de6   :  { %v2618_v50 = vpop.f32.mrb[24].mxu1 }
0x3de7   :  { %v2619_v6 = vadd.f32 %v9628_v5, %v2618_v50  ;;  %v8171_v10 = vpop.f32.mrb[25].mxu1 }
0x3de9   :  { %2630 = vrot.lane.b32.xlu1 %v2619_v6, %s9163_s29  ;;  %v2622_v16 = vadd.f32 %v2619_v6, %v2544_v14 }
0x3deb   :  { %v7503_v32 = vmul.f32 -1.442695, %v2622_v16 }
0x3ded   :  { %8976 = vpow2.f32 %v7503_v32 }
0x3dee   :  { %v2717_v12 = vpop.f32.mrb[26].mxu1 }
0x3def   :  { %v8182_v13 = vpop.f32.mrb[27].mxu1  ;;  %v2718_v44 = vadd.f32 %v9635_v7, %v2717_v12 }
0x3df7   :  { %v8977_v15 = vpop.eup %8976 }
0x3df8   :  { %v2626_v17 = vadd.f32 1.0, %v8977_v15 }
0x3dfa   :  { %8978 = vrcp.f32 %v2626_v17 }
0x3e04   :  { %v8979_v18 = vpop.eup %8978 }
0x3e5b   :  { %v2631_v19 = vpop.permute.xlu1 %2630 }
0x3e5c   :  { %v2633_v20 = vmul.f32 %v8979_v18, %v2631_v19 }
0x3e5e   :  { %2635 = vrot.lane.b32.xlu0 %v2633_v20, %s9162_s26 }
0x3ed0   :  { %v2636_v21 = vpop.permute.xlu0 %2635 }
0x3ed1   :  { %v2638_v23 = vadd.f32 %v2636_v21, %v2544_v14 }
0x3ed3   :  { %8980 = vtanh.f32 %v2638_v23 }
0x3edd   :  { %v8981_v25 = vpop.eup %8980 }
0x3ede   :  { %v2640_v26 = vsub.f32 %v2476_v1, %v8981_v25 }
0x3ee0   :  { %2642 = vrot.lane.b32.xlu1 %v2640_v26, %s9165_s25 }
0x3f52   :  { %v2643_v29 = vpop.permute.xlu1 %2642 }
0x3f53   :  { %v2645_v31 = vmul.f32 %v8979_v18, %v2643_v29 }
0x3f55   :  { %2647 = vrot.lane.b32.xlu0 %v2645_v31, %s9164_s24 }
0x3fc7   :  { %v2648_v33 = vpop.permute.xlu0 %2647 }
0x3fc8   :  { %v2650_v35 = vadd.f32 %v8981_v25, %v2648_v33 }
0x3fca   :  { %2722 = vrot.lane.b32.xlu1 %v2650_v35, %s9163_s29 }
0x403c   :  { %v9735_v39 = vpop.permute.xlu1 %2722 }
0x403d   :  { %8188 = vmatmul.mubr.msk.f32.vlgmr.msra.gmra.mrb[26].mxu0 %vm1848_vm2, %v9735_v39 }
0x403e   :  { %8714 = vmatpush3.bf16.msra.mxu0 %v9553_v24  ;;  %8198 = vmatprep.mubr.msk.f32.mxu0 %vm9159_vm0, %v9160_v4 }
0x403f   :  { %8715 = vmatprep.subr.bf16.mxu0 %v9158_v0 }
0x4042   :  { %8717 = vmatpush3.bf16.msra.mxu0 %v9566_v28 }
0x4043   :  { %8727 = vmatprep.subr.bf16.mxu0 %v9158_v0 }
0x4045   :  { %8199 = vmatmul.mubr.msk.f32.vlgmr.msra.gmra.mrb[28].mxu0 %vm59_vm1, %v9414_v37 }
0x4046   :  { %8729 = vmatpush3.bf16.msra.mxu0 %v9591_v55  ;;  %8223 = vmatprep.mubr.msk.f32.mxu0 %vm9159_vm0, %v9160_v4 }
0x4047   :  { %8730 = vmatprep.subr.bf16.mxu0 %v9158_v0 }
0x4110   :  { %v2792_v40 = vpop.f32.mrb[26].mxu0 }
0x4111   :  { %v2793_v41 = vadd.f32 %v9628_v5, %v2792_v40  ;;  %v8189_v30 = vpop.f32.mrb[27].mxu0 }
0x4113   :  { %2804 = vrot.lane.b32.xlu0 %v2793_v41, %s9163_s29  ;;  %v2796_v11 = vadd.f32 %v2793_v41, %v2718_v44 }
0x4115   :  { %v7506_v53 = vmul.f32 -1.442695, %v2796_v11 }
0x4117   :  { %8982 = vpow2.f32 %v7506_v53 }
0x4118   :  { %v2891_v42 = vpop.f32.mrb[28].mxu0 }
0x4119   :  { %v8200_v43 = vpop.f32.mrb[29].mxu0  ;;  %v2892_v16 = vadd.f32 %v9635_v7, %v2891_v42 }
0x4121   :  { %v8983_v37 = vpop.eup %8982 }
0x4122   :  { %v2800_v9 = vadd.f32 1.0, %v8983_v37 }
0x4124   :  { %8984 = vrcp.f32 %v2800_v9 }
0x412e   :  { %v8985_v46 = vpop.eup %8984 }
0x4185   :  { %v2805_v47 = vpop.permute.xlu0 %2804 }
0x4186   :  { %v2807_v48 = vmul.f32 %v8985_v46, %v2805_v47 }
0x4188   :  { %2809 = vrot.lane.b32.xlu1 %v2807_v48, %s9162_s26 }
0x41fa   :  { %v2810_v49 = vpop.permute.xlu1 %2809 }
0x41fb   :  { %v2812_v51 = vadd.f32 %v2810_v49, %v2718_v44 }
0x41fd   :  { %8986 = vtanh.f32 %v2812_v51 }
0x4207   :  { %v8987_v52 = vpop.eup %8986 }
0x4208   :  { %v2814_v54 = vsub.f32 %v2650_v35, %v8987_v52 }
0x420a   :  { %2816 = vrot.lane.b32.xlu0 %v2814_v54, %s9165_s25 }
0x427c   :  { %v2817_v56 = vpop.permute.xlu0 %2816 }
0x427d   :  { %v2819_v61 = vmul.f32 %v8985_v46, %v2817_v56 }
0x427f   :  { %2821 = vrot.lane.b32.xlu1 %v2819_v61, %s9164_s24 }
0x42f1   :  { %v2822_v63 = vpop.permute.xlu1 %2821 }
0x42f2   :  { %v2824_v1 = vadd.f32 %v8987_v52, %v2822_v63 }
0x42f4   :  { %2896 = vrot.lane.b32.xlu0 %v2824_v1, %s9163_s29 }
0x4366   :  { %v9758_v50 = vpop.permute.xlu0 %2896 }
0x4367   :  { %8206 = vmatmul.mubr.msk.f32.vlgmr.msra.gmra.mrb[28].mxu1 %vm1848_vm2, %v9758_v50 }
0x4368   :  { %8723 = vmatpush3.bf16.msra.mxu1 %v9553_v24  ;;  %8216 = vmatprep.mubr.msk.f32.mxu1 %vm9159_vm0, %v9160_v4 }
0x4369   :  { %8724 = vmatprep.subr.bf16.mxu1 %v9158_v0 }
0x436c   :  { %8726 = vmatpush3.bf16.msra.mxu1 %v9566_v28 }
0x436d   :  { %8736 = vmatprep.subr.bf16.mxu1 %v9158_v0 }
0x436f   :  { %8217 = vmatmul.mubr.msk.f32.vlgmr.msra.gmra.mrb[30].mxu1 %vm59_vm1, %v9433_v59 }
0x4370   :  { %8738 = vmatpush3.bf16.msra.mxu1 %v9591_v55  ;;  %8241 = vmatprep.mubr.msk.f32.mxu1 %vm9159_vm0, %v9160_v4 }
0x4371   :  { %8739 = vmatprep.subr.bf16.mxu1 %v9158_v0 }
0x443a   :  { %v2966_v6 = vpop.f32.mrb[28].mxu1 }
0x443b   :  { %v2967_v10 = vadd.f32 %v9628_v5, %v2966_v6  ;;  %v8207_v12 = vpop.f32.mrb[29].mxu1 }
0x443d   :  { %2978 = vrot.lane.b32.xlu1 %v2967_v10, %s9163_s29  ;;  %v2970_v32 = vadd.f32 %v2967_v10, %v2892_v16 }
0x443f   :  { %v7509_v15 = vmul.f32 -1.442695, %v2970_v32 }
0x4441   :  { %8988 = vpow2.f32 %v7509_v15 }
0x4442   :  { %v3065_v13 = vpop.f32.mrb[30].mxu1 }
0x4443   :  { %v8218_v14 = vpop.f32.mrb[31].mxu1  ;;  %v3066_v11 = vadd.f32 %v9635_v7, %v3065_v13 }
0x444b   :  { %v8989_v59 = vpop.eup %8988 }
0x444c   :  { %v2974_v17 = vadd.f32 1.0, %v8989_v59 }
0x444e   :  { %8990 = vrcp.f32 %v2974_v17 }
0x4458   :  { %v8991_v18 = vpop.eup %8990 }
0x44af   :  { %v2979_v19 = vpop.permute.xlu1 %2978 }
0x44b0   :  { %v2981_v20 = vmul.f32 %v8991_v18, %v2979_v19 }
0x44b2   :  { %2983 = vrot.lane.b32.xlu0 %v2981_v20, %s9162_s26 }
0x4524   :  { %v2984_v21 = vpop.permute.xlu0 %2983 }
0x4525   :  { %v2986_v23 = vadd.f32 %v2984_v21, %v2892_v16 }
0x4527   :  { %8992 = vtanh.f32 %v2986_v23 }
0x4531   :  { %v8993_v25 = vpop.eup %8992 }
0x4532   :  { %v2988_v26 = vsub.f32 %v2824_v1, %v8993_v25 }
0x4534   :  { %2990 = vrot.lane.b32.xlu1 %v2988_v26, %s9165_s25 }
0x45a6   :  { %v2991_v29 = vpop.permute.xlu1 %2990 }
0x45a7   :  { %v2993_v31 = vmul.f32 %v8991_v18, %v2991_v29 }
0x45a9   :  { %2995 = vrot.lane.b32.xlu0 %v2993_v31, %s9164_s24 }
0x461b   :  { %v2996_v33 = vpop.permute.xlu0 %2995 }
0x461c   :  { %v2998_v35 = vadd.f32 %v8993_v25, %v2996_v33 }
0x461e   :  { %3070 = vrot.lane.b32.xlu1 %v2998_v35, %s9163_s29 }
0x4690   :  { %v9781_v40 = vpop.permute.xlu1 %3070 }
0x4691   :  { %8224 = vmatmul.mubr.msk.f32.vlgmr.msra.gmra.mrb[30].mxu0 %vm1848_vm2, %v9781_v40 }
0x4692   :  { %8732 = vmatpush3.bf16.msra.mxu0 %v9553_v24  ;;  %8234 = vmatprep.mubr.msk.f32.mxu0 %vm9159_vm0, %v9160_v4 }
0x4693   :  { %8733 = vmatprep.subr.bf16.mxu0 %v9158_v0 }
0x4696   :  { %8735 = vmatpush3.bf16.msra.mxu0 %v9566_v28 }
0x4697   :  { %8745 = vmatprep.subr.bf16.mxu0 %v9158_v0 }
0x4699   :  { %8235 = vmatmul.mubr.msk.f32.vlgmr.msra.gmra.mrb[32].mxu0 %vm59_vm1, %v9452_v22 }
0x469a   :  { %8747 = vmatpush3.bf16.msra.mxu0 %v9591_v55  ;;  %8259 = vmatprep.mubr.msk.f32.mxu0 %vm9159_vm0, %v9160_v4 }
0x469b   :  { %8748 = vmatprep.subr.bf16.mxu0 %v9158_v0 }
0x4764   :  { %v3140_v41 = vpop.f32.mrb[30].mxu0 }
0x4765   :  { %v3141_v30 = vadd.f32 %v9628_v5, %v3140_v41  ;;  %v8225_v42 = vpop.f32.mrb[31].mxu0 }
0x4767   :  { %3152 = vrot.lane.b32.xlu0 %v3141_v30, %s9163_s29  ;;  %v3144_v53 = vadd.f32 %v3141_v30, %v3066_v11 }
0x4769   :  { %v7512_v37 = vmul.f32 -1.442695, %v3144_v53 }
0x476b   :  { %8994 = vpow2.f32 %v7512_v37 }
0x476c   :  { %v3239_v43 = vpop.f32.mrb[32].mxu0 }
0x476d   :  { %v8236_v44 = vpop.f32.mrb[33].mxu0  ;;  %v3240_v32 = vadd.f32 %v9635_v7, %v3239_v43 }
0x4775   :  { %v8995_v22 = vpop.eup %8994 }
0x4776   :  { %v3148_v9 = vadd.f32 1.0, %v8995_v22 }
0x4778   :  { %8996 = vrcp.f32 %v3148_v9 }
0x4782   :  { %v8997_v46 = vpop.eup %8996 }
0x47d9   :  { %v3153_v47 = vpop.permute.xlu0 %3152 }
0x47da   :  { %v3155_v48 = vmul.f32 %v8997_v46, %v3153_v47 }
0x47dc   :  { %3157 = vrot.lane.b32.xlu1 %v3155_v48, %s9162_s26 }
0x484e   :  { %v3158_v49 = vpop.permute.xlu1 %3157 }
0x484f   :  { %v3160_v51 = vadd.f32 %v3158_v49, %v3066_v11 }
0x4851   :  { %8998 = vtanh.f32 %v3160_v51 }
0x485b   :  { %v8999_v52 = vpop.eup %8998 }
0x485c   :  { %v3162_v54 = vsub.f32 %v2998_v35, %v8999_v52 }
0x485e   :  { %3164 = vrot.lane.b32.xlu0 %v3162_v54, %s9165_s25 }
0x48d0   :  { %v3165_v56 = vpop.permute.xlu0 %3164 }
0x48d1   :  { %v3167_v61 = vmul.f32 %v8997_v46, %v3165_v56 }
0x48d3   :  { %3169 = vrot.lane.b32.xlu1 %v3167_v61, %s9164_s24 }
0x4945   :  { %v3170_v63 = vpop.permute.xlu1 %3169 }
0x4946   :  { %v3172_v1 = vadd.f32 %v8999_v52, %v3170_v63 }
0x4948   :  { %3244 = vrot.lane.b32.xlu0 %v3172_v1, %s9163_s29 }
0x49ba   :  { %v9804_v6 = vpop.permute.xlu0 %3244 }
0x49bb   :  { %8242 = vmatmul.mubr.msk.f32.vlgmr.msra.gmra.mrb[32].mxu1 %vm1848_vm2, %v9804_v6 }
0x49bc   :  { %8741 = vmatpush3.bf16.msra.mxu1 %v9553_v24  ;;  %8252 = vmatprep.mubr.msk.f32.mxu1 %vm9159_vm0, %v9160_v4 }
0x49bd   :  { %8742 = vmatprep.subr.bf16.mxu1 %v9158_v0 }
0x49c0   :  { %8744 = vmatpush3.bf16.msra.mxu1 %v9566_v28 }
0x49c1   :  { %8754 = vmatprep.subr.bf16.mxu1 %v9158_v0 }
0x49c3   :  { %8253 = vmatmul.mubr.msk.f32.vlgmr.msra.gmra.mrb[34].mxu1 %vm59_vm1, %v9471_v45 }
0x49c4   :  { %8756 = vmatpush3.bf16.msra.mxu1 %v9591_v55  ;;  %8277 = vmatprep.mubr.msk.f32.mxu1 %vm9159_vm0, %v9160_v4 }
0x49c5   :  { %8757 = vmatprep.subr.bf16.mxu1 %v9158_v0 }
0x4a8e   :  { %v3314_v10 = vpop.f32.mrb[32].mxu1 }
0x4a8f   :  { %v3315_v12 = vadd.f32 %v9628_v5, %v3314_v10  ;;  %v8243_v13 = vpop.f32.mrb[33].mxu1 }
0x4a91   :  { %3326 = vrot.lane.b32.xlu1 %v3315_v12, %s9163_s29  ;;  %v3318_v15 = vadd.f32 %v3315_v12, %v3240_v32 }
0x4a93   :  { %v7515_v59 = vmul.f32 -1.442695, %v3318_v15 }
0x4a95   :  { %9000 = vpow2.f32 %v7515_v59 }
0x4a96   :  { %v3413_v14 = vpop.f32.mrb[34].mxu1 }
0x4a97   :  { %v8254_v16 = vpop.f32.mrb[35].mxu1  ;;  %v3414_v53 = vadd.f32 %v9635_v7, %v3413_v14 }
0x4a9f   :  { %v9001_v45 = vpop.eup %9000 }
0x4aa0   :  { %v3322_v17 = vadd.f32 1.0, %v9001_v45 }
0x4aa2   :  { %9002 = vrcp.f32 %v3322_v17 }
0x4aac   :  { %v9003_v18 = vpop.eup %9002 }
0x4b03   :  { %v3327_v19 = vpop.permute.xlu1 %3326 }
0x4b04   :  { %v3329_v20 = vmul.f32 %v9003_v18, %v3327_v19 }
0x4b06   :  { %3331 = vrot.lane.b32.xlu0 %v3329_v20, %s9162_s26 }
0x4b78   :  { %v3332_v21 = vpop.permute.xlu0 %3331 }
0x4b79   :  { %v3334_v23 = vadd.f32 %v3332_v21, %v3240_v32 }
0x4b7b   :  { %9004 = vtanh.f32 %v3334_v23 }
0x4b85   :  { %v9005_v25 = vpop.eup %9004 }
0x4b86   :  { %v3336_v26 = vsub.f32 %v3172_v1, %v9005_v25 }
0x4b88   :  { %3338 = vrot.lane.b32.xlu1 %v3336_v26, %s9165_s25 }
0x4bfa   :  { %v3339_v29 = vpop.permute.xlu1 %3338 }
0x4bfb   :  { %v3341_v31 = vmul.f32 %v9003_v18, %v3339_v29 }
0x4bfd   :  { %3343 = vrot.lane.b32.xlu0 %v3341_v31, %s9164_s24 }
0x4c6f   :  { %v3344_v33 = vpop.permute.xlu0 %3343 }
0x4c70   :  { %v3346_v35 = vadd.f32 %v9005_v25, %v3344_v33 }
0x4c72   :  { %3418 = vrot.lane.b32.xlu1 %v3346_v35, %s9163_s29 }
0x4ce4   :  { %v9827_v41 = vpop.permute.xlu1 %3418 }
0x4ce5   :  { %8260 = vmatmul.mubr.msk.f32.vlgmr.msra.gmra.mrb[34].mxu0 %vm1848_vm2, %v9827_v41 }
0x4ce6   :  { %8750 = vmatpush3.bf16.msra.mxu0 %v9553_v24  ;;  %8270 = vmatprep.mubr.msk.f32.mxu0 %vm9159_vm0, %v9160_v4 }
0x4ce7   :  { %8751 = vmatprep.subr.bf16.mxu0 %v9158_v0 }
0x4cea   :  { %8753 = vmatpush3.bf16.msra.mxu0 %v9566_v28 }
0x4ceb   :  { %8763 = vmatprep.subr.bf16.mxu0 %v9158_v0 }
0x4ced   :  { %8271 = vmatmul.mubr.msk.f32.vlgmr.msra.gmra.mrb[36].mxu0 %vm59_vm1, %v9490_v8 }
0x4cee   :  { %8765 = vmatpush3.bf16.msra.mxu0 %v9591_v55  ;;  %8295 = vmatprep.mubr.msk.f32.mxu0 %vm9159_vm0, %v9160_v4 }
0x4cef   :  { %8766 = vmatprep.subr.bf16.mxu0 %v9158_v0 }
0x4db8   :  { %v3488_v30 = vpop.f32.mrb[34].mxu0 }
0x4db9   :  { %v3489_v42 = vadd.f32 %v9628_v5, %v3488_v30  ;;  %v8261_v43 = vpop.f32.mrb[35].mxu0 }
0x4dbb   :  { %3500 = vrot.lane.b32.xlu0 %v3489_v42, %s9163_s29  ;;  %v3492_v37 = vadd.f32 %v3489_v42, %v3414_v53 }
0x4dbd   :  { %v7518_v22 = vmul.f32 -1.442695, %v3492_v37 }
0x4dbf   :  { %9006 = vpow2.f32 %v7518_v22 }
0x4dc0   :  { %v3587_v44 = vpop.f32.mrb[36].mxu0 }
0x4dc1   :  { %v8272_v11 = vpop.f32.mrb[37].mxu0  ;;  %v3588_v15 = vadd.f32 %v9635_v7, %v3587_v44 }
0x4dc9   :  { %v9007_v8 = vpop.eup %9006 }
0x4dca   :  { %v3496_v9 = vadd.f32 1.0, %v9007_v8 }
0x4dcc   :  { %9008 = vrcp.f32 %v3496_v9 }
0x4dd6   :  { %v9009_v46 = vpop.eup %9008 }
0x4e2d   :  { %v3501_v47 = vpop.permute.xlu0 %3500 }
0x4e2e   :  { %v3503_v48 = vmul.f32 %v9009_v46, %v3501_v47 }
0x4e30   :  { %3505 = vrot.lane.b32.xlu1 %v3503_v48, %s9162_s26 }
0x4ea2   :  { %v3506_v49 = vpop.permute.xlu1 %3505 }
0x4ea3   :  { %v3508_v51 = vadd.f32 %v3506_v49, %v3414_v53 }
0x4ea5   :  { %9010 = vtanh.f32 %v3508_v51 }
0x4eaf   :  { %v9011_v52 = vpop.eup %9010 }
0x4eb0   :  { %v3510_v54 = vsub.f32 %v3346_v35, %v9011_v52 }
0x4eb2   :  { %3512 = vrot.lane.b32.xlu0 %v3510_v54, %s9165_s25 }
0x4f24   :  { %v3513_v56 = vpop.permute.xlu0 %3512 }
0x4f25   :  { %v3515_v61 = vmul.f32 %v9009_v46, %v3513_v56 }
0x4f27   :  { %3517 = vrot.lane.b32.xlu1 %v3515_v61, %s9164_s24 }
0x4f99   :  { %v3518_v63 = vpop.permute.xlu1 %3517 }
0x4f9a   :  { %v3520_v1 = vadd.f32 %v9011_v52, %v3518_v63 }
0x4f9c   :  { %3592 = vrot.lane.b32.xlu0 %v3520_v1, %s9163_s29 }
0x500e   :  { %v9850_v10 = vpop.permute.xlu0 %3592 }
0x500f   :  { %8278 = vmatmul.mubr.msk.f32.vlgmr.msra.gmra.mrb[36].mxu1 %vm1848_vm2, %v9850_v10 }
0x5010   :  { %8759 = vmatpush3.bf16.msra.mxu1 %v9553_v24  ;;  %8288 = vmatprep.mubr.msk.f32.mxu1 %vm9159_vm0, %v9160_v4 }
0x5011   :  { %8760 = vmatprep.subr.bf16.mxu1 %v9158_v0 }
0x5014   :  { %8762 = vmatpush3.bf16.msra.mxu1 %v9566_v28 }
0x5015   :  { %8772 = vmatprep.subr.bf16.mxu1 %v9158_v0 }
0x5017   :  { %8289 = vmatmul.mubr.msk.f32.vlgmr.msra.gmra.mrb[38].mxu1 %vm59_vm1, %v9509_v34 }
0x5018   :  { %8774 = vmatpush3.bf16.msra.mxu1 %v9591_v55  ;;  %8313 = vmatprep.mubr.msk.f32.mxu1 %vm9159_vm0, %v9160_v4 }
0x5019   :  { %8775 = vmatprep.subr.bf16.mxu1 %v9158_v0 }
0x50e2   :  { %v3662_v12 = vpop.f32.mrb[36].mxu1 }
0x50e3   :  { %v3663_v13 = vadd.f32 %v9628_v5, %v3662_v12  ;;  %v8279_v14 = vpop.f32.mrb[37].mxu1 }
0x50e5   :  { %3674 = vrot.lane.b32.xlu1 %v3663_v13, %s9163_s29  ;;  %v3666_v59 = vadd.f32 %v3663_v13, %v3588_v15 }
0x50e7   :  { %v7521_v45 = vmul.f32 -1.442695, %v3666_v59 }
0x50e9   :  { %9012 = vpow2.f32 %v7521_v45 }
0x50ea   :  { %v3761_v16 = vpop.f32.mrb[38].mxu1 }
0x50eb   :  { %v8290_v32 = vpop.f32.mrb[39].mxu1  ;;  %v3762_v37 = vadd.f32 %v9635_v7, %v3761_v16 }
0x50f3   :  { %v9013_v34 = vpop.eup %9012 }
0x50f4   :  { %v3670_v17 = vadd.f32 1.0, %v9013_v34 }
0x50f6   :  { %9014 = vrcp.f32 %v3670_v17 }
0x5100   :  { %v9015_v18 = vpop.eup %9014 }
0x5157   :  { %v3675_v19 = vpop.permute.xlu1 %3674 }
0x5158   :  { %v3677_v20 = vmul.f32 %v9015_v18, %v3675_v19 }
0x515a   :  { %3679 = vrot.lane.b32.xlu0 %v3677_v20, %s9162_s26 }
0x51cc   :  { %v3680_v21 = vpop.permute.xlu0 %3679 }
0x51cd   :  { %v3682_v23 = vadd.f32 %v3680_v21, %v3588_v15 }
0x51cf   :  { %9016 = vtanh.f32 %v3682_v23 }
0x51d9   :  { %v9017_v25 = vpop.eup %9016 }
0x51da   :  { %v3684_v26 = vsub.f32 %v3520_v1, %v9017_v25 }
0x51dc   :  { %3686 = vrot.lane.b32.xlu1 %v3684_v26, %s9165_s25 }
0x524e   :  { %v3687_v29 = vpop.permute.xlu1 %3686 }
0x524f   :  { %v3689_v31 = vmul.f32 %v9015_v18, %v3687_v29 }
0x5251   :  { %3691 = vrot.lane.b32.xlu0 %v3689_v31, %s9164_s24 }
0x52c3   :  { %v3692_v33 = vpop.permute.xlu0 %3691 }
0x52c4   :  { %v3694_v35 = vadd.f32 %v9017_v25, %v3692_v33 }
0x52c6   :  { %3766 = vrot.lane.b32.xlu1 %v3694_v35, %s9163_s29 }
0x5338   :  { %v9873_v30 = vpop.permute.xlu1 %3766 }
0x5339   :  { %8296 = vmatmul.mubr.msk.f32.vlgmr.msra.gmra.mrb[38].mxu0 %vm1848_vm2, %v9873_v30 }
0x533a   :  { %8768 = vmatpush3.bf16.msra.mxu0 %v9553_v24  ;;  %8306 = vmatprep.mubr.msk.f32.mxu0 %vm9159_vm0, %v9160_v4 }
0x533b   :  { %8769 = vmatprep.subr.bf16.mxu0 %v9158_v0 }
0x533e   :  { %8771 = vmatpush3.bf16.msra.mxu0 %v9566_v28 }
0x533f   :  { %8781 = vmatprep.subr.bf16.mxu0 %v9158_v0 }
0x5341   :  { %8307 = vmatmul.mubr.msk.f32.vlgmr.msra.gmra.mrb[40].mxu0 %vm59_vm1, %v9528_v58 }
0x5342   :  { %8783 = vmatpush3.bf16.msra.mxu0 %v9591_v55  ;;  %8331 = vmatprep.mubr.msk.f32.mxu0 %vm9159_vm0, %v9160_v4 }
0x5343   :  { %8784 = vmatprep.subr.bf16.mxu0 %v9158_v0 }
0x540c   :  { %v3836_v42 = vpop.f32.mrb[38].mxu0 }
0x540d   :  { %v3837_v43 = vadd.f32 %v9628_v5, %v3836_v42  ;;  %v8297_v44 = vpop.f32.mrb[39].mxu0  ;;  %v9150_v42 = vld [vmem:[%s10459_s8] ss:$0 sm:$0xff] }
0x540f   :  { %3848 = vrot.lane.b32.xlu0 %v3837_v43, %s9163_s29  ;;  %v3840_v22 = vadd.f32 %v3837_v43, %v3762_v37 }
0x5411   :  { %v7524_v8 = vmul.f32 -1.442695, %v3840_v22 }
0x5413   :  { %9018 = vpow2.f32 %v7524_v8 }
0x5414   :  { %v3935_v11 = vpop.f32.mrb[40].mxu0 }
0x5415   :  { %v8308_v53 = vpop.f32.mrb[41].mxu0  ;;  %v3936_v59 = vadd.f32 %v9635_v7, %v3935_v11 }
0x541d   :  { %v9019_v58 = vpop.eup %9018 }
0x541e   :  { %v3844_v9 = vadd.f32 1.0, %v9019_v58 }
0x5420   :  { %9020 = vrcp.f32 %v3844_v9 }
0x542a   :  { %v9021_v46 = vpop.eup %9020 }
0x5481   :  { %v3849_v47 = vpop.permute.xlu0 %3848 }
0x5482   :  { %v3851_v48 = vmul.f32 %v9021_v46, %v3849_v47 }
0x5484   :  { %3853 = vrot.lane.b32.xlu1 %v3851_v48, %s9162_s26 }
0x54f6   :  { %v3854_v49 = vpop.permute.xlu1 %3853 }
0x54f7   :  { %v3856_v51 = vadd.f32 %v3854_v49, %v3762_v37 }
0x54f9   :  { %9022 = vtanh.f32 %v3856_v51 }
0x5503   :  { %v9023_v52 = vpop.eup %9022 }
0x5504   :  { %v3858_v54 = vsub.f32 %v3694_v35, %v9023_v52 }
0x5506   :  { %3860 = vrot.lane.b32.xlu0 %v3858_v54, %s9165_s25 }
0x5578   :  { %v3861_v56 = vpop.permute.xlu0 %3860 }
0x5579   :  { %v3863_v61 = vmul.f32 %v9021_v46, %v3861_v56 }
0x557b   :  { %3865 = vrot.lane.b32.xlu1 %v3863_v61, %s9164_s24  ;;  %v9152_v61 = vld [vmem:[%s10454_s3] ss:$0 sm:$0xff] }
0x55ed   :  { %v3866_v63 = vpop.permute.xlu1 %3865 }
0x55ee   :  { %v3868_v1 = vadd.f32 %v9023_v52, %v3866_v63  ;;  %v1723_v63 = vadd.f32 %v9152_v61, %v9623_v62  ;;  %v4570_v61 = vld [vmem:[%s10464_s10] sm:$0xff] }
0x55f0   :  { %3940 = vrot.lane.b32.xlu0 %v3868_v1, %s9163_s29 }
0x5662   :  { %v9896_v12 = vpop.permute.xlu0 %3940 }
0x5663   :  { %8314 = vmatmul.mubr.msk.f32.vlgmr.msra.gmra.mrb[40].mxu1 %vm1848_vm2, %v9896_v12 }
0x5664   :  { %8777 = vmatpush3.bf16.msra.mxu1 %v9553_v24  ;;  %8324 = vmatprep.mubr.msk.f32.mxu1 %vm9159_vm0, %v9160_v4 }
0x5665   :  { %8778 = vmatprep.subr.bf16.mxu1 %v9158_v0 }
0x5668   :  { %8780 = vmatpush3.bf16.msra.mxu1 %v9566_v28 }
0x5669   :  { %8790 = vmatprep.subr.bf16.mxu1 %v9158_v0 }
0x566b   :  { %8325 = vmatmul.mubr.msk.f32.vlgmr.msra.gmra.mrb[42].mxu1 %vm59_vm1, %v9561_v27 }
0x566c   :  { %8792 = vmatpush3.bf16.msra.mxu1 %v9591_v55  ;;  %8349 = vmatprep.mubr.msk.f32.mxu1 %vm9159_vm0, %v9160_v4 }
0x566d   :  { %8793 = vmatprep.subr.bf16.mxu1 %v9158_v0 }
0x5736   :  { %v4010_v13 = vpop.f32.mrb[40].mxu1 }
0x5737   :  { %v4011_v14 = vadd.f32 %v9628_v5, %v4010_v13  ;;  %v8315_v16 = vpop.f32.mrb[41].mxu1 }
0x5739   :  { %4022 = vrot.lane.b32.xlu1 %v4011_v14, %s9163_s29  ;;  %v4014_v45 = vadd.f32 %v4011_v14, %v3936_v59 }
0x573b   :  { %v7527_v34 = vmul.f32 -1.442695, %v4014_v45 }
0x573d   :  { %9024 = vpow2.f32 %v7527_v34 }
0x573e   :  { %v4109_v32 = vpop.f32.mrb[42].mxu1 }
0x573f   :  { %v8326_v15 = vpop.f32.mrb[43].mxu1 }
0x5747   :  { %v9025_v27 = vpop.eup %9024 }
0x5748   :  { %v4018_v17 = vadd.f32 1.0, %v9025_v27 }
0x574a   :  { %9026 = vrcp.f32 %v4018_v17 }
0x5754   :  { %v9027_v18 = vpop.eup %9026 }
0x57ab   :  { %v4023_v19 = vpop.permute.xlu1 %4022 }
0x57ac   :  { %v4025_v20 = vmul.f32 %v9027_v18, %v4023_v19 }
0x57ae   :  { %4027 = vrot.lane.b32.xlu0 %v4025_v20, %s9162_s26 }
0x5820   :  { %v4028_v21 = vpop.permute.xlu0 %4027 }
0x5821   :  { %v4030_v5 = vadd.f32 %v4028_v21, %v3936_v59 }
0x5823   :  { %9028 = vtanh.f32 %v4030_v5 }
0x582d   :  { %v9029_v23 = vpop.eup %9028 }
0x582e   :  { %v4032_v25 = vsub.f32 %v3868_v1, %v9029_v23  ;;  %v7485_v1 = vld [vmem:[%s10455_s0 + $0x1e] sm:$0x3] }
0x582f   :  { %v1728_v13 = vadd.f32 %v7485_v1, %v1723_v63 }
0x5830   :  { %4034 = vrot.lane.b32.xlu1 %v4032_v25, %s9165_s25 }
0x5831   :  { %v7486_v14 = vmul.f32 -1.442695, %v1728_v13 }
0x58a2   :  { %v4035_v26 = vpop.permute.xlu1 %4034 }
0x58a3   :  { %v4037_v7 = vmul.f32 %v9027_v18, %v4035_v26 }
0x58a5   :  { %4039 = vrot.lane.b32.xlu0 %v4037_v7, %s9164_s24 }
0x5917   :  { %v4040_v29 = vpop.permute.xlu0 %4039 }
0x5918   :  { %v4042_v31 = vadd.f32 %v9029_v23, %v4040_v29 }
0x591a   :  { %4114 = vrot.lane.b32.xlu1 %v4042_v31, %s9163_s29 }
0x598c   :  { %v9919_v33 = vpop.permute.xlu1 %4114 }
0x598d   :  { %8332 = vmatmul.mubr.msk.f32.vlgmr.msra.gmra.mrb[42].mxu0 %vm1848_vm2, %v9919_v33 }
0x598e   :  { %8786 = vmatpush3.bf16.msra.mxu0 %v9553_v24  ;;  %8342 = vmatprep.mubr.msk.f32.mxu0 %vm9159_vm0, %v9160_v4 }
0x598f   :  { %8787 = vmatprep.subr.bf16.mxu0 %v9158_v0 }
0x5992   :  { %8789 = vmatpush3.bf16.msra.mxu0 %v9566_v28 }
0x5993   :  { %8799 = vmatprep.subr.bf16.mxu0 %v9158_v0 }
0x5995   :  { %8343 = vmatmul.mubr.msk.f32.vlgmr.msra.gmra.mrb[44].mxu0 %vm59_vm1, %v9599_v60 }
0x5996   :  { %8801 = vmatpush3.bf16.msra.mxu0 %v9591_v55  ;;  %8367 = vmatprep.mubr.msk.f32.mxu0 %vm9159_vm0, %v9160_v4  ;;  %v9151_v55 = vld [vmem:[%s10460_s6] ss:$0 sm:$0xff] }
0x5997   :  { %8802 = vmatprep.subr.bf16.mxu0 %v9158_v0  ;;  %v4110_v60 = vadd.f32 %v9151_v55, %v4109_v32 }
0x5a60   :  { %v4184_v35 = vpop.f32.mrb[42].mxu0 }
0x5a61   :  { %v4185_v43 = vadd.f32 %v9150_v42, %v4184_v35  ;;  %v8333_v44 = vpop.f32.mrb[43].mxu0 }
0x5a63   :  { %4196 = vrot.lane.b32.xlu0 %v4185_v43, %s9163_s29  ;;  %v4188_v37 = vadd.f32 %v4185_v43, %v4110_v60 }
0x5a65   :  { %v7530_v22 = vmul.f32 -1.442695, %v4188_v37 }
0x5a67   :  { %9030 = vpow2.f32 %v7530_v22  ;;  %v9981_v22 = vld [vmem:[%s10461_s12] sm:$0x3] }
0x5a68   :  { %v9939_v11 = vpop.f32.mrb[44].mxu0 }
0x5a69   :  { %v8344_v53 = vpop.f32.mrb[45].mxu0 }
0x5a71   :  { %v9031_v8 = vpop.eup %9030 }
0x5a72   :  { %v4192_v58 = vadd.f32 1.0, %v9031_v8  ;;  %v9986_v8 = vld [vmem:[%s10462_s9] sm:$0x3] }
0x5a74   :  { %9032 = vrcp.f32 %v4192_v58 }
0x5a7e   :  { %v9033_v9 = vpop.eup %9032 }
0x5ad5   :  { %v4197_v46 = vpop.permute.xlu0 %4196 }
0x5ad6   :  { %v4199_v47 = vmul.f32 %v9033_v9, %v4197_v46 }
0x5ad8   :  { %4201 = vrot.lane.b32.xlu1 %v4199_v47, %s9162_s26 }
0x5b4a   :  { %v4202_v48 = vpop.permute.xlu1 %4201 }
0x5b4b   :  { %v4204_v49 = vadd.f32 %v4202_v48, %v4110_v60 }
0x5b4d   :  { %9034 = vtanh.f32 %v4204_v49 }
0x5b4e   :  { %9036 = vpow2.f32 %v7486_v14 }
0x5b57   :  { %v9035_v51 = vpop.eup %9034 }
0x5b58   :  { %v4206_v52 = vsub.f32 %v4042_v31, %v9035_v51  ;;  %v9037_v16 = vpop.eup %9036 }
0x5b59   :  { %v1732_v32 = vadd.f32 1.0, %v9037_v16 }
0x5b5a   :  { %4208 = vrot.lane.b32.xlu0 %v4206_v52, %s9165_s25 }
0x5b5b   :  { %9038 = vrcp.f32 %v1732_v32 }
0x5b65   :  { %v9039_v45 = vpop.eup %9038 }
0x5bcc   :  { %v4209_v54 = vpop.permute.xlu0 %4208 }
0x5bcd   :  { %v4211_v56 = vmul.f32 %v9033_v9, %v4209_v54 }
0x5bcf   :  { %4213 = vrot.lane.b32.xlu1 %v4211_v56, %s9164_s24 }
0x5bd3   :  { %1736 = vrot.lane.b32.xlu1 %v1723_v63, %s9161_s23  ;;  %v4571_v63 = vld [vmem:[%s10464_s10 + $0x8] sm:$0xff] }
0x5c41   :  { %v4214_v15 = vpop.permute.xlu1 %4213 }
0x5c42   :  { %v4216_v59 = vadd.f32 %v9035_v51, %v4214_v15  ;;  %v10008_v51 = vld [vmem:[%s10463_s13] ss:$0 sm:$0xff] }
0x5c44   :  { %4288 = vrot.lane.b32.xlu0 %v4216_v59, %s9163_s29 }
0x5c45   :  { %v1737_v34 = vpop.permute.xlu1 %1736 }
0x5c46   :  { %v1739_v27 = vmul.f32 %v9039_v45, %v1737_v34 }
0x5c48   :  { %1741 = vrot.lane.b32.xlu1 %v1739_v27, %s9161_s23 }
0x5cb6   :  { %v9957_v62 = vpop.permute.xlu0 %4288 }
0x5cb7   :  { %8350 = vmatmul.mubr.msk.f32.vlgmr.msra.gmra.mrb[44].mxu1 %vm1848_vm2, %v9957_v62 }
0x5cb8   :  { %8795 = vmatpush3.bf16.msra.mxu1 %v9553_v24  ;;  %8360 = vmatprep.mubr.msk.f32.mxu1 %vm9159_vm0, %v9160_v4 }
0x5cb9   :  { %8796 = vmatprep.subr.bf16.mxu1 %v9158_v0 }
0x5cba   :  { %v1742_v17 = vpop.permute.xlu1 %1741 }
0x5cbb   :  { %v1744_v18 = vadd.f32 %v7485_v1, %v1742_v17  ;;  %v10021_v1 = vpack.c.bf16 %v4571_v63, %v4570_v61 }
0x5cbc   :  { %8798 = vmatpush3.bf16.msra.mxu1 %v9566_v28  ;;  %v4284_v28 = vadd.f32 %v9151_v55, %v9939_v11 }
0x5cbd   :  { %9040 = vtanh.f32 %v1744_v18  ;;  %8377 = vmatprep.subr.mxu1 %v9160_v4 }
0x5cc7   :  { %v9041_v19 = vpop.eup %9040 }
0x5cc8   :  { %v1746_v20 = vsub.f32 %v9595_v57, %v9041_v19 }
0x5cca   :  { %1748 = vrot.lane.b32.xlu1 %v1746_v20, %s9163_s29 }
0x5d3c   :  { %v1749_v21 = vpop.permute.xlu1 %1748 }
0x5d3d   :  { %v1751_v5 = vmul.f32 %v9039_v45, %v1749_v21 }
0x5d3f   :  { %1753 = vrot.lane.b32.xlu1 %v1751_v5, %s9162_s26 }
0x5d8a   :  { %v4358_v24 = vpop.f32.mrb[44].mxu1 }
0x5d8b   :  { %v4359_v23 = vadd.f32 %v9150_v42, %v4358_v24  ;;  %v8351_v25 = vpop.f32.mrb[45].mxu1 }
0x5d8d   :  { %4370 = vrot.lane.b32.xlu0 %v4359_v23, %s9163_s29  ;;  %v4362_v29 = vadd.f32 %v4359_v23, %v4284_v28 }
0x5d8f   :  { %v7533_v31 = vmul.f32 -1.442695, %v4362_v29 }
0x5d91   :  { %9042 = vpow2.f32 %v7533_v31 }
0x5d9b   :  { %v9043_v57 = vpop.eup %9042 }
0x5d9c   :  { %v4366_v35 = vadd.f32 1.0, %v9043_v57 }
0x5d9e   :  { %9044 = vrcp.f32 %v4366_v35 }
0x5da8   :  { %v9045_v43 = vpop.eup %9044 }
0x5db1   :  { %v1754_v26 = vpop.permute.xlu1 %1753 }
0x5db2   :  { %v1756_v7 = vadd.f32 %v9041_v19, %v1754_v26 }
0x5db4   :  { %4392 = vrot.lane.b32.xlu1 %v1756_v7, %s9161_s23 }
0x5dff   :  { %v4371_v44 = vpop.permute.xlu0 %4370 }
0x5e00   :  { %v4373_v53 = vmul.f32 %v9045_v43, %v4371_v44 }
0x5e02   :  { %4375 = vrot.lane.b32.xlu0 %v4373_v53, %s9162_s26 }
0x5e26   :  { %v4393_v42 = vpop.permute.xlu1 %4392 }
0x5e27   :  { %8361 = vmatmul.mubr.msk.f32.vlgmr.msra.gmra.mrb[46].mxu1 %vm59_vm1, %v4393_v42 }
0x5e28   :  { %8379 = vmatprep.mubr.msk.f32.mxu1 %vm9159_vm0, %v9160_v4  ;;  %8378 = vmatpush3.msk.msra.mxu1 %vm4662_vm3, %v9981_v22 }
0x5e29   :  { %8389 = vmatprep.subr.mxu1 %v9160_v4 }
0x5e2b   :  { %8380 = vmatmul.mubr.msk.f32.vlgmr.msra.gmra.mrb[48].mxu1 %vm4658_vm4, %v9986_v8 }
0x5e2c   :  { %8390 = vmatpush3.msk.msra.mxu1 %vm4662_vm3, %v9981_v22  ;;  %8391 = vmatprep.mubr.msk.f32.mxu1 %vm9159_vm0, %v9160_v4 }
0x5e2d   :  { %8401 = vmatprep.subr.mxu1 %v9160_v4 }
0x5e74   :  { %v4376_v60 = vpop.permute.xlu0 %4375 }
0x5e75   :  { %v4378_v37 = vadd.f32 %v4376_v60, %v4284_v28 }
0x5e77   :  { %9046 = vtanh.f32 %v4378_v37 }
0x5e81   :  { %v9047_v11 = vpop.eup %9046 }
0x5e82   :  { %v4380_v55 = vsub.f32 %v4216_v59, %v9047_v11 }
0x5e84   :  { %4382 = vrot.lane.b32.xlu0 %v4380_v55, %s9165_s25 }
0x5ef6   :  { %v4383_v58 = vpop.permute.xlu0 %4382 }
0x5ef7   :  { %v4385_v9 = vmul.f32 %v9045_v43, %v4383_v58 }
0x5ef9   :  { %4387 = vrot.lane.b32.xlu0 %v4385_v9, %s9164_s24 }
0x5efa   :  { %v9999_v46 = vpop.f32.mrb[46].mxu1 }
0x5efb   :  { %v8362_v47 = vpop.f32.mrb[47].mxu1 }
0x5efe   :  { %v4732_v52 = vpop.f32.mrb[48].mxu1 }
0x5eff   :  { %v10011_v54 = vadd.f32 %v10008_v51, %v4732_v52  ;;  %v8381_v56 = vpop.f32.mrb[49].mxu1 }
0x5f01   :  { %4744 = vrot.lane.b32.xlu1 %v10011_v54, %s9166_s7 }
0x5f6b   :  { %v4388_v48 = vpop.permute.xlu0 %4387 }
0x5f6c   :  { %v10001_v49 = vadd.f32 %v9047_v11, %v4388_v48 }
0x5f6e   :  { %4467 = vrot.lane.b32.xlu0 %v10001_v49, %s9163_s29 }
0x5f73   :  { %v4745_v17 = vpop.permute.xlu1 %4744 }
0x5fe0   :  { %v4468_v13 = vpop.permute.xlu0 %4467 }
0x5fe1   :  { %8368 = vmatmul.mubr.msk.f32.vlgmr.msra.gmra.mrb[46].mxu0 %vm1848_vm2, %v4468_v13 }
0x5fe2   :  { %8804 = vmatpush3.bf16.msra.mxu0 %v10021_v1  ;;  %8374 = vmatprep.mubr.msk.f32.mxu0 %vm9159_vm0, %v9160_v4 }
0x5fe3   :  { %8805 = vmatprep.subr.bf16.mxu0 %v9158_v0 }
0x5fe5   :  { %8375 = vmatmul.mubr.msk.f32.vlgmr.msra.gmra.mrb[48].mxu0 %vm1848_vm2, %v9643_v36 }
0x5fe6   :  { %8807 = vmatpush3.bf16.msra.mxu0 %v10021_v1  ;;  %8386 = vmatprep.mubr.msk.f32.mxu0 %vm9159_vm0, %v9160_v4 }
0x5fe7   :  { %8808 = vmatprep.subr.bf16.mxu0 %v9158_v0 }
0x5fe9   :  { %8387 = vmatmul.mubr.msk.f32.vlgmr.msra.gmra.mrb[50].mxu0 %vm1848_vm2, %v9666_v2 }
0x5fea   :  { %8810 = vmatpush3.bf16.msra.mxu0 %v10021_v1  ;;  %8398 = vmatprep.mubr.msk.f32.mxu0 %vm9159_vm0, %v9160_v4 }
0x5feb   :  { %8811 = vmatprep.subr.bf16.mxu0 %v9158_v0 }
0x5fed   :  { %8399 = vmatmul.mubr.msk.f32.vlgmr.msra.gmra.mrb[52].mxu0 %vm1848_vm2, %v9689_v38  ;;  %v10121_v38 = vld [vmem:[%s10465_s11] ss:$0 sm:$0xff] }
0x5fee   :  { %8813 = vmatpush3.bf16.msra.mxu0 %v10021_v1  ;;  %8410 = vmatprep.mubr.msk.f32.mxu0 %vm9159_vm0, %v9160_v4 }
0x5fef   :  { %8814 = vmatprep.subr.bf16.mxu0 %v9158_v0 }
0x5ff1   :  { %8411 = vmatmul.mubr.msk.f32.vlgmr.msra.gmra.mrb[54].mxu0 %vm1848_vm2, %v9712_v3 }
0x5ff2   :  { %8816 = vmatpush3.bf16.msra.mxu0 %v10021_v1  ;;  %8422 = vmatprep.mubr.msk.f32.mxu0 %vm9159_vm0, %v9160_v4 }
0x5ff3   :  { %8817 = vmatprep.subr.bf16.mxu0 %v9158_v0 }
0x5ff5   :  { %8423 = vmatmul.mubr.msk.f32.vlgmr.msra.gmra.mrb[56].mxu0 %vm1848_vm2, %v9735_v39 }
0x5ff6   :  { %8819 = vmatpush3.bf16.msra.mxu0 %v10021_v1  ;;  %8434 = vmatprep.mubr.msk.f32.mxu0 %vm9159_vm0, %v9160_v4 }
0x5ff7   :  { %8820 = vmatprep.subr.bf16.mxu0 %v9158_v0 }
0x5ff9   :  { %8435 = vmatmul.mubr.msk.f32.vlgmr.msra.gmra.mrb[58].mxu0 %vm1848_vm2, %v9758_v50 }
0x5ffa   :  { %8822 = vmatpush3.bf16.msra.mxu0 %v10021_v1  ;;  %8446 = vmatprep.mubr.msk.f32.mxu0 %vm9159_vm0, %v9160_v4 }
0x5ffb   :  { %8823 = vmatprep.subr.bf16.mxu0 %v9158_v0 }
0x5ffd   :  { %8447 = vmatmul.mubr.msk.f32.vlgmr.msra.gmra.mrb[60].mxu0 %vm1848_vm2, %v9781_v40 }
0x5ffe   :  { %8825 = vmatpush3.bf16.msra.mxu0 %v10021_v1  ;;  %8458 = vmatprep.mubr.msk.f32.mxu0 %vm9159_vm0, %v9160_v4 }
0x5fff   :  { %8826 = vmatprep.subr.bf16.mxu0 %v9158_v0 }
0x6001   :  { %8459 = vmatmul.mubr.msk.f32.vlgmr.msra.gmra.mrb[62].mxu0 %vm1848_vm2, %v9804_v6 }
0x6002   :  { %8828 = vmatpush3.bf16.msra.mxu0 %v10021_v1  ;;  %8470 = vmatprep.mubr.msk.f32.mxu0 %vm9159_vm0, %v9160_v4 }
0x6003   :  { %8829 = vmatprep.subr.bf16.mxu0 %v9158_v0 }
0x6005   :  { %8471 = vmatmul.mubr.msk.f32.vlgmr.msra.gmra.mrb[64].mxu0 %vm1848_vm2, %v9827_v41 }
0x6006   :  { %8831 = vmatpush3.bf16.msra.mxu0 %v10021_v1  ;;  %8482 = vmatprep.mubr.msk.f32.mxu0 %vm9159_vm0, %v9160_v4 }
0x6007   :  { %8832 = vmatprep.subr.bf16.mxu0 %v9158_v0 }
0x6009   :  { %8483 = vmatmul.mubr.msk.f32.vlgmr.msra.gmra.mrb[66].mxu0 %vm1848_vm2, %v9850_v10 }
0x600a   :  { %8834 = vmatpush3.bf16.msra.mxu0 %v10021_v1  ;;  %8494 = vmatprep.mubr.msk.f32.mxu0 %vm9159_vm0, %v9160_v4 }
0x600b   :  { %8835 = vmatprep.subr.bf16.mxu0 %v9158_v0 }
0x600d   :  { %8495 = vmatmul.mubr.msk.f32.vlgmr.msra.gmra.mrb[68].mxu0 %vm1848_vm2, %v9873_v30 }
0x600e   :  { %8837 = vmatpush3.bf16.msra.mxu0 %v10021_v1  ;;  %8506 = vmatprep.mubr.msk.f32.mxu0 %vm9159_vm0, %v9160_v4 }
0x600f   :  { %8838 = vmatprep.subr.bf16.mxu0 %v9158_v0 }
0x6011   :  { %8507 = vmatmul.mubr.msk.f32.vlgmr.msra.gmra.mrb[70].mxu0 %vm1848_vm2, %v9896_v12 }
0x6012   :  { %8840 = vmatpush3.bf16.msra.mxu0 %v10021_v1  ;;  %8518 = vmatprep.mubr.msk.f32.mxu0 %vm9159_vm0, %v9160_v4 }
0x6013   :  { %8841 = vmatprep.subr.bf16.mxu0 %v9158_v0 }
0x6015   :  { %8519 = vmatmul.mubr.msk.f32.vlgmr.msra.gmra.mrb[72].mxu0 %vm1848_vm2, %v9919_v33 }
0x6016   :  { %8843 = vmatpush3.bf16.msra.mxu0 %v10021_v1  ;;  %8530 = vmatprep.mubr.msk.f32.mxu0 %vm9159_vm0, %v9160_v4 }
0x6017   :  { %8844 = vmatprep.subr.bf16.mxu0 %v9158_v0 }
0x6019   :  { %8531 = vmatmul.mubr.msk.f32.vlgmr.msra.gmra.mrb[74].mxu0 %vm1848_vm2, %v9957_v62 }
0x601a   :  { %8846 = vmatpush3.bf16.msra.mxu0 %v10021_v1  ;;  %8542 = vmatprep.mubr.msk.f32.mxu0 %vm9159_vm0, %v9160_v4 }
0x601b   :  { %8847 = vmatprep.subr.bf16.mxu0 %v9158_v0 }
0x601d   :  { %8543 = vmatmul.mubr.msk.f32.vlgmr.msra.gmra.mrb[76].mxu0 %vm1848_vm2, %v4468_v13 }
0x601e   :  { %8849 = vmatpush3.bf16.msra.mxu0 %v10021_v1  ;;  %8554 = vmatprep.mubr.msk.f32.mxu0 %vm9159_vm0, %v9160_v4 }
0x60b4   :  { %v10116_v36 = vpop.f32.mrb[46].mxu0 }
0x60b5   :  { %v8369_v2 = vpop.f32.mrb[47].mxu0 }
0x60b8   :  { %v4648_v3 = vpop.f32.mrb[48].mxu0 }
0x60b9   :  { %v4649_v39 = vadd.f32 %v10121_v38, %v4648_v3  ;;  %v8376_v50 = vpop.f32.mrb[49].mxu0 }
0x60bb   :  { %v4736_v0 = vadd.f32 %v10011_v54, %v4649_v39 }
0x60bc   :  { %v10125_v40 = vpop.f32.mrb[50].mxu0 }
0x60bd   :  { %v7542_v6 = vmul.f32 -1.442695, %v4736_v0  ;;  %v8388_v41 = vpop.f32.mrb[51].mxu0  ;;  %v4842_v56 = vadd.f32 %v10121_v38, %v10125_v40 }
0x60bf   :  { %9048 = vpow2.f32 %v7542_v6 }
0x60c0   :  { %v10127_v10 = vpop.f32.mrb[52].mxu0 }
0x60c1   :  { %v8400_v30 = vpop.f32.mrb[53].mxu0 }
0x60c4   :  { %v10129_v12 = vpop.f32.mrb[54].mxu0 }
0x60c5   :  { %v8412_v33 = vpop.f32.mrb[55].mxu0 }
0x60c8   :  { %v10131_v14 = vpop.f32.mrb[56].mxu0 }
0x60c9   :  { %v9049_v16 = vpop.eup %9048  ;;  %v8424_v32 = vpop.f32.mrb[57].mxu0 }
0x60ca   :  { %v4740_v15 = vadd.f32 1.0, %v9049_v16 }
0x60cc   :  { %9050 = vrcp.f32 %v4740_v15  ;;  %v10133_v59 = vpop.f32.mrb[58].mxu0 }
0x60cd   :  { %v8436_v45 = vpop.f32.mrb[59].mxu0 }
0x60d0   :  { %v10135_v34 = vpop.f32.mrb[60].mxu0 }
0x60d1   :  { %v8448_v27 = vpop.f32.mrb[61].mxu0 }
0x60d4   :  { %v10137_v62 = vpop.f32.mrb[62].mxu0 }
0x60d5   :  { %v8460_v18 = vpop.f32.mrb[63].mxu0 }
0x60d6   :  { %v9051_v19 = vpop.eup %9050 }
0x60d7   :  { %v4747_v20 = vmul.f32 %v9051_v19, %v4745_v17  ;;  %v5019_v17 = vadd.f32 %v10121_v38, %v10127_v10 }
0x60d8   :  { %v10139_v21 = vpop.f32.mrb[64].mxu0 }
0x60d9   :  { %v8472_v5 = vpop.f32.mrb[65].mxu0  ;;  %4749 = vrot.lane.b32.xlu0 %v4747_v20, %s9167_s27 }
0x60dc   :  { %v10142_v24 = vpop.f32.mrb[66].mxu0 }
0x60dd   :  { %v8484_v23 = vpop.f32.mrb[67].mxu0 }
0x60e0   :  { %v10144_v25 = vpop.f32.mrb[68].mxu0 }
0x60e1   :  { %v8496_v26 = vpop.f32.mrb[69].mxu0 }
0x60e4   :  { %v10146_v7 = vpop.f32.mrb[70].mxu0 }
0x60e5   :  { %v8508_v28 = vpop.f32.mrb[71].mxu0 }
0x60e8   :  { %v10148_v29 = vpop.f32.mrb[72].mxu0 }
0x60e9   :  { %v8520_v31 = vpop.f32.mrb[73].mxu0 }
0x60ec   :  { %v10150_v57 = vpop.f32.mrb[74].mxu0 }
0x60ed   :  { %v8532_v35 = vpop.f32.mrb[75].mxu0 }
0x60f0   :  { %v10152_v43 = vpop.f32.mrb[76].mxu0 }
0x60f1   :  { %v8544_v44 = vpop.f32.mrb[77].mxu0 }
0x614b   :  { %v4750_v53 = vpop.permute.xlu0 %4749 }
0x614c   :  { %v4752_v42 = vadd.f32 %v4750_v53, %v4649_v39 }
0x614e   :  { %9052 = vtanh.f32 %v4752_v42 }
0x6158   :  { %v9053_v60 = vpop.eup %9052 }
0x6159   :  { %4755 = vrot.lane.b32.xlu1 %v9053_v60, %s9166_s7 }
0x61cb   :  { %v4756_v37 = vpop.permute.xlu1 %4755 }
0x61cc   :  { %v4758_v11 = vsub.f32 %v9986_v8, %v4756_v37 }
0x61ce   :  { %4760 = vrot.lane.b32.xlu0 %v4758_v11, %s9168_s28 }
0x6240   :  { %v4761_v55 = vpop.permute.xlu0 %4760 }
0x6241   :  { %v4763_v58 = vmul.f32 %v9051_v19, %v4761_v55 }
0x6243   :  { %4765 = vrot.lane.b32.xlu1 %v4763_v58, %s9168_s28 }
0x62b5   :  { %v4766_v9 = vpop.permute.xlu1 %4765 }
0x62b6   :  { %v4768_v47 = vadd.f32 %v9053_v60, %v4766_v9 }
0x62b8   :  { %4770 = vrot.lane.b32.xlu0 %v4768_v47, %s9166_s7 }
0x632a   :  { %v4771_v48 = vpop.permute.xlu0 %4770 }
0x632b   :  { %4774 = vst.msk [vmem:[%s10466_s14] sm:$0x3] %vm4773_vm5, %v4771_v48  ;;  %8392 = vmatmul.mubr.msk.f32.vlgmr.msra.gmra.mrb[50].mxu1 %vm4658_vm4, %v4771_v48 }
0x632c   :  { %8402 = vmatpush3.msk.msra.mxu1 %vm4662_vm3, %v9981_v22  ;;  %8403 = vmatprep.mubr.msk.f32.mxu1 %vm9159_vm0, %v9160_v4 }
0x632d   :  { %8413 = vmatprep.subr.mxu1 %v9160_v4 }
0x63fe   :  { %v4913_v8 = vpop.f32.mrb[50].mxu1 }
0x63ff   :  { %v4914_v52 = vadd.f32 %v10008_v51, %v4913_v8  ;;  %v8393_v54 = vpop.f32.mrb[51].mxu1 }
0x6401   :  { %4925 = vrot.lane.b32.xlu1 %v4914_v52, %s9166_s7  ;;  %v4917_v61 = vadd.f32 %v4914_v52, %v4842_v56 }
0x6403   :  { %v7546_v63 = vmul.f32 -1.442695, %v4917_v61 }
0x6405   :  { %9054 = vpow2.f32 %v7546_v63 }
0x640f   :  { %v9055_v1 = vpop.eup %9054 }
0x6410   :  { %v4921_v13 = vadd.f32 1.0, %v9055_v1 }
0x6412   :  { %9056 = vrcp.f32 %v4921_v13 }
0x641c   :  { %v9057_v2 = vpop.eup %9056 }
0x6473   :  { %v4926_v3 = vpop.permute.xlu1 %4925 }
0x6474   :  { %v4928_v39 = vmul.f32 %v9057_v2, %v4926_v3 }
0x6476   :  { %4930 = vrot.lane.b32.xlu0 %v4928_v39, %s9167_s27 }
0x64e8   :  { %v4931_v50 = vpop.permute.xlu0 %4930 }
0x64e9   :  { %v4933_v0 = vadd.f32 %v4931_v50, %v4842_v56 }
0x64eb   :  { %9058 = vtanh.f32 %v4933_v0 }
0x64f5   :  { %v9059_v6 = vpop.eup %9058 }
0x64f6   :  { %v4935_v41 = vsub.f32 %v4768_v47, %v9059_v6  ;;  %v5196_v47 = vadd.f32 %v10121_v38, %v10129_v12 }
0x64f8   :  { %4937 = vrot.lane.b32.xlu1 %v4935_v41, %s9169_s5 }
0x656a   :  { %v4938_v40 = vpop.permute.xlu1 %4937 }
0x656b   :  { %v4940_v30 = vmul.f32 %v9057_v2, %v4938_v40 }
0x656d   :  { %4942 = vrot.lane.b32.xlu0 %v4940_v30, %s9168_s28 }
0x65df   :  { %v4943_v33 = vpop.permute.xlu0 %4942 }
0x65e0   :  { %v4945_v16 = vadd.f32 %v9059_v6, %v4943_v33  ;;  %v5373_v33 = vadd.f32 %v10121_v38, %v10131_v14 }
0x65e2   :  { %4947 = vrot.lane.b32.xlu1 %v4945_v16, %s9166_s7 }
0x6654   :  { %v4948_v32 = vpop.permute.xlu1 %4947 }
0x6655   :  { %7547 = vst.msk [vmem:[%s10466_s14 + $0x2] sm:$0x3] %vm4773_vm5, %v4948_v32  ;;  %8404 = vmatmul.mubr.msk.f32.vlgmr.msra.gmra.mrb[52].mxu1 %vm4658_vm4, %v4948_v32 }
0x6656   :  { %8414 = vmatpush3.msk.msra.mxu1 %vm4662_vm3, %v9981_v22  ;;  %8415 = vmatprep.mubr.msk.f32.mxu1 %vm9159_vm0, %v9160_v4 }
0x6657   :  { %8425 = vmatprep.subr.mxu1 %v9160_v4 }
0x6728   :  { %v5090_v15 = vpop.f32.mrb[52].mxu1 }
0x6729   :  { %v5091_v45 = vadd.f32 %v10008_v51, %v5090_v15  ;;  %v8405_v27 = vpop.f32.mrb[53].mxu1 }
0x672b   :  { %5102 = vrot.lane.b32.xlu0 %v5091_v45, %s9166_s7  ;;  %v5094_v18 = vadd.f32 %v5091_v45, %v5019_v17 }
0x672d   :  { %v7551_v19 = vmul.f32 -1.442695, %v5094_v18 }
0x672f   :  { %9060 = vpow2.f32 %v7551_v19 }
0x6739   :  { %v9061_v20 = vpop.eup %9060 }
0x673a   :  { %v5098_v5 = vadd.f32 1.0, %v9061_v20 }
0x673c   :  { %9062 = vrcp.f32 %v5098_v5 }
0x6746   :  { %v9063_v23 = vpop.eup %9062 }
0x679d   :  { %v5103_v26 = vpop.permute.xlu0 %5102 }
0x679e   :  { %v5105_v28 = vmul.f32 %v9063_v23, %v5103_v26 }
0x67a0   :  { %5107 = vrot.lane.b32.xlu1 %v5105_v28, %s9167_s27 }
0x6812   :  { %v5108_v31 = vpop.permute.xlu1 %5107 }
0x6813   :  { %v5110_v35 = vadd.f32 %v5108_v31, %v5019_v17 }
0x6815   :  { %9064 = vtanh.f32 %v5110_v35 }
0x681f   :  { %v9065_v44 = vpop.eup %9064 }
0x6820   :  { %v5112_v53 = vsub.f32 %v4945_v16, %v9065_v44 }
0x6822   :  { %5114 = vrot.lane.b32.xlu0 %v5112_v53, %s9169_s5 }
0x6894   :  { %v5115_v42 = vpop.permute.xlu0 %5114 }
0x6895   :  { %v5117_v10 = vmul.f32 %v9063_v23, %v5115_v42 }
0x6897   :  { %5119 = vrot.lane.b32.xlu1 %v5117_v10, %s9168_s28  ;;  %v5550_v10 = vadd.f32 %v10121_v38, %v10133_v59 }
0x6909   :  { %v5120_v60 = vpop.permute.xlu1 %5119 }
0x690a   :  { %v5122_v37 = vadd.f32 %v9065_v44, %v5120_v60 }
0x690c   :  { %5124 = vrot.lane.b32.xlu0 %v5122_v37, %s9166_s7 }
0x697e   :  { %v5125_v11 = vpop.permute.xlu0 %5124 }
0x697f   :  { %7552 = vst.msk [vmem:[%s10466_s14 + $0x4] sm:$0x3] %vm4773_vm5, %v5125_v11  ;;  %8416 = vmatmul.mubr.msk.f32.vlgmr.msra.gmra.mrb[54].mxu1 %vm4658_vm4, %v5125_v11 }
0x6980   :  { %8426 = vmatpush3.msk.msra.mxu1 %vm4662_vm3, %v9981_v22  ;;  %8427 = vmatprep.mubr.msk.f32.mxu1 %vm9159_vm0, %v9160_v4 }
0x6981   :  { %8437 = vmatprep.subr.mxu1 %v9160_v4 }
0x6a52   :  { %v5267_v55 = vpop.f32.mrb[54].mxu1 }
0x6a53   :  { %v5268_v58 = vadd.f32 %v10008_v51, %v5267_v55  ;;  %v8417_v9 = vpop.f32.mrb[55].mxu1 }
0x6a55   :  { %5279 = vrot.lane.b32.xlu1 %v5268_v58, %s9166_s7  ;;  %v5271_v48 = vadd.f32 %v5268_v58, %v5196_v47 }
0x6a57   :  { %v7556_v8 = vmul.f32 -1.442695, %v5271_v48 }
0x6a59   :  { %9066 = vpow2.f32 %v7556_v8 }
0x6a63   :  { %v9067_v52 = vpop.eup %9066 }
0x6a64   :  { %v5275_v54 = vadd.f32 1.0, %v9067_v52 }
0x6a66   :  { %9068 = vrcp.f32 %v5275_v54 }
0x6a70   :  { %v9069_v56 = vpop.eup %9068 }
0x6ac7   :  { %v5280_v61 = vpop.permute.xlu1 %5279 }
0x6ac8   :  { %v5282_v63 = vmul.f32 %v9069_v56, %v5280_v61 }
0x6aca   :  { %5284 = vrot.lane.b32.xlu0 %v5282_v63, %s9167_s27 }
0x6b3c   :  { %v5285_v1 = vpop.permute.xlu0 %5284 }
0x6b3d   :  { %v5287_v13 = vadd.f32 %v5285_v1, %v5196_v47 }
0x6b3f   :  { %9070 = vtanh.f32 %v5287_v13 }
0x6b49   :  { %v9071_v2 = vpop.eup %9070 }
0x6b4a   :  { %v5289_v3 = vsub.f32 %v5122_v37, %v9071_v2 }
0x6b4c   :  { %5291 = vrot.lane.b32.xlu1 %v5289_v3, %s9169_s5 }
0x6bbe   :  { %v5292_v39 = vpop.permute.xlu1 %5291 }
0x6bbf   :  { %v5294_v12 = vmul.f32 %v9069_v56, %v5292_v39  ;;  %v5727_v39 = vadd.f32 %v10121_v38, %v10135_v34 }
0x6bc1   :  { %5296 = vrot.lane.b32.xlu0 %v5294_v12, %s9168_s28 }
0x6c33   :  { %v5297_v50 = vpop.permute.xlu0 %5296 }
0x6c34   :  { %v5299_v0 = vadd.f32 %v9071_v2, %v5297_v50 }
0x6c36   :  { %5301 = vrot.lane.b32.xlu1 %v5299_v0, %s9166_s7 }
0x6ca8   :  { %v5302_v6 = vpop.permute.xlu1 %5301 }
0x6ca9   :  { %7557 = vst.msk [vmem:[%s10466_s14 + $0x6] sm:$0x3] %vm4773_vm5, %v5302_v6  ;;  %8428 = vmatmul.mubr.msk.f32.vlgmr.msra.gmra.mrb[56].mxu1 %vm4658_vm4, %v5302_v6 }
0x6caa   :  { %8438 = vmatpush3.msk.msra.mxu1 %vm4662_vm3, %v9981_v22  ;;  %8439 = vmatprep.mubr.msk.f32.mxu1 %vm9159_vm0, %v9160_v4 }
0x6cab   :  { %8449 = vmatprep.subr.mxu1 %v9160_v4 }
0x6d7c   :  { %v5444_v41 = vpop.f32.mrb[56].mxu1 }
0x6d7d   :  { %v5445_v40 = vadd.f32 %v10008_v51, %v5444_v41  ;;  %v8429_v30 = vpop.f32.mrb[57].mxu1 }
0x6d7f   :  { %5456 = vrot.lane.b32.xlu0 %v5445_v40, %s9166_s7  ;;  %v5448_v16 = vadd.f32 %v5445_v40, %v5373_v33 }
0x6d81   :  { %v7561_v32 = vmul.f32 -1.442695, %v5448_v16 }
0x6d83   :  { %9072 = vpow2.f32 %v7561_v32 }
0x6d8d   :  { %v9073_v15 = vpop.eup %9072 }
0x6d8e   :  { %v5452_v45 = vadd.f32 1.0, %v9073_v15 }
0x6d90   :  { %9074 = vrcp.f32 %v5452_v45 }
0x6d9a   :  { %v9075_v27 = vpop.eup %9074 }
0x6df1   :  { %v5457_v17 = vpop.permute.xlu0 %5456 }
0x6df2   :  { %v5459_v18 = vmul.f32 %v9075_v27, %v5457_v17 }
0x6df4   :  { %5461 = vrot.lane.b32.xlu1 %v5459_v18, %s9167_s27 }
0x6e66   :  { %v5462_v19 = vpop.permute.xlu1 %5461 }
0x6e67   :  { %v5464_v20 = vadd.f32 %v5462_v19, %v5373_v33 }
0x6e69   :  { %9076 = vtanh.f32 %v5464_v20 }
0x6e73   :  { %v9077_v5 = vpop.eup %9076 }
0x6e74   :  { %v5466_v23 = vsub.f32 %v5299_v0, %v9077_v5 }
0x6e76   :  { %5468 = vrot.lane.b32.xlu0 %v5466_v23, %s9169_s5  ;;  %v5904_v23 = vadd.f32 %v10121_v38, %v10137_v62 }
0x6ee8   :  { %v5469_v26 = vpop.permute.xlu0 %5468 }
0x6ee9   :  { %v5471_v14 = vmul.f32 %v9075_v27, %v5469_v26 }
0x6eeb   :  { %5473 = vrot.lane.b32.xlu1 %v5471_v14, %s9168_s28 }
0x6f5d   :  { %v5474_v28 = vpop.permute.xlu1 %5473 }
0x6f5e   :  { %v5476_v31 = vadd.f32 %v9077_v5, %v5474_v28 }
0x6f60   :  { %5478 = vrot.lane.b32.xlu0 %v5476_v31, %s9166_s7 }
0x6fd2   :  { %v5479_v35 = vpop.permute.xlu0 %5478 }
0x6fd3   :  { %7562 = vst.msk [vmem:[%s10466_s14 + $0x8] sm:$0x3] %vm4773_vm5, %v5479_v35  ;;  %8440 = vmatmul.mubr.msk.f32.vlgmr.msra.gmra.mrb[58].mxu1 %vm4658_vm4, %v5479_v35 }
0x6fd4   :  { %8450 = vmatpush3.msk.msra.mxu1 %vm4662_vm3, %v9981_v22  ;;  %8451 = vmatprep.mubr.msk.f32.mxu1 %vm9159_vm0, %v9160_v4 }
0x6fd5   :  { %8461 = vmatprep.subr.mxu1 %v9160_v4 }
0x70a6   :  { %v5621_v44 = vpop.f32.mrb[58].mxu1 }
0x70a7   :  { %v5622_v53 = vadd.f32 %v10008_v51, %v5621_v44  ;;  %v8441_v42 = vpop.f32.mrb[59].mxu1 }
0x70a9   :  { %5633 = vrot.lane.b32.xlu1 %v5622_v53, %s9166_s7  ;;  %v5625_v60 = vadd.f32 %v5622_v53, %v5550_v10 }
0x70ab   :  { %v7566_v37 = vmul.f32 -1.442695, %v5625_v60 }
0x70ad   :  { %9078 = vpow2.f32 %v7566_v37 }
0x70b7   :  { %v9079_v11 = vpop.eup %9078 }
0x70b8   :  { %v5629_v55 = vadd.f32 1.0, %v9079_v11 }
0x70ba   :  { %9080 = vrcp.f32 %v5629_v55 }
0x70c4   :  { %v9081_v58 = vpop.eup %9080 }
0x711b   :  { %v5634_v9 = vpop.permute.xlu1 %5633 }
0x711c   :  { %v5636_v47 = vmul.f32 %v9081_v58, %v5634_v9 }
0x711e   :  { %5638 = vrot.lane.b32.xlu0 %v5636_v47, %s9167_s27 }
0x7190   :  { %v5639_v48 = vpop.permute.xlu0 %5638 }
0x7191   :  { %v5641_v8 = vadd.f32 %v5639_v48, %v5550_v10 }
0x7193   :  { %9082 = vtanh.f32 %v5641_v8 }
0x719d   :  { %v9083_v52 = vpop.eup %9082 }
0x719e   :  { %v5643_v54 = vsub.f32 %v5476_v31, %v9083_v52 }
0x71a0   :  { %5645 = vrot.lane.b32.xlu1 %v5643_v54, %s9169_s5 }
0x7212   :  { %v5646_v56 = vpop.permute.xlu1 %5645 }
0x7213   :  { %v5648_v59 = vmul.f32 %v9081_v58, %v5646_v56 }
0x7215   :  { %5650 = vrot.lane.b32.xlu0 %v5648_v59, %s9168_s28 }
0x7287   :  { %v5651_v61 = vpop.permute.xlu0 %5650 }
0x7288   :  { %v5653_v63 = vadd.f32 %v9083_v52, %v5651_v61  ;;  %v6081_v52 = vadd.f32 %v10121_v38, %v10139_v21 }
0x728a   :  { %5655 = vrot.lane.b32.xlu1 %v5653_v63, %s9166_s7 }
0x72fc   :  { %v5656_v1 = vpop.permute.xlu1 %5655 }
0x72fd   :  { %7567 = vst.msk [vmem:[%s10466_s14 + $0xa] sm:$0x3] %vm4773_vm5, %v5656_v1  ;;  %8452 = vmatmul.mubr.msk.f32.vlgmr.msra.gmra.mrb[60].mxu1 %vm4658_vm4, %v5656_v1 }
0x72fe   :  { %8462 = vmatpush3.msk.msra.mxu1 %vm4662_vm3, %v9981_v22  ;;  %8463 = vmatprep.mubr.msk.f32.mxu1 %vm9159_vm0, %v9160_v4 }
0x72ff   :  { %8473 = vmatprep.subr.mxu1 %v9160_v4 }
0x73d0   :  { %v5798_v13 = vpop.f32.mrb[60].mxu1 }
0x73d1   :  { %v5799_v2 = vadd.f32 %v10008_v51, %v5798_v13  ;;  %v8453_v3 = vpop.f32.mrb[61].mxu1 }
0x73d3   :  { %5810 = vrot.lane.b32.xlu0 %v5799_v2, %s9166_s7  ;;  %v5802_v12 = vadd.f32 %v5799_v2, %v5727_v39 }
0x73d5   :  { %v7571_v50 = vmul.f32 -1.442695, %v5802_v12 }
0x73d7   :  { %9084 = vpow2.f32 %v7571_v50 }
0x73e1   :  { %v9085_v0 = vpop.eup %9084 }
0x73e2   :  { %v5806_v6 = vadd.f32 1.0, %v9085_v0 }
0x73e4   :  { %9086 = vrcp.f32 %v5806_v6 }
0x73ee   :  { %v9087_v41 = vpop.eup %9086 }
0x7445   :  { %v5811_v40 = vpop.permute.xlu0 %5810 }
0x7446   :  { %v5813_v30 = vmul.f32 %v9087_v41, %v5811_v40 }
0x7448   :  { %5815 = vrot.lane.b32.xlu1 %v5813_v30, %s9167_s27 }
0x74ba   :  { %v5816_v33 = vpop.permute.xlu1 %5815 }
0x74bb   :  { %v5818_v16 = vadd.f32 %v5816_v33, %v5727_v39 }
0x74bd   :  { %9088 = vtanh.f32 %v5818_v16  ;;  %v6258_v16 = vadd.f32 %v10121_v38, %v10142_v24 }
0x74c7   :  { %v9089_v32 = vpop.eup %9088 }
0x74c8   :  { %v5820_v15 = vsub.f32 %v5653_v63, %v9089_v32 }
0x74ca   :  { %5822 = vrot.lane.b32.xlu0 %v5820_v15, %s9169_s5 }
0x753c   :  { %v5823_v45 = vpop.permute.xlu0 %5822 }
0x753d   :  { %v5825_v34 = vmul.f32 %v9087_v41, %v5823_v45 }
0x753f   :  { %5827 = vrot.lane.b32.xlu1 %v5825_v34, %s9168_s28 }
0x75b1   :  { %v5828_v27 = vpop.permute.xlu1 %5827 }
0x75b2   :  { %v5830_v17 = vadd.f32 %v9089_v32, %v5828_v27 }
0x75b4   :  { %5832 = vrot.lane.b32.xlu0 %v5830_v17, %s9166_s7 }
0x7626   :  { %v5833_v18 = vpop.permute.xlu0 %5832 }
0x7627   :  { %7572 = vst.msk [vmem:[%s10466_s14 + $0xc] sm:$0x3] %vm4773_vm5, %v5833_v18  ;;  %8464 = vmatmul.mubr.msk.f32.vlgmr.msra.gmra.mrb[62].mxu1 %vm4658_vm4, %v5833_v18 }
0x7628   :  { %8474 = vmatpush3.msk.msra.mxu1 %vm4662_vm3, %v9981_v22  ;;  %8475 = vmatprep.mubr.msk.f32.mxu1 %vm9159_vm0, %v9160_v4 }
0x7629   :  { %8485 = vmatprep.subr.mxu1 %v9160_v4 }
0x76fa   :  { %v5975_v19 = vpop.f32.mrb[62].mxu1 }
0x76fb   :  { %v5976_v20 = vadd.f32 %v10008_v51, %v5975_v19  ;;  %v8465_v5 = vpop.f32.mrb[63].mxu1 }
0x76fd   :  { %5987 = vrot.lane.b32.xlu1 %v5976_v20, %s9166_s7  ;;  %v5979_v26 = vadd.f32 %v5976_v20, %v5904_v23 }
0x76ff   :  { %v7576_v14 = vmul.f32 -1.442695, %v5979_v26 }
0x7701   :  { %9090 = vpow2.f32 %v7576_v14 }
0x770b   :  { %v9091_v28 = vpop.eup %9090 }
0x770c   :  { %v5983_v31 = vadd.f32 1.0, %v9091_v28 }
0x770e   :  { %9092 = vrcp.f32 %v5983_v31 }
0x7718   :  { %v9093_v35 = vpop.eup %9092 }
0x776f   :  { %v5988_v44 = vpop.permute.xlu1 %5987 }
0x7770   :  { %v5990_v53 = vmul.f32 %v9093_v35, %v5988_v44 }
0x7772   :  { %5992 = vrot.lane.b32.xlu0 %v5990_v53, %s9167_s27 }
0x77e4   :  { %v5993_v42 = vpop.permute.xlu0 %5992 }
0x77e5   :  { %v5995_v10 = vadd.f32 %v5993_v42, %v5904_v23  ;;  %v6435_v42 = vadd.f32 %v10121_v38, %v10144_v25 }
0x77e7   :  { %9094 = vtanh.f32 %v5995_v10 }
0x77f1   :  { %v9095_v60 = vpop.eup %9094 }
0x77f2   :  { %v5997_v37 = vsub.f32 %v5830_v17, %v9095_v60 }
0x77f4   :  { %5999 = vrot.lane.b32.xlu1 %v5997_v37, %s9169_s5 }
0x7866   :  { %v6000_v11 = vpop.permute.xlu1 %5999 }
0x7867   :  { %v6002_v62 = vmul.f32 %v9093_v35, %v6000_v11 }
0x7869   :  { %6004 = vrot.lane.b32.xlu0 %v6002_v62, %s9168_s28 }
0x78db   :  { %v6005_v55 = vpop.permute.xlu0 %6004 }
0x78dc   :  { %v6007_v58 = vadd.f32 %v9095_v60, %v6005_v55 }
0x78de   :  { %6009 = vrot.lane.b32.xlu1 %v6007_v58, %s9166_s7 }
0x7950   :  { %v6010_v9 = vpop.permute.xlu1 %6009 }
0x7951   :  { %7577 = vst.msk [vmem:[%s10466_s14 + $0xe] sm:$0x3] %vm4773_vm5, %v6010_v9  ;;  %8476 = vmatmul.mubr.msk.f32.vlgmr.msra.gmra.mrb[64].mxu1 %vm4658_vm4, %v6010_v9 }
0x7952   :  { %8486 = vmatpush3.msk.msra.mxu1 %vm4662_vm3, %v9981_v22  ;;  %8487 = vmatprep.mubr.msk.f32.mxu1 %vm9159_vm0, %v9160_v4 }
0x7953   :  { %8497 = vmatprep.subr.mxu1 %v9160_v4 }
0x7a24   :  { %v6152_v47 = vpop.f32.mrb[64].mxu1 }
0x7a25   :  { %v6153_v48 = vadd.f32 %v10008_v51, %v6152_v47  ;;  %v8477_v8 = vpop.f32.mrb[65].mxu1 }
0x7a27   :  { %6164 = vrot.lane.b32.xlu0 %v6153_v48, %s9166_s7  ;;  %v6156_v54 = vadd.f32 %v6153_v48, %v6081_v52 }
0x7a29   :  { %v7581_v56 = vmul.f32 -1.442695, %v6156_v54 }
0x7a2b   :  { %9096 = vpow2.f32 %v7581_v56 }
0x7a35   :  { %v9097_v59 = vpop.eup %9096 }
0x7a36   :  { %v6160_v61 = vadd.f32 1.0, %v9097_v59 }
0x7a38   :  { %9098 = vrcp.f32 %v6160_v61 }
0x7a42   :  { %v9099_v63 = vpop.eup %9098 }
0x7a99   :  { %v6165_v1 = vpop.permute.xlu0 %6164 }
0x7a9a   :  { %v6167_v13 = vmul.f32 %v9099_v63, %v6165_v1 }
0x7a9c   :  { %6169 = vrot.lane.b32.xlu1 %v6167_v13, %s9167_s27  ;;  %v6612_v13 = vadd.f32 %v10121_v38, %v10146_v7 }
0x7b0e   :  { %v6170_v2 = vpop.permute.xlu1 %6169 }
0x7b0f   :  { %v6172_v3 = vadd.f32 %v6170_v2, %v6081_v52 }
0x7b11   :  { %9100 = vtanh.f32 %v6172_v3 }
0x7b1b   :  { %v9101_v39 = vpop.eup %9100 }
0x7b1c   :  { %v6174_v12 = vsub.f32 %v6007_v58, %v9101_v39 }
0x7b1e   :  { %6176 = vrot.lane.b32.xlu0 %v6174_v12, %s9169_s5 }
0x7b90   :  { %v6177_v50 = vpop.permute.xlu0 %6176 }
0x7b91   :  { %v6179_v21 = vmul.f32 %v9099_v63, %v6177_v50 }
0x7b93   :  { %6181 = vrot.lane.b32.xlu1 %v6179_v21, %s9168_s28 }
0x7c05   :  { %v6182_v0 = vpop.permute.xlu1 %6181 }
0x7c06   :  { %v6184_v6 = vadd.f32 %v9101_v39, %v6182_v0 }
0x7c08   :  { %6186 = vrot.lane.b32.xlu0 %v6184_v6, %s9166_s7 }
0x7c7a   :  { %v6187_v41 = vpop.permute.xlu0 %6186 }
0x7c7b   :  { %7582 = vst.msk [vmem:[%s10466_s14 + $0x10] sm:$0x3] %vm4773_vm5, %v6187_v41  ;;  %8488 = vmatmul.mubr.msk.f32.vlgmr.msra.gmra.mrb[66].mxu1 %vm4658_vm4, %v6187_v41 }
0x7c7c   :  { %8498 = vmatpush3.msk.msra.mxu1 %vm4662_vm3, %v9981_v22  ;;  %8499 = vmatprep.mubr.msk.f32.mxu1 %vm9159_vm0, %v9160_v4 }
0x7c7d   :  { %8509 = vmatprep.subr.mxu1 %v9160_v4 }
0x7d4e   :  { %v6329_v40 = vpop.f32.mrb[66].mxu1 }
0x7d4f   :  { %v6330_v30 = vadd.f32 %v10008_v51, %v6329_v40  ;;  %v8489_v33 = vpop.f32.mrb[67].mxu1 }
0x7d51   :  { %6341 = vrot.lane.b32.xlu1 %v6330_v30, %s9166_s7  ;;  %v6333_v32 = vadd.f32 %v6330_v30, %v6258_v16 }
0x7d53   :  { %v7586_v15 = vmul.f32 -1.442695, %v6333_v32 }
0x7d55   :  { %9102 = vpow2.f32 %v7586_v15  ;;  %v10365_v15 = vld [vmem:[%s10461_s12] sm:$0x3] }
0x7d5f   :  { %v9103_v45 = vpop.eup %9102 }
0x7d60   :  { %v6337_v34 = vadd.f32 1.0, %v9103_v45 }
0x7d62   :  { %9104 = vrcp.f32 %v6337_v34 }
0x7d6c   :  { %v9105_v27 = vpop.eup %9104 }
0x7dc3   :  { %v6342_v17 = vpop.permute.xlu1 %6341 }
0x7dc4   :  { %v6344_v18 = vmul.f32 %v9105_v27, %v6342_v17  ;;  %v6789_v17 = vadd.f32 %v10121_v38, %v10148_v29 }
0x7dc6   :  { %6346 = vrot.lane.b32.xlu0 %v6344_v18, %s9167_s27 }
0x7e38   :  { %v6347_v19 = vpop.permute.xlu0 %6346 }
0x7e39   :  { %v6349_v20 = vadd.f32 %v6347_v19, %v6258_v16 }
0x7e3b   :  { %9106 = vtanh.f32 %v6349_v20 }
0x7e45   :  { %v9107_v5 = vpop.eup %9106 }
0x7e46   :  { %v6351_v23 = vsub.f32 %v6184_v6, %v9107_v5 }
0x7e48   :  { %6353 = vrot.lane.b32.xlu1 %v6351_v23, %s9169_s5 }
0x7eba   :  { %v6354_v26 = vpop.permute.xlu1 %6353 }
0x7ebb   :  { %v6356_v24 = vmul.f32 %v9105_v27, %v6354_v26 }
0x7ebd   :  { %6358 = vrot.lane.b32.xlu0 %v6356_v24, %s9168_s28 }
0x7f2f   :  { %v6359_v14 = vpop.permute.xlu0 %6358 }
0x7f30   :  { %v6361_v28 = vadd.f32 %v9107_v5, %v6359_v14 }
0x7f32   :  { %6363 = vrot.lane.b32.xlu1 %v6361_v28, %s9166_s7 }
0x7fa4   :  { %v6364_v31 = vpop.permute.xlu1 %6363 }
0x7fa5   :  { %7587 = vst.msk [vmem:[%s10466_s14 + $0x12] sm:$0x3] %vm4773_vm5, %v6364_v31  ;;  %8500 = vmatmul.mubr.msk.f32.vlgmr.msra.gmra.mrb[68].mxu1 %vm4658_vm4, %v6364_v31 }
0x7fa6   :  { %8510 = vmatpush3.msk.msra.mxu1 %vm4662_vm3, %v9981_v22  ;;  %8511 = vmatprep.mubr.msk.f32.mxu1 %vm9159_vm0, %v9160_v4 }
0x7fa7   :  { %8521 = vmatprep.subr.mxu1 %v9160_v4 }
0x8078   :  { %v6506_v35 = vpop.f32.mrb[68].mxu1 }
0x8079   :  { %v6507_v44 = vadd.f32 %v10008_v51, %v6506_v35  ;;  %v8501_v53 = vpop.f32.mrb[69].mxu1 }
0x807b   :  { %6518 = vrot.lane.b32.xlu0 %v6507_v44, %s9166_s7  ;;  %v6510_v10 = vadd.f32 %v6507_v44, %v6435_v42 }
0x807d   :  { %v7591_v60 = vmul.f32 -1.442695, %v6510_v10 }
0x807f   :  { %9108 = vpow2.f32 %v7591_v60  ;;  %v10393_v60 = vld [vmem:[%s10463_s13] ss:$0 sm:$0xff] }
0x8089   :  { %v9109_v37 = vpop.eup %9108 }
0x808a   :  { %v6514_v11 = vadd.f32 1.0, %v9109_v37 }
0x808c   :  { %9110 = vrcp.f32 %v6514_v11 }
0x8096   :  { %v9111_v62 = vpop.eup %9110 }
0x80ed   :  { %v6519_v55 = vpop.permute.xlu0 %6518 }
0x80ee   :  { %v6521_v58 = vmul.f32 %v9111_v62, %v6519_v55 }
0x80f0   :  { %6523 = vrot.lane.b32.xlu1 %v6521_v58, %s9167_s27 }
0x8162   :  { %v6524_v9 = vpop.permute.xlu1 %6523 }
0x8163   :  { %v6526_v47 = vadd.f32 %v6524_v9, %v6435_v42 }
0x8165   :  { %9112 = vtanh.f32 %v6526_v47 }
0x816f   :  { %v9113_v48 = vpop.eup %9112 }
0x8170   :  { %v6528_v8 = vsub.f32 %v6361_v28, %v9113_v48 }
0x8172   :  { %6530 = vrot.lane.b32.xlu0 %v6528_v8, %s9169_s5 }
0x81e4   :  { %v6531_v52 = vpop.permute.xlu0 %6530 }
0x81e5   :  { %v6533_v25 = vmul.f32 %v9111_v62, %v6531_v52  ;;  %v6966_v62 = vadd.f32 %v10121_v38, %v10150_v57 }
0x81e7   :  { %6535 = vrot.lane.b32.xlu1 %v6533_v25, %s9168_s28 }
0x8259   :  { %v6536_v54 = vpop.permute.xlu1 %6535 }
0x825a   :  { %v6538_v56 = vadd.f32 %v9113_v48, %v6536_v54 }
0x825c   :  { %6540 = vrot.lane.b32.xlu0 %v6538_v56, %s9166_s7 }
0x82ce   :  { %v6541_v59 = vpop.permute.xlu0 %6540 }
0x82cf   :  { %7592 = vst.msk [vmem:[%s10466_s14 + $0x14] sm:$0x3] %vm4773_vm5, %v6541_v59  ;;  %8512 = vmatmul.mubr.msk.f32.vlgmr.msra.gmra.mrb[70].mxu1 %vm4658_vm4, %v6541_v59 }
0x82d0   :  { %8522 = vmatpush3.msk.msra.mxu1 %vm4662_vm3, %v9981_v22  ;;  %8523 = vmatprep.mubr.msk.f32.mxu1 %vm9159_vm0, %v9160_v4 }
0x82d1   :  { %8533 = vmatprep.subr.mxu1 %v9160_v4 }
0x83a2   :  { %v6683_v61 = vpop.f32.mrb[70].mxu1 }
0x83a3   :  { %v6684_v63 = vadd.f32 %v10008_v51, %v6683_v61  ;;  %v8513_v1 = vpop.f32.mrb[71].mxu1 }
0x83a4   :  { %v9155_v1 = vld [vmem:[%s10459_s8] ss:$0 sm:$0xff] }
0x83a5   :  { %6695 = vrot.lane.b32.xlu1 %v6684_v63, %s9166_s7  ;;  %v6687_v2 = vadd.f32 %v6684_v63, %v6612_v13 }
0x83a7   :  { %v7596_v3 = vmul.f32 -1.442695, %v6687_v2  ;;  %v9156_v2 = vld [vmem:[%s10460_s6] ss:$0 sm:$0xff] }
0x83a9   :  { %9114 = vpow2.f32 %v7596_v3  ;;  %v4463_v3 = vadd.f32 %v9156_v2, %v9999_v46 }
0x83b3   :  { %v9115_v39 = vpop.eup %9114 }
0x83b4   :  { %v6691_v12 = vadd.f32 1.0, %v9115_v39 }
0x83b6   :  { %9116 = vrcp.f32 %v6691_v12 }
0x83c0   :  { %v9117_v22 = vpop.eup %9116 }
0x8417   :  { %v6696_v50 = vpop.permute.xlu1 %6695 }
0x8418   :  { %v6698_v21 = vmul.f32 %v9117_v22, %v6696_v50 }
0x841a   :  { %6700 = vrot.lane.b32.xlu0 %v6698_v21, %s9167_s27 }
0x848c   :  { %v6701_v0 = vpop.permute.xlu0 %6700 }
0x848d   :  { %v6703_v6 = vadd.f32 %v6701_v0, %v6612_v13  ;;  %v4538_v13 = vadd.f32 %v9155_v1, %v10116_v36 }
0x848f   :  { %9118 = vtanh.f32 %v6703_v6  ;;  %v4541_v39 = vadd.f32 %v4538_v13, %v4463_v3 }
0x8491   :  { %v7536_v12 = vmul.f32 -1.442695, %v4541_v39 }
0x8499   :  { %v9119_v41 = vpop.eup %9118 }
0x849a   :  { %v6705_v40 = vsub.f32 %v6538_v56, %v9119_v41 }
0x849c   :  { %6707 = vrot.lane.b32.xlu1 %v6705_v40, %s9169_s5 }
0x850e   :  { %v6708_v30 = vpop.permute.xlu1 %6707 }
0x850f   :  { %v6710_v7 = vmul.f32 %v9117_v22, %v6708_v30 }
0x8511   :  { %6712 = vrot.lane.b32.xlu0 %v6710_v7, %s9168_s28 }
0x8583   :  { %v6713_v33 = vpop.permute.xlu0 %6712 }
0x8584   :  { %v6715_v16 = vadd.f32 %v9119_v41, %v6713_v33 }
0x8586   :  { %6717 = vrot.lane.b32.xlu1 %v6715_v16, %s9166_s7 }
0x85f8   :  { %v6718_v32 = vpop.permute.xlu1 %6717 }
0x85f9   :  { %7597 = vst.msk [vmem:[%s10466_s14 + $0x16] sm:$0x3] %vm4773_vm5, %v6718_v32  ;;  %8524 = vmatmul.mubr.msk.f32.vlgmr.msra.gmra.mrb[72].mxu1 %vm4658_vm4, %v6718_v32 }
0x85fa   :  { %8534 = vmatpush3.msk.msra.mxu1 %vm4662_vm3, %v10365_v15  ;;  %8535 = vmatprep.mubr.msk.f32.mxu1 %vm9159_vm0, %v9160_v4 }
0x85fb   :  { %8545 = vmatprep.subr.mxu1 %v9160_v4 }
0x86cc   :  { %v6860_v45 = vpop.f32.mrb[72].mxu1 }
0x86cd   :  { %v6861_v34 = vadd.f32 %v10008_v51, %v6860_v45  ;;  %v8525_v27 = vpop.f32.mrb[73].mxu1 }
0x86cf   :  { %6872 = vrot.lane.b32.xlu0 %v6861_v34, %s9166_s7  ;;  %v6864_v18 = vadd.f32 %v6861_v34, %v6789_v17 }
0x86d1   :  { %v7601_v19 = vmul.f32 -1.442695, %v6864_v18 }
0x86d3   :  { %9120 = vpow2.f32 %v7601_v19 }
0x86dd   :  { %v9121_v20 = vpop.eup %9120 }
0x86de   :  { %v6868_v5 = vadd.f32 1.0, %v9121_v20 }
0x86e0   :  { %9122 = vrcp.f32 %v6868_v5 }
0x86ea   :  { %v9123_v23 = vpop.eup %9122 }
0x8741   :  { %v6873_v26 = vpop.permute.xlu0 %6872 }
0x8742   :  { %v6875_v24 = vmul.f32 %v9123_v23, %v6873_v26 }
0x8744   :  { %6877 = vrot.lane.b32.xlu1 %v6875_v24, %s9167_s27 }
0x87b6   :  { %v6878_v14 = vpop.permute.xlu1 %6877 }
0x87b7   :  { %v6880_v28 = vadd.f32 %v6878_v14, %v6789_v17 }
0x87b9   :  { %9124 = vtanh.f32 %v6880_v28 }
0x87c3   :  { %v9125_v51 = vpop.eup %9124 }
0x87c4   :  { %v6882_v31 = vsub.f32 %v6715_v16, %v9125_v51 }
0x87c6   :  { %6884 = vrot.lane.b32.xlu0 %v6882_v31, %s9169_s5 }
0x8838   :  { %v6885_v35 = vpop.permute.xlu0 %6884 }
0x8839   :  { %v6887_v29 = vmul.f32 %v9123_v23, %v6885_v35 }
0x883b   :  { %6889 = vrot.lane.b32.xlu1 %v6887_v29, %s9168_s28 }
0x88ad   :  { %v6890_v44 = vpop.permute.xlu1 %6889 }
0x88ae   :  { %v6892_v53 = vadd.f32 %v9125_v51, %v6890_v44 }
0x88b0   :  { %6894 = vrot.lane.b32.xlu0 %v6892_v53, %s9166_s7 }
0x8922   :  { %v6895_v42 = vpop.permute.xlu0 %6894 }
0x8923   :  { %7602 = vst.msk [vmem:[%s10466_s14 + $0x18] sm:$0x3] %vm4773_vm5, %v6895_v42  ;;  %8536 = vmatmul.mubr.msk.f32.vlgmr.msra.gmra.mrb[74].mxu1 %vm4658_vm4, %v6895_v42 }
0x8924   :  { %8546 = vmatpush3.msk.msra.mxu1 %vm4662_vm3, %v10365_v15  ;;  %8547 = vmatprep.mubr.msk.f32.mxu1 %vm9159_vm0, %v9160_v4 }
0x8925   :  { %8557 = vmatprep.subr.mxu1 %v9160_v4 }
0x89f6   :  { %v7037_v10 = vpop.f32.mrb[74].mxu1 }
0x89f7   :  { %v7038_v37 = vadd.f32 %v10393_v60, %v7037_v10  ;;  %v8537_v11 = vpop.f32.mrb[75].mxu1 }
0x89f9   :  { %7049 = vrot.lane.b32.xlu1 %v7038_v37, %s9166_s7  ;;  %v7041_v55 = vadd.f32 %v7038_v37, %v6966_v62 }
0x89fb   :  { %v7606_v58 = vmul.f32 -1.442695, %v7041_v55 }
0x89fd   :  { %9126 = vpow2.f32 %v7606_v58 }
0x8a07   :  { %v9127_v9 = vpop.eup %9126 }
0x8a08   :  { %v7045_v47 = vadd.f32 1.0, %v9127_v9 }
0x8a0a   :  { %9128 = vrcp.f32 %v7045_v47 }
0x8a14   :  { %v9129_v48 = vpop.eup %9128 }
0x8a6b   :  { %v7050_v8 = vpop.permute.xlu1 %7049 }
0x8a6c   :  { %v7052_v52 = vmul.f32 %v9129_v48, %v7050_v8 }
0x8a6e   :  { %7054 = vrot.lane.b32.xlu0 %v7052_v52, %s9167_s27 }
0x8ae0   :  { %v7055_v25 = vpop.permute.xlu0 %7054 }
0x8ae1   :  { %v7057_v54 = vadd.f32 %v7055_v25, %v6966_v62 }
0x8ae3   :  { %9130 = vtanh.f32 %v7057_v54 }
0x8ae4   :  { %9132 = vpow2.f32 %v7536_v12 }
0x8aed   :  { %v9131_v56 = vpop.eup %9130 }
0x8aee   :  { %v7059_v59 = vsub.f32 %v6892_v53, %v9131_v56  ;;  %v9133_v22 = vpop.eup %9132 }
0x8aef   :  { %v4545_v50 = vadd.f32 1.0, %v9133_v22 }
0x8af0   :  { %7061 = vrot.lane.b32.xlu1 %v7059_v59, %s9169_s5 }
0x8af1   :  { %9134 = vrcp.f32 %v4545_v50 }
0x8afb   :  { %v9135_v46 = vpop.eup %9134 }
0x8b62   :  { %v7062_v61 = vpop.permute.xlu1 %7061 }
0x8b63   :  { %v7064_v38 = vmul.f32 %v9129_v48, %v7062_v61 }
0x8b65   :  { %7066 = vrot.lane.b32.xlu0 %v7064_v38, %s9168_s28 }
0x8bd7   :  { %v7067_v57 = vpop.permute.xlu0 %7066 }
0x8bd8   :  { %v7069_v63 = vadd.f32 %v9131_v56, %v7067_v57 }
0x8bda   :  { %7071 = vrot.lane.b32.xlu1 %v7069_v63, %s9166_s7 }
0x8bde   :  { %4549 = vrot.lane.b32.xlu1 %v4538_v13, %s9163_s29 }
0x8c4c   :  { %v7072_v21 = vpop.permute.xlu1 %7071 }
0x8c4d   :  { %7607 = vst.msk [vmem:[%s10466_s14 + $0x1a] sm:$0x3] %vm4773_vm5, %v7072_v21  ;;  %8548 = vmatmul.mubr.msk.f32.vlgmr.msra.gmra.mrb[76].mxu1 %vm4658_vm4, %v7072_v21 }
0x8c4e   :  { %8558 = vmatpush3.msk.msra.mxu1 %vm4662_vm3, %v10365_v15  ;;  %8559 = vmatprep.mubr.msk.f32.mxu1 %vm9159_vm0, %v9160_v4  ;;  %v9157_v15 = vld [vmem:[%s10465_s11] ss:$0 sm:$0xff] }
0x8c4f   :  { %v7143_v45 = vadd.f32 %v9157_v15, %v10152_v43 }
0x8c50   :  { %v4550_v36 = vpop.permute.xlu1 %4549 }
0x8c51   :  { %v4552_v0 = vmul.f32 %v9135_v46, %v4550_v36 }
0x8c53   :  { %4554 = vrot.lane.b32.xlu1 %v4552_v0, %s9162_s26 }
0x8cc5   :  { %v4555_v6 = vpop.permute.xlu1 %4554 }
0x8cc6   :  { %v4557_v41 = vadd.f32 %v4555_v6, %v4463_v3 }
0x8cc8   :  { %9136 = vtanh.f32 %v4557_v41 }
0x8cd2   :  { %v9137_v40 = vpop.eup %9136 }
0x8cd3   :  { %v4559_v30 = vsub.f32 %v10001_v49, %v9137_v40 }
0x8cd5   :  { %4561 = vrot.lane.b32.xlu1 %v4559_v30, %s9165_s25 }
0x8d20   :  { %v7214_v7 = vpop.f32.mrb[76].mxu1 }
0x8d21   :  { %v7215_v33 = vadd.f32 %v10393_v60, %v7214_v7  ;;  %v8549_v16 = vpop.f32.mrb[77].mxu1 }
0x8d23   :  { %7226 = vrot.lane.b32.xlu0 %v7215_v33, %s9166_s7  ;;  %v7218_v34 = vadd.f32 %v7215_v33, %v7143_v45 }
0x8d25   :  { %v7611_v49 = vmul.f32 -1.442695, %v7218_v34 }
0x8d27   :  { %9138 = vpow2.f32 %v7611_v49 }
0x8d31   :  { %v9139_v27 = vpop.eup %9138 }
0x8d32   :  { %v7222_v17 = vadd.f32 1.0, %v9139_v27 }
0x8d34   :  { %9140 = vrcp.f32 %v7222_v17 }
0x8d3e   :  { %v9141_v18 = vpop.eup %9140 }
0x8d47   :  { %v4562_v4 = vpop.permute.xlu1 %4561 }
0x8d48   :  { %v4564_v32 = vmul.f32 %v9135_v46, %v4562_v4 }
0x8d4a   :  { %4566 = vrot.lane.b32.xlu1 %v4564_v32, %s9164_s24 }
0x8d95   :  { %v7227_v19 = vpop.permute.xlu0 %7226 }
0x8d96   :  { %v7229_v20 = vmul.f32 %v9141_v18, %v7227_v19 }
0x8d98   :  { %7231 = vrot.lane.b32.xlu0 %v7229_v20, %s9167_s27 }
0x8dbc   :  { %v4567_v5 = vpop.permute.xlu1 %4566 }
0x8dbd   :  { %v4569_v23 = vadd.f32 %v9137_v40, %v4567_v5 }
0x8dbf   :  { %7254 = vrot.lane.b32.xlu1 %v4569_v23, %s9163_s29 }
0x8e0a   :  { %v7232_v26 = vpop.permute.xlu0 %7231 }
0x8e0b   :  { %v7234_v24 = vadd.f32 %v7232_v26, %v7143_v45 }
0x8e0d   :  { %9142 = vtanh.f32 %v7234_v24 }
0x8e17   :  { %v9143_v14 = vpop.eup %9142 }
0x8e18   :  { %v7236_v43 = vsub.f32 %v7069_v63, %v9143_v14 }
0x8e1a   :  { %7238 = vrot.lane.b32.xlu0 %v7236_v43, %s9169_s5 }
0x8e31   :  { %v7255_v28 = vpop.permute.xlu1 %7254 }
0x8e32   :  { %8555 = vmatmul.mubr.msk.f32.vlgmr.msra.gmra.mrb[78].mxu0 %vm1848_vm2, %v7255_v28 }
0x8e8c   :  { %v7239_v51 = vpop.permute.xlu0 %7238 }
0x8e8d   :  { %v7241_v31 = vmul.f32 %v9141_v18, %v7239_v51 }
0x8e8f   :  { %7243 = vrot.lane.b32.xlu0 %v7241_v31, %s9168_s28 }
0x8f01   :  { %v7244_v35 = vpop.permute.xlu0 %7243 }
0x8f02   :  { %v7246_v29 = vadd.f32 %v9143_v14, %v7244_v35 }
0x8f04   :  { %7248 = vrot.lane.b32.xlu0 %v7246_v29, %s9166_s7 }
0x8f05   :  { %v7324_v44 = vpop.f32.mrb[78].mxu0 }
0x8f06   :  { %v8556_v53 = vpop.f32.mrb[79].mxu0  ;;  %v7325_v62 = vadd.f32 %v9157_v15, %v7324_v44 }
0x8f76   :  { %v7249_v42 = vpop.permute.xlu0 %7248 }
0x8f77   :  { %7612 = vst.msk [vmem:[%s10466_s14 + $0x1c] sm:$0x3] %vm4773_vm5, %v7249_v42  ;;  %8560 = vmatmul.mubr.msk.f32.vlgmr.msra.gmra.mrb[78].mxu1 %vm4658_vm4, %v7249_v42 }
0x904a   :  { %v7396_v10 = vpop.f32.mrb[78].mxu1 }
0x904b   :  { %v7397_v37 = vadd.f32 %v10393_v60, %v7396_v10  ;;  %v8561_v11 = vpop.f32.mrb[79].mxu1 }
0x904d   :  { %7408 = vrot.lane.b32.xlu0 %v7397_v37, %s9166_s7  ;;  %v7400_v55 = vadd.f32 %v7397_v37, %v7325_v62 }
0x904f   :  { %v7616_v58 = vmul.f32 -1.442695, %v7400_v55 }
0x9051   :  { %9144 = vpow2.f32 %v7616_v58 }
0x905b   :  { %v9145_v9 = vpop.eup %9144 }
0x905c   :  { %v7404_v47 = vadd.f32 1.0, %v9145_v9 }
0x905e   :  { %9146 = vrcp.f32 %v7404_v47 }
0x9068   :  { %v9147_v48 = vpop.eup %9146 }
0x90bf   :  { %v7409_v8 = vpop.permute.xlu0 %7408 }
0x90c0   :  { %v7411_v52 = vmul.f32 %v9147_v48, %v7409_v8 }
0x90c2   :  { %7413 = vrot.lane.b32.xlu1 %v7411_v52, %s9167_s27 }
0x9134   :  { %v7414_v25 = vpop.permute.xlu1 %7413 }
0x9135   :  { %v7416_v54 = vadd.f32 %v7414_v25, %v7325_v62 }
0x9137   :  { %9148 = vtanh.f32 %v7416_v54 }
0x9141   :  { %v9149_v56 = vpop.eup %9148 }
0x9142   :  { %v7418_v60 = vsub.f32 %v7246_v29, %v9149_v56 }
0x9144   :  { %7420 = vrot.lane.b32.xlu0 %v7418_v60, %s9169_s5 }
0x91b6   :  { %v7421_v59 = vpop.permute.xlu0 %7420 }
0x91b7   :  { %v7423_v61 = vmul.f32 %v9147_v48, %v7421_v59 }
0x91b9   :  { %7425 = vrot.lane.b32.xlu1 %v7423_v61, %s9168_s28 }
0x922b   :  { %v7426_v38 = vpop.permute.xlu1 %7425 }
0x922c   :  { %v7428_v57 = vadd.f32 %v9149_v56, %v7426_v38 }
0x922e   :  { %7430 = vrot.lane.b32.xlu0 %v7428_v57, %s9166_s7 }
0x92a0   :  { %v7431_v63 = vpop.permute.xlu0 %7430 }
0x92a1   :  { %7617 = vst.msk [vmem:[%s10466_s14 + $0x1e] sm:$0x3] %vm4773_vm5, %v7431_v63 }

</bundles_post_ra>
